<compile_context>
chip_gen: v6e
topology: v6e:2x2x1
jax: 0.10.0
libtpu: 0.0.40
codegen_flags: <defaults>
</compile_context>

<pallas_src>
import functools
import numpy as np
import jax
import jax.numpy as jnp
from jax import lax
from jax.experimental import pallas as pl
from jax.experimental.pallas import tpu as pltpu

# ----------------------------------------------------------------------------
# Constants mirroring DiffusionModel.__init__ (no file I/O).
# ----------------------------------------------------------------------------
BIN_SIZE = 8e-12
C0 = 3.0e8
US_SCALE = 100.0
T0_SCALE = 1.0e9
N_DIPOLES = 20
CLAMP_TSHIFT = 8e-12          # torch.clamp(t - t0, 8e-12)
CLAMP_TC = 1e-14              # torch.clamp(t - t0, 1e-14)

LANES = 128
ROWS_PAD = 48                 # 48*128 = 6144 >= T = 4374 time samples
PRUNE_REL = 1e-10             # dipole-term pruning threshold (per review)
MAX_TERMS = 2 * (2 * N_DIPOLES + 1)   # 82


def _trapz(y, x):
    return float(np.sum(0.5 * (y[1:] + y[:-1]) * np.diff(x)))


def fresnel(n, theta_i):
    n0 = 1.0
    with np.errstate(invalid="ignore", divide="ignore"):
        theta_t = np.arcsin(n * np.sin(theta_i) / n0)
        R = 0.5 * (np.sin(theta_i - theta_t) ** 2 / np.sin(theta_i + theta_t) ** 2
                   + np.tan(theta_i - theta_t) ** 2 / np.tan(theta_i + theta_t) ** 2)
        R[theta_i == 0] = (n - n0) ** 2 / (n + n0) ** 2
        R[np.arcsin(np.minimum(n0 / n, 1.0)) < theta_i] = 1.0
    return R


def calculate_reflection_coeff(n1):
    theta = np.linspace(0.0, np.pi / 2, 501)
    c1 = abs(_trapz(fresnel(n1, theta) * np.sin(theta) * np.cos(theta), theta))
    theta = -np.linspace(-np.pi / 2, 0.0, 501)
    c2 = abs(_trapz(fresnel(n1, theta) * np.sin(theta) * np.cos(theta) ** 2, theta))
    return (3 * c2 + 2 * c1) / (3 * c2 - 2 * c1 + 2)


def make_time_vector():
    t = np.arange(1, 65536, dtype=np.float64) * BIN_SIZE
    t = t[t < 3.5e-8]          # -> 4374 samples, identical to the torch module
    return t.astype(np.float32)


def _detect_block_rows():
    # v5e / v6e have a single TensorCore: one (48,128) block, no extra grid
    # step overhead.  v7x has 2 TCs: split rows 2-way so "parallel" can shard.
    try:
        kind = jax.devices()[0].device_kind.lower()
    except Exception:
        return ROWS_PAD
    if "v7" in kind or "7x" in kind:
        return ROWS_PAD // 2
    return ROWS_PAD


BLOCK_ROWS = _detect_block_rows()
N_BLOCKS = ROWS_PAD // BLOCK_ROWS


# ----------------------------------------------------------------------------
# Pallas kernel factory.  One SMEM table per call, row b:
#   [ua*c, t0/t0_scale, log((4*pi*D*c)^-1.5), pad, w_0..w_{K-1}, a_0..a_{K-1}]
# where each surviving dipole term is  w * exp(a / tshift).
# Time values are generated in-kernel from the grid position (no time input).
# ----------------------------------------------------------------------------
def _make_kernel(K, block_rows):
    def kernel(tbl_ref, out_ref):
        b = pl.program_id(0)       # parameter-set index
        blk = pl.program_id(1)     # row-block index within the time slab

        ua_c = tbl_ref[b, 0]       # ua * c
        t0 = tbl_ref[b, 1]         # t0 / t0_scale  [s]
        ln_pref = tbl_ref[b, 2]    # log((4*pi*D*c) ** (-3/2))
        # Hoisted scalar reads; w/a pairs come from one SMEM base address.
        ws = [tbl_ref[b, 4 + i] for i in range(K)]
        aa = [tbl_ref[b, 4 + K + i] for i in range(K)]

        # t = (flat_index + 1) * bin_size, generated on-chip.
        row = lax.broadcasted_iota(jnp.int32, (block_rows, LANES), 0)
        col = lax.broadcasted_iota(jnp.int32, (block_rows, LANES), 1)
        k = (blk * block_rows + row) * LANES + col + 1
        t = k.astype(jnp.float32) * jnp.float32(BIN_SIZE)

        tmt0 = t - t0
        tshift = jnp.maximum(tmt0, jnp.float32(CLAMP_TSHIFT))
        # approx reciprocal (EUP vrcp) + one Newton refinement (2 VALU ops).
        r = pl.reciprocal(tshift, approx=True)
        inv_ts = r * (jnp.float32(2.0) - tshift * r)

        # K pruned image-dipole terms, statically unrolled: one exp each.
        acc = jnp.zeros((block_rows, LANES), jnp.float32)
        for w, a in zip(ws, aa):
            acc = acc + w * jnp.exp(a * inv_ts)

        # pref * clamp(t-t0,1e-14)^(-5/2) * exp(-ua*c*(t-t0)) as a single exp.
        tc = jnp.maximum(tmt0, jnp.float32(CLAMP_TC))
        logterm = ln_pref - jnp.float32(2.5) * jnp.log(tc) - ua_c * tmt0
        # Insurance: padded tail rows can never hit exp->inf (inf*0 -> NaN).
        logterm = jnp.minimum(logterm, jnp.float32(85.0))
        out_ref[...] = jnp.exp(logterm) * acc

    return kernel


@functools.lru_cache(maxsize=None)
def _get_call(B, K, block_rows):
    n_blocks = ROWS_PAD // block_rows
    kernel = _make_kernel(K, block_rows)
    return jax.jit(pl.pallas_call(
        kernel,
        out_shape=jax.ShapeDtypeStruct((B * ROWS_PAD, LANES), jnp.float32),
        grid_spec=pltpu.PrefetchScalarGridSpec(
            num_scalar_prefetch=0,
            grid=(B, n_blocks),
            in_specs=[pl.BlockSpec(memory_space=pltpu.MemorySpace.SMEM)],
            out_specs=pl.BlockSpec((block_rows, LANES),
                                   lambda b, i: (b * n_blocks + i, 0)),
        ),
        compiler_params=pltpu.CompilerParams(
            dimension_semantics=("parallel", "parallel")),
    ))


# ----------------------------------------------------------------------------
# Host precompute: build + prune the dipole terms for one parameter set.
# ----------------------------------------------------------------------------
def _dipole_terms(d, ua, us, t0, R, c, t_max):
    us_full = us * US_SCALE
    t0_s = t0 / T0_SCALE
    ze = (2.0 / 3.0) / us_full * (1.0 + R) / (1.0 - R)
    z0 = 1.0 / us_full
    D = 1.0 / (3.0 * (ua + us_full))
    d4c = 4.0 * D * c
    pref = (4.0 * np.pi * D * c) ** (-1.5)

    ii = np.arange(-N_DIPOLES, N_DIPOLES + 1, dtype=np.float64)
    z1 = d * (1.0 - 2.0 * ii) - 4.0 * ii * ze - z0
    z2 = d * (1.0 - 2.0 * ii) - (4.0 * ii - 2.0) * ze + z0
    w = np.concatenate([z1, -z2])                       # signed weights
    a = np.concatenate([-(z1 * z1) / d4c, -(z2 * z2) / d4c])   # exponent coeffs

    # Prune: bound each term's max relative contribution (vs the term with the
    # least-negative exponent) over the valid time range; max is at tshift_max.
    tshift_max = max(t_max - t0_s, CLAMP_TSHIFT)
    a_max = float(a.max())
    ref_w = abs(float(w[int(np.argmax(a))]))
    rel = np.abs(w) * np.exp((a - a_max) / tshift_max)
    keep = rel > PRUNE_REL * ref_w
    keep &= w != 0.0
    return (ua * c, t0_s, float(np.log(pref))), w[keep], a[keep]


# ----------------------------------------------------------------------------
# Wrappers mirroring DiffusionModel.forward(d, ua, us, t0).
# ----------------------------------------------------------------------------
def diffusion_forward_pallas_batched(param_sets, R, c, n_time):
    """param_sets: list of (d, ua, us, t0). Returns (B, 1, n_time) float32."""
    assert n_time <= ROWS_PAD * LANES
    B = len(param_sets)
    t_max = n_time * BIN_SIZE

    scal, ws, aas = [], [], []
    for (d, ua, us, t0) in param_sets:
        s, w, a = _dipole_terms(d, ua, us, t0, R, c, t_max)
        scal.append(s), ws.append(w), aas.append(a)

    kmax = max(len(w) for w in ws)
    # Bucket K to a multiple of 8 (min 8, cap 82) so kernel recompiles are rare.
    K = min(MAX_TERMS, max(8, ((kmax + 7) // 8) * 8))
    K = max(K, kmax)

    tbl = np.zeros((B, 4 + 2 * K), np.float32)          # zero pad: w=0, a=0 is inert
    for b in range(B):
        tbl[b, 0], tbl[b, 1], tbl[b, 2] = scal[b]
        kb = len(ws[b])
        tbl[b, 4:4 + kb] = ws[b]
        tbl[b, 4 + K:4 + K + kb] = aas[b]

    out = _get_call(B, K, BLOCK_ROWS)(jnp.asarray(tbl))
    model = out.reshape(B, ROWS_PAD * LANES)[:, :n_time]
    return model[:, None, :]                            # (B, 1, T)


def diffusion_forward_pallas(d, ua, us, t0, R, c, n_time):
    """Single forward(), shaped (1, 1, T) exactly like the torch module."""
    return diffusion_forward_pallas_batched([(d, ua, us, t0)], R, c, n_time)[0][None]


# ----------------------------------------------------------------------------
# Pure-JAX reference (literal port of DiffusionModel.forward) for validation.
# ----------------------------------------------------------------------------
def diffusion_forward_ref(t_np, d, ua, us, t0, R, c):
    t = jnp.asarray(t_np, jnp.float32)[None, :, None]
    us = us * US_SCALE
    t0 = t0 / T0_SCALE
    ze = 2.0 / 3.0 * 1.0 / us * (1.0 + R) / (1.0 - R)
    tshift = jnp.maximum(t - t0, 8e-12)
    z0 = 1.0 / us
    D = 1.0 / (3.0 * (ua + us))
    ii = jnp.arange(-N_DIPOLES, N_DIPOLES + 1, dtype=jnp.float32)[None, None, :]
    z1 = d * (1 - 2 * ii) - 4 * ii * ze - z0
    z2 = d * (1 - 2 * ii) - (4 * ii - 2) * ze + z0
    dip = (z1 * jnp.exp(-z1 ** 2 / (4 * D * c * tshift))
           - z2 * jnp.exp(-z2 ** 2 / (4 * D * c * tshift)))
    dip = jnp.sum(dip, axis=-1, keepdims=True)
    model = (4 * np.pi * D * c) ** (-1.5) \
            * jnp.maximum(t - t0, 1e-14) ** (-2.5) \
            * jnp.exp(-ua * c * (t - t0)) * dip
    return jnp.squeeze(model)[None, None, :]


if __name__ == "__main__":
    # Deterministic module-style constants.
    n_init = 1.0
    R = calculate_reflection_coeff(n_init)       # internal-reflection coeff (0 for n=1)
    c = C0 / n_init
    t_np = make_time_vector()                    # (4374,) time axis, as in the module
    T = t_np.shape[0]

    key = jax.random.PRNGKey(0)
    k1, k2, k3, k4, k5 = jax.random.split(key, 5)

    # --- single forward(), 2-inch slab (from self.thicknesses) ---------------
    d = 0.0254 * 2.0
    us = float(150.0 / US_SCALE + 0.2 * jax.random.uniform(k1))  # scaled reduced scattering
    ua = float(0.3 * jax.random.uniform(k2))                     # absorption coefficient
    t0 = float(1.0 * jax.random.uniform(k3))                     # time offset (pre t0_scale)

    out = diffusion_forward_pallas(d, ua, us, t0, R, c, T)
    out = np.asarray(jax.block_until_ready(out))
    assert out.shape == (1, 1, T)
    ref = np.asarray(diffusion_forward_ref(t_np, d, ua, us, t0, R, c))
    atol = 1e-4 * float(np.max(np.abs(ref)))
    np.testing.assert_allclose(out, ref, rtol=2e-2, atol=atol)

    # --- batched forward() over several slab thicknesses (fit-loop pattern) --
    thick = [2.0, 4.0, 8.0]
    uas = np.asarray(0.3 * jax.random.uniform(k4, (len(thick),)))
    t0s = np.asarray(1.0 * jax.random.uniform(k5, (len(thick),)))
    psets = [(0.0254 * th, float(uas[i]), us, float(t0s[i]))
             for i, th in enumerate(thick)]

    outb = diffusion_forward_pallas_batched(psets, R, c, T)
    outb = np.asarray(jax.block_until_ready(outb))
    assert outb.shape == (len(thick), 1, T)
    for i, (dd, uai, usi, t0i) in enumerate(psets):
        refi = np.asarray(diffusion_forward_ref(t_np, dd, uai, usi, t0i, R, c))
        atol_i = 1e-4 * float(np.max(np.abs(refi)))
        np.testing.assert_allclose(outb[i:i + 1], refi, rtol=2e-2, atol=atol_i)

    # TODO(synk): __init__'s load_impulse_response / preprocess_data (h5py
    # captures + F.conv1d with the measured laser impulse) are file-I/O setup,
    # not the forward pass, and are intentionally not reproduced here.
    print("KERNEL_OK")
</pallas_src>

<mosaic_0001>
module attributes {stable_mosaic.version = 11 : i64} {
  func.func @kernel(%arg0: i32, %arg1: i32, %arg2: memref<1x116xf32, #tpu.memory_space<smem>>, %arg3: memref<48x128xf32, #tpu.memory_space<vmem>>) attributes {dimension_semantics = [#tpu.dimension_semantics<parallel>, #tpu.dimension_semantics<parallel>], iteration_bounds = array<i64: 1, 1>, scalar_prefetch = 0 : i64, scratch_operands = 0 : i64, tpu.core_type = #tpu.core_type<tc>, window_params = [{transform_indices = @transform_0, window_bounds = array<i64: 1, 116>}, {transform_indices = @transform_1, window_bounds = array<i64: 48, 128>}]} {
    %0 = arith.index_cast %arg0 : i32 to index
    %c0 = arith.constant 0 : index
    %1 = memref.load %arg2[%0, %c0] : memref<1x116xf32, #tpu.memory_space<smem>>
    %2 = arith.index_cast %arg0 : i32 to index
    %c1 = arith.constant 1 : index
    %3 = memref.load %arg2[%2, %c1] : memref<1x116xf32, #tpu.memory_space<smem>>
    %4 = arith.index_cast %arg0 : i32 to index
    %c2 = arith.constant 2 : index
    %5 = memref.load %arg2[%4, %c2] : memref<1x116xf32, #tpu.memory_space<smem>>
    %6 = arith.index_cast %arg0 : i32 to index
    %c4 = arith.constant 4 : index
    %7 = memref.load %arg2[%6, %c4] : memref<1x116xf32, #tpu.memory_space<smem>>
    %8 = arith.index_cast %arg0 : i32 to index
    %c5 = arith.constant 5 : index
    %9 = memref.load %arg2[%8, %c5] : memref<1x116xf32, #tpu.memory_space<smem>>
    %10 = arith.index_cast %arg0 : i32 to index
    %c6 = arith.constant 6 : index
    %11 = memref.load %arg2[%10, %c6] : memref<1x116xf32, #tpu.memory_space<smem>>
    %12 = arith.index_cast %arg0 : i32 to index
    %c7 = arith.constant 7 : index
    %13 = memref.load %arg2[%12, %c7] : memref<1x116xf32, #tpu.memory_space<smem>>
    %14 = arith.index_cast %arg0 : i32 to index
    %c8 = arith.constant 8 : index
    %15 = memref.load %arg2[%14, %c8] : memref<1x116xf32, #tpu.memory_space<smem>>
    %16 = arith.index_cast %arg0 : i32 to index
    %c9 = arith.constant 9 : index
    %17 = memref.load %arg2[%16, %c9] : memref<1x116xf32, #tpu.memory_space<smem>>
    %18 = arith.index_cast %arg0 : i32 to index
    %c10 = arith.constant 10 : index
    %19 = memref.load %arg2[%18, %c10] : memref<1x116xf32, #tpu.memory_space<smem>>
    %20 = arith.index_cast %arg0 : i32 to index
    %c11 = arith.constant 11 : index
    %21 = memref.load %arg2[%20, %c11] : memref<1x116xf32, #tpu.memory_space<smem>>
    %22 = arith.index_cast %arg0 : i32 to index
    %c12 = arith.constant 12 : index
    %23 = memref.load %arg2[%22, %c12] : memref<1x116xf32, #tpu.memory_space<smem>>
    %24 = arith.index_cast %arg0 : i32 to index
    %c13 = arith.constant 13 : index
    %25 = memref.load %arg2[%24, %c13] : memref<1x116xf32, #tpu.memory_space<smem>>
    %26 = arith.index_cast %arg0 : i32 to index
    %c14 = arith.constant 14 : index
    %27 = memref.load %arg2[%26, %c14] : memref<1x116xf32, #tpu.memory_space<smem>>
    %28 = arith.index_cast %arg0 : i32 to index
    %c15 = arith.constant 15 : index
    %29 = memref.load %arg2[%28, %c15] : memref<1x116xf32, #tpu.memory_space<smem>>
    %30 = arith.index_cast %arg0 : i32 to index
    %c16 = arith.constant 16 : index
    %31 = memref.load %arg2[%30, %c16] : memref<1x116xf32, #tpu.memory_space<smem>>
    %32 = arith.index_cast %arg0 : i32 to index
    %c17 = arith.constant 17 : index
    %33 = memref.load %arg2[%32, %c17] : memref<1x116xf32, #tpu.memory_space<smem>>
    %34 = arith.index_cast %arg0 : i32 to index
    %c18 = arith.constant 18 : index
    %35 = memref.load %arg2[%34, %c18] : memref<1x116xf32, #tpu.memory_space<smem>>
    %36 = arith.index_cast %arg0 : i32 to index
    %c19 = arith.constant 19 : index
    %37 = memref.load %arg2[%36, %c19] : memref<1x116xf32, #tpu.memory_space<smem>>
    %38 = arith.index_cast %arg0 : i32 to index
    %c20 = arith.constant 20 : index
    %39 = memref.load %arg2[%38, %c20] : memref<1x116xf32, #tpu.memory_space<smem>>
    %40 = arith.index_cast %arg0 : i32 to index
    %c21 = arith.constant 21 : index
    %41 = memref.load %arg2[%40, %c21] : memref<1x116xf32, #tpu.memory_space<smem>>
    %42 = arith.index_cast %arg0 : i32 to index
    %c22 = arith.constant 22 : index
    %43 = memref.load %arg2[%42, %c22] : memref<1x116xf32, #tpu.memory_space<smem>>
    %44 = arith.index_cast %arg0 : i32 to index
    %c23 = arith.constant 23 : index
    %45 = memref.load %arg2[%44, %c23] : memref<1x116xf32, #tpu.memory_space<smem>>
    %46 = arith.index_cast %arg0 : i32 to index
    %c24 = arith.constant 24 : index
    %47 = memref.load %arg2[%46, %c24] : memref<1x116xf32, #tpu.memory_space<smem>>
    %48 = arith.index_cast %arg0 : i32 to index
    %c25 = arith.constant 25 : index
    %49 = memref.load %arg2[%48, %c25] : memref<1x116xf32, #tpu.memory_space<smem>>
    %50 = arith.index_cast %arg0 : i32 to index
    %c26 = arith.constant 26 : index
    %51 = memref.load %arg2[%50, %c26] : memref<1x116xf32, #tpu.memory_space<smem>>
    %52 = arith.index_cast %arg0 : i32 to index
    %c27 = arith.constant 27 : index
    %53 = memref.load %arg2[%52, %c27] : memref<1x116xf32, #tpu.memory_space<smem>>
    %54 = arith.index_cast %arg0 : i32 to index
    %c28 = arith.constant 28 : index
    %55 = memref.load %arg2[%54, %c28] : memref<1x116xf32, #tpu.memory_space<smem>>
    %56 = arith.index_cast %arg0 : i32 to index
    %c29 = arith.constant 29 : index
    %57 = memref.load %arg2[%56, %c29] : memref<1x116xf32, #tpu.memory_space<smem>>
    %58 = arith.index_cast %arg0 : i32 to index
    %c30 = arith.constant 30 : index
    %59 = memref.load %arg2[%58, %c30] : memref<1x116xf32, #tpu.memory_space<smem>>
    %60 = arith.index_cast %arg0 : i32 to index
    %c31 = arith.constant 31 : index
    %61 = memref.load %arg2[%60, %c31] : memref<1x116xf32, #tpu.memory_space<smem>>
    %62 = arith.index_cast %arg0 : i32 to index
    %c32 = arith.constant 32 : index
    %63 = memref.load %arg2[%62, %c32] : memref<1x116xf32, #tpu.memory_space<smem>>
    %64 = arith.index_cast %arg0 : i32 to index
    %c33 = arith.constant 33 : index
    %65 = memref.load %arg2[%64, %c33] : memref<1x116xf32, #tpu.memory_space<smem>>
    %66 = arith.index_cast %arg0 : i32 to index
    %c34 = arith.constant 34 : index
    %67 = memref.load %arg2[%66, %c34] : memref<1x116xf32, #tpu.memory_space<smem>>
    %68 = arith.index_cast %arg0 : i32 to index
    %c35 = arith.constant 35 : index
    %69 = memref.load %arg2[%68, %c35] : memref<1x116xf32, #tpu.memory_space<smem>>
    %70 = arith.index_cast %arg0 : i32 to index
    %c36 = arith.constant 36 : index
    %71 = memref.load %arg2[%70, %c36] : memref<1x116xf32, #tpu.memory_space<smem>>
    %72 = arith.index_cast %arg0 : i32 to index
    %c37 = arith.constant 37 : index
    %73 = memref.load %arg2[%72, %c37] : memref<1x116xf32, #tpu.memory_space<smem>>
    %74 = arith.index_cast %arg0 : i32 to index
    %c38 = arith.constant 38 : index
    %75 = memref.load %arg2[%74, %c38] : memref<1x116xf32, #tpu.memory_space<smem>>
    %76 = arith.index_cast %arg0 : i32 to index
    %c39 = arith.constant 39 : index
    %77 = memref.load %arg2[%76, %c39] : memref<1x116xf32, #tpu.memory_space<smem>>
    %78 = arith.index_cast %arg0 : i32 to index
    %c40 = arith.constant 40 : index
    %79 = memref.load %arg2[%78, %c40] : memref<1x116xf32, #tpu.memory_space<smem>>
    %80 = arith.index_cast %arg0 : i32 to index
    %c41 = arith.constant 41 : index
    %81 = memref.load %arg2[%80, %c41] : memref<1x116xf32, #tpu.memory_space<smem>>
    %82 = arith.index_cast %arg0 : i32 to index
    %c42 = arith.constant 42 : index
    %83 = memref.load %arg2[%82, %c42] : memref<1x116xf32, #tpu.memory_space<smem>>
    %84 = arith.index_cast %arg0 : i32 to index
    %c43 = arith.constant 43 : index
    %85 = memref.load %arg2[%84, %c43] : memref<1x116xf32, #tpu.memory_space<smem>>
    %86 = arith.index_cast %arg0 : i32 to index
    %c44 = arith.constant 44 : index
    %87 = memref.load %arg2[%86, %c44] : memref<1x116xf32, #tpu.memory_space<smem>>
    %88 = arith.index_cast %arg0 : i32 to index
    %c45 = arith.constant 45 : index
    %89 = memref.load %arg2[%88, %c45] : memref<1x116xf32, #tpu.memory_space<smem>>
    %90 = arith.index_cast %arg0 : i32 to index
    %c46 = arith.constant 46 : index
    %91 = memref.load %arg2[%90, %c46] : memref<1x116xf32, #tpu.memory_space<smem>>
    %92 = arith.index_cast %arg0 : i32 to index
    %c47 = arith.constant 47 : index
    %93 = memref.load %arg2[%92, %c47] : memref<1x116xf32, #tpu.memory_space<smem>>
    %94 = arith.index_cast %arg0 : i32 to index
    %c48 = arith.constant 48 : index
    %95 = memref.load %arg2[%94, %c48] : memref<1x116xf32, #tpu.memory_space<smem>>
    %96 = arith.index_cast %arg0 : i32 to index
    %c49 = arith.constant 49 : index
    %97 = memref.load %arg2[%96, %c49] : memref<1x116xf32, #tpu.memory_space<smem>>
    %98 = arith.index_cast %arg0 : i32 to index
    %c50 = arith.constant 50 : index
    %99 = memref.load %arg2[%98, %c50] : memref<1x116xf32, #tpu.memory_space<smem>>
    %100 = arith.index_cast %arg0 : i32 to index
    %c51 = arith.constant 51 : index
    %101 = memref.load %arg2[%100, %c51] : memref<1x116xf32, #tpu.memory_space<smem>>
    %102 = arith.index_cast %arg0 : i32 to index
    %c52 = arith.constant 52 : index
    %103 = memref.load %arg2[%102, %c52] : memref<1x116xf32, #tpu.memory_space<smem>>
    %104 = arith.index_cast %arg0 : i32 to index
    %c53 = arith.constant 53 : index
    %105 = memref.load %arg2[%104, %c53] : memref<1x116xf32, #tpu.memory_space<smem>>
    %106 = arith.index_cast %arg0 : i32 to index
    %c54 = arith.constant 54 : index
    %107 = memref.load %arg2[%106, %c54] : memref<1x116xf32, #tpu.memory_space<smem>>
    %108 = arith.index_cast %arg0 : i32 to index
    %c55 = arith.constant 55 : index
    %109 = memref.load %arg2[%108, %c55] : memref<1x116xf32, #tpu.memory_space<smem>>
    %110 = arith.index_cast %arg0 : i32 to index
    %c56 = arith.constant 56 : index
    %111 = memref.load %arg2[%110, %c56] : memref<1x116xf32, #tpu.memory_space<smem>>
    %112 = arith.index_cast %arg0 : i32 to index
    %c57 = arith.constant 57 : index
    %113 = memref.load %arg2[%112, %c57] : memref<1x116xf32, #tpu.memory_space<smem>>
    %114 = arith.index_cast %arg0 : i32 to index
    %c58 = arith.constant 58 : index
    %115 = memref.load %arg2[%114, %c58] : memref<1x116xf32, #tpu.memory_space<smem>>
    %116 = arith.index_cast %arg0 : i32 to index
    %c59 = arith.constant 59 : index
    %117 = memref.load %arg2[%116, %c59] : memref<1x116xf32, #tpu.memory_space<smem>>
    %118 = arith.index_cast %arg0 : i32 to index
    %c60 = arith.constant 60 : index
    %119 = memref.load %arg2[%118, %c60] : memref<1x116xf32, #tpu.memory_space<smem>>
    %120 = arith.index_cast %arg0 : i32 to index
    %c61 = arith.constant 61 : index
    %121 = memref.load %arg2[%120, %c61] : memref<1x116xf32, #tpu.memory_space<smem>>
    %122 = arith.index_cast %arg0 : i32 to index
    %c62 = arith.constant 62 : index
    %123 = memref.load %arg2[%122, %c62] : memref<1x116xf32, #tpu.memory_space<smem>>
    %124 = arith.index_cast %arg0 : i32 to index
    %c63 = arith.constant 63 : index
    %125 = memref.load %arg2[%124, %c63] : memref<1x116xf32, #tpu.memory_space<smem>>
    %126 = arith.index_cast %arg0 : i32 to index
    %c64 = arith.constant 64 : index
    %127 = memref.load %arg2[%126, %c64] : memref<1x116xf32, #tpu.memory_space<smem>>
    %128 = arith.index_cast %arg0 : i32 to index
    %c65 = arith.constant 65 : index
    %129 = memref.load %arg2[%128, %c65] : memref<1x116xf32, #tpu.memory_space<smem>>
    %130 = arith.index_cast %arg0 : i32 to index
    %c66 = arith.constant 66 : index
    %131 = memref.load %arg2[%130, %c66] : memref<1x116xf32, #tpu.memory_space<smem>>
    %132 = arith.index_cast %arg0 : i32 to index
    %c67 = arith.constant 67 : index
    %133 = memref.load %arg2[%132, %c67] : memref<1x116xf32, #tpu.memory_space<smem>>
    %134 = arith.index_cast %arg0 : i32 to index
    %c68 = arith.constant 68 : index
    %135 = memref.load %arg2[%134, %c68] : memref<1x116xf32, #tpu.memory_space<smem>>
    %136 = arith.index_cast %arg0 : i32 to index
    %c69 = arith.constant 69 : index
    %137 = memref.load %arg2[%136, %c69] : memref<1x116xf32, #tpu.memory_space<smem>>
    %138 = arith.index_cast %arg0 : i32 to index
    %c70 = arith.constant 70 : index
    %139 = memref.load %arg2[%138, %c70] : memref<1x116xf32, #tpu.memory_space<smem>>
    %140 = arith.index_cast %arg0 : i32 to index
    %c71 = arith.constant 71 : index
    %141 = memref.load %arg2[%140, %c71] : memref<1x116xf32, #tpu.memory_space<smem>>
    %142 = arith.index_cast %arg0 : i32 to index
    %c72 = arith.constant 72 : index
    %143 = memref.load %arg2[%142, %c72] : memref<1x116xf32, #tpu.memory_space<smem>>
    %144 = arith.index_cast %arg0 : i32 to index
    %c73 = arith.constant 73 : index
    %145 = memref.load %arg2[%144, %c73] : memref<1x116xf32, #tpu.memory_space<smem>>
    %146 = arith.index_cast %arg0 : i32 to index
    %c74 = arith.constant 74 : index
    %147 = memref.load %arg2[%146, %c74] : memref<1x116xf32, #tpu.memory_space<smem>>
    %148 = arith.index_cast %arg0 : i32 to index
    %c75 = arith.constant 75 : index
    %149 = memref.load %arg2[%148, %c75] : memref<1x116xf32, #tpu.memory_space<smem>>
    %150 = arith.index_cast %arg0 : i32 to index
    %c76 = arith.constant 76 : index
    %151 = memref.load %arg2[%150, %c76] : memref<1x116xf32, #tpu.memory_space<smem>>
    %152 = arith.index_cast %arg0 : i32 to index
    %c77 = arith.constant 77 : index
    %153 = memref.load %arg2[%152, %c77] : memref<1x116xf32, #tpu.memory_space<smem>>
    %154 = arith.index_cast %arg0 : i32 to index
    %c78 = arith.constant 78 : index
    %155 = memref.load %arg2[%154, %c78] : memref<1x116xf32, #tpu.memory_space<smem>>
    %156 = arith.index_cast %arg0 : i32 to index
    %c79 = arith.constant 79 : index
    %157 = memref.load %arg2[%156, %c79] : memref<1x116xf32, #tpu.memory_space<smem>>
    %158 = arith.index_cast %arg0 : i32 to index
    %c80 = arith.constant 80 : index
    %159 = memref.load %arg2[%158, %c80] : memref<1x116xf32, #tpu.memory_space<smem>>
    %160 = arith.index_cast %arg0 : i32 to index
    %c81 = arith.constant 81 : index
    %161 = memref.load %arg2[%160, %c81] : memref<1x116xf32, #tpu.memory_space<smem>>
    %162 = arith.index_cast %arg0 : i32 to index
    %c82 = arith.constant 82 : index
    %163 = memref.load %arg2[%162, %c82] : memref<1x116xf32, #tpu.memory_space<smem>>
    %164 = arith.index_cast %arg0 : i32 to index
    %c83 = arith.constant 83 : index
    %165 = memref.load %arg2[%164, %c83] : memref<1x116xf32, #tpu.memory_space<smem>>
    %166 = arith.index_cast %arg0 : i32 to index
    %c84 = arith.constant 84 : index
    %167 = memref.load %arg2[%166, %c84] : memref<1x116xf32, #tpu.memory_space<smem>>
    %168 = arith.index_cast %arg0 : i32 to index
    %c85 = arith.constant 85 : index
    %169 = memref.load %arg2[%168, %c85] : memref<1x116xf32, #tpu.memory_space<smem>>
    %170 = arith.index_cast %arg0 : i32 to index
    %c86 = arith.constant 86 : index
    %171 = memref.load %arg2[%170, %c86] : memref<1x116xf32, #tpu.memory_space<smem>>
    %172 = arith.index_cast %arg0 : i32 to index
    %c87 = arith.constant 87 : index
    %173 = memref.load %arg2[%172, %c87] : memref<1x116xf32, #tpu.memory_space<smem>>
    %174 = arith.index_cast %arg0 : i32 to index
    %c88 = arith.constant 88 : index
    %175 = memref.load %arg2[%174, %c88] : memref<1x116xf32, #tpu.memory_space<smem>>
    %176 = arith.index_cast %arg0 : i32 to index
    %c89 = arith.constant 89 : index
    %177 = memref.load %arg2[%176, %c89] : memref<1x116xf32, #tpu.memory_space<smem>>
    %178 = arith.index_cast %arg0 : i32 to index
    %c90 = arith.constant 90 : index
    %179 = memref.load %arg2[%178, %c90] : memref<1x116xf32, #tpu.memory_space<smem>>
    %180 = arith.index_cast %arg0 : i32 to index
    %c91 = arith.constant 91 : index
    %181 = memref.load %arg2[%180, %c91] : memref<1x116xf32, #tpu.memory_space<smem>>
    %182 = arith.index_cast %arg0 : i32 to index
    %c92 = arith.constant 92 : index
    %183 = memref.load %arg2[%182, %c92] : memref<1x116xf32, #tpu.memory_space<smem>>
    %184 = arith.index_cast %arg0 : i32 to index
    %c93 = arith.constant 93 : index
    %185 = memref.load %arg2[%184, %c93] : memref<1x116xf32, #tpu.memory_space<smem>>
    %186 = arith.index_cast %arg0 : i32 to index
    %c94 = arith.constant 94 : index
    %187 = memref.load %arg2[%186, %c94] : memref<1x116xf32, #tpu.memory_space<smem>>
    %188 = arith.index_cast %arg0 : i32 to index
    %c95 = arith.constant 95 : index
    %189 = memref.load %arg2[%188, %c95] : memref<1x116xf32, #tpu.memory_space<smem>>
    %190 = arith.index_cast %arg0 : i32 to index
    %c96 = arith.constant 96 : index
    %191 = memref.load %arg2[%190, %c96] : memref<1x116xf32, #tpu.memory_space<smem>>
    %192 = arith.index_cast %arg0 : i32 to index
    %c97 = arith.constant 97 : index
    %193 = memref.load %arg2[%192, %c97] : memref<1x116xf32, #tpu.memory_space<smem>>
    %194 = arith.index_cast %arg0 : i32 to index
    %c98 = arith.constant 98 : index
    %195 = memref.load %arg2[%194, %c98] : memref<1x116xf32, #tpu.memory_space<smem>>
    %196 = arith.index_cast %arg0 : i32 to index
    %c99 = arith.constant 99 : index
    %197 = memref.load %arg2[%196, %c99] : memref<1x116xf32, #tpu.memory_space<smem>>
    %198 = arith.index_cast %arg0 : i32 to index
    %c100 = arith.constant 100 : index
    %199 = memref.load %arg2[%198, %c100] : memref<1x116xf32, #tpu.memory_space<smem>>
    %200 = arith.index_cast %arg0 : i32 to index
    %c101 = arith.constant 101 : index
    %201 = memref.load %arg2[%200, %c101] : memref<1x116xf32, #tpu.memory_space<smem>>
    %202 = arith.index_cast %arg0 : i32 to index
    %c102 = arith.constant 102 : index
    %203 = memref.load %arg2[%202, %c102] : memref<1x116xf32, #tpu.memory_space<smem>>
    %204 = arith.index_cast %arg0 : i32 to index
    %c103 = arith.constant 103 : index
    %205 = memref.load %arg2[%204, %c103] : memref<1x116xf32, #tpu.memory_space<smem>>
    %206 = arith.index_cast %arg0 : i32 to index
    %c104 = arith.constant 104 : index
    %207 = memref.load %arg2[%206, %c104] : memref<1x116xf32, #tpu.memory_space<smem>>
    %208 = arith.index_cast %arg0 : i32 to index
    %c105 = arith.constant 105 : index
    %209 = memref.load %arg2[%208, %c105] : memref<1x116xf32, #tpu.memory_space<smem>>
    %210 = arith.index_cast %arg0 : i32 to index
    %c106 = arith.constant 106 : index
    %211 = memref.load %arg2[%210, %c106] : memref<1x116xf32, #tpu.memory_space<smem>>
    %212 = arith.index_cast %arg0 : i32 to index
    %c107 = arith.constant 107 : index
    %213 = memref.load %arg2[%212, %c107] : memref<1x116xf32, #tpu.memory_space<smem>>
    %214 = arith.index_cast %arg0 : i32 to index
    %c108 = arith.constant 108 : index
    %215 = memref.load %arg2[%214, %c108] : memref<1x116xf32, #tpu.memory_space<smem>>
    %216 = arith.index_cast %arg0 : i32 to index
    %c109 = arith.constant 109 : index
    %217 = memref.load %arg2[%216, %c109] : memref<1x116xf32, #tpu.memory_space<smem>>
    %218 = arith.index_cast %arg0 : i32 to index
    %c110 = arith.constant 110 : index
    %219 = memref.load %arg2[%218, %c110] : memref<1x116xf32, #tpu.memory_space<smem>>
    %220 = arith.index_cast %arg0 : i32 to index
    %c111 = arith.constant 111 : index
    %221 = memref.load %arg2[%220, %c111] : memref<1x116xf32, #tpu.memory_space<smem>>
    %222 = arith.index_cast %arg0 : i32 to index
    %c112 = arith.constant 112 : index
    %223 = memref.load %arg2[%222, %c112] : memref<1x116xf32, #tpu.memory_space<smem>>
    %224 = arith.index_cast %arg0 : i32 to index
    %c113 = arith.constant 113 : index
    %225 = memref.load %arg2[%224, %c113] : memref<1x116xf32, #tpu.memory_space<smem>>
    %226 = arith.index_cast %arg0 : i32 to index
    %c114 = arith.constant 114 : index
    %227 = memref.load %arg2[%226, %c114] : memref<1x116xf32, #tpu.memory_space<smem>>
    %228 = arith.index_cast %arg0 : i32 to index
    %c115 = arith.constant 115 : index
    %229 = memref.load %arg2[%228, %c115] : memref<1x116xf32, #tpu.memory_space<smem>>
    %230 = tpu.iota {dimensions = array<i32: 0>} : vector<48x128xi32>
    %231 = tpu.iota {dimensions = array<i32: 1>} : vector<48x128xi32>
    %c48_i32 = arith.constant 48 : i32
    %232 = arith.muli %arg1, %c48_i32 : i32
    %233 = vector.broadcast %232 : i32 to vector<48x128xi32>
    %234 = arith.addi %233, %230 : vector<48x128xi32>
    %c128_i32 = arith.constant 128 : i32
    %235 = vector.broadcast %c128_i32 : i32 to vector<48x128xi32>
    %236 = arith.muli %234, %235 : vector<48x128xi32>
    %237 = arith.addi %236, %231 : vector<48x128xi32>
    %c1_i32 = arith.constant 1 : i32
    %238 = vector.broadcast %c1_i32 : i32 to vector<48x128xi32>
    %239 = arith.addi %237, %238 : vector<48x128xi32>
    %240 = arith.sitofp %239 : vector<48x128xi32> to vector<48x128xf32>
    %cst = arith.constant 8.000000e-12 : f32
    %241 = vector.broadcast %cst : f32 to vector<48x128xf32>
    %242 = arith.mulf %240, %241 : vector<48x128xf32>
    %243 = vector.broadcast %3 : f32 to vector<48x128xf32>
    %244 = arith.subf %242, %243 : vector<48x128xf32>
    %cst_0 = arith.constant 8.000000e-12 : f32
    %245 = vector.broadcast %cst_0 : f32 to vector<48x128xf32>
    %246 = arith.maximumf %244, %245 : vector<48x128xf32>
    %247 = tpu.reciprocal %246 {approx = true} : vector<48x128xf32> -> vector<48x128xf32>
    %248 = arith.mulf %246, %247 : vector<48x128xf32>
    %cst_1 = arith.constant 2.000000e+00 : f32
    %249 = vector.broadcast %cst_1 : f32 to vector<48x128xf32>
    %250 = arith.subf %249, %248 : vector<48x128xf32>
    %251 = arith.mulf %247, %250 : vector<48x128xf32>
    %cst_2 = arith.constant 0.000000e+00 : f32
    %252 = vector.broadcast %cst_2 : f32 to vector<48x128xf32>
    %253 = vector.broadcast %119 : f32 to vector<48x128xf32>
    %254 = arith.mulf %253, %251 : vector<48x128xf32>
    %255 = math.exp %254 : vector<48x128xf32>
    %256 = vector.broadcast %7 : f32 to vector<48x128xf32>
    %257 = arith.mulf %256, %255 : vector<48x128xf32>
    %258 = arith.addf %252, %257 : vector<48x128xf32>
    %259 = vector.broadcast %121 : f32 to vector<48x128xf32>
    %260 = arith.mulf %259, %251 : vector<48x128xf32>
    %261 = math.exp %260 : vector<48x128xf32>
    %262 = vector.broadcast %9 : f32 to vector<48x128xf32>
    %263 = arith.mulf %262, %261 : vector<48x128xf32>
    %264 = arith.addf %258, %263 : vector<48x128xf32>
    %265 = vector.broadcast %123 : f32 to vector<48x128xf32>
    %266 = arith.mulf %265, %251 : vector<48x128xf32>
    %267 = math.exp %266 : vector<48x128xf32>
    %268 = vector.broadcast %11 : f32 to vector<48x128xf32>
    %269 = arith.mulf %268, %267 : vector<48x128xf32>
    %270 = arith.addf %264, %269 : vector<48x128xf32>
    %271 = vector.broadcast %125 : f32 to vector<48x128xf32>
    %272 = arith.mulf %271, %251 : vector<48x128xf32>
    %273 = math.exp %272 : vector<48x128xf32>
    %274 = vector.broadcast %13 : f32 to vector<48x128xf32>
    %275 = arith.mulf %274, %273 : vector<48x128xf32>
    %276 = arith.addf %270, %275 : vector<48x128xf32>
    %277 = vector.broadcast %127 : f32 to vector<48x128xf32>
    %278 = arith.mulf %277, %251 : vector<48x128xf32>
    %279 = math.exp %278 : vector<48x128xf32>
    %280 = vector.broadcast %15 : f32 to vector<48x128xf32>
    %281 = arith.mulf %280, %279 : vector<48x128xf32>
    %282 = arith.addf %276, %281 : vector<48x128xf32>
    %283 = vector.broadcast %129 : f32 to vector<48x128xf32>
    %284 = arith.mulf %283, %251 : vector<48x128xf32>
    %285 = math.exp %284 : vector<48x128xf32>
    %286 = vector.broadcast %17 : f32 to vector<48x128xf32>
    %287 = arith.mulf %286, %285 : vector<48x128xf32>
    %288 = arith.addf %282, %287 : vector<48x128xf32>
    %289 = vector.broadcast %131 : f32 to vector<48x128xf32>
    %290 = arith.mulf %289, %251 : vector<48x128xf32>
    %291 = math.exp %290 : vector<48x128xf32>
    %292 = vector.broadcast %19 : f32 to vector<48x128xf32>
    %293 = arith.mulf %292, %291 : vector<48x128xf32>
    %294 = arith.addf %288, %293 : vector<48x128xf32>
    %295 = vector.broadcast %133 : f32 to vector<48x128xf32>
    %296 = arith.mulf %295, %251 : vector<48x128xf32>
    %297 = math.exp %296 : vector<48x128xf32>
    %298 = vector.broadcast %21 : f32 to vector<48x128xf32>
    %299 = arith.mulf %298, %297 : vector<48x128xf32>
    %300 = arith.addf %294, %299 : vector<48x128xf32>
    %301 = vector.broadcast %135 : f32 to vector<48x128xf32>
    %302 = arith.mulf %301, %251 : vector<48x128xf32>
    %303 = math.exp %302 : vector<48x128xf32>
    %304 = vector.broadcast %23 : f32 to vector<48x128xf32>
    %305 = arith.mulf %304, %303 : vector<48x128xf32>
    %306 = arith.addf %300, %305 : vector<48x128xf32>
    %307 = vector.broadcast %137 : f32 to vector<48x128xf32>
    %308 = arith.mulf %307, %251 : vector<48x128xf32>
    %309 = math.exp %308 : vector<48x128xf32>
    %310 = vector.broadcast %25 : f32 to vector<48x128xf32>
    %311 = arith.mulf %310, %309 : vector<48x128xf32>
    %312 = arith.addf %306, %311 : vector<48x128xf32>
    %313 = vector.broadcast %139 : f32 to vector<48x128xf32>
    %314 = arith.mulf %313, %251 : vector<48x128xf32>
    %315 = math.exp %314 : vector<48x128xf32>
    %316 = vector.broadcast %27 : f32 to vector<48x128xf32>
    %317 = arith.mulf %316, %315 : vector<48x128xf32>
    %318 = arith.addf %312, %317 : vector<48x128xf32>
    %319 = vector.broadcast %141 : f32 to vector<48x128xf32>
    %320 = arith.mulf %319, %251 : vector<48x128xf32>
    %321 = math.exp %320 : vector<48x128xf32>
    %322 = vector.broadcast %29 : f32 to vector<48x128xf32>
    %323 = arith.mulf %322, %321 : vector<48x128xf32>
    %324 = arith.addf %318, %323 : vector<48x128xf32>
    %325 = vector.broadcast %143 : f32 to vector<48x128xf32>
    %326 = arith.mulf %325, %251 : vector<48x128xf32>
    %327 = math.exp %326 : vector<48x128xf32>
    %328 = vector.broadcast %31 : f32 to vector<48x128xf32>
    %329 = arith.mulf %328, %327 : vector<48x128xf32>
    %330 = arith.addf %324, %329 : vector<48x128xf32>
    %331 = vector.broadcast %145 : f32 to vector<48x128xf32>
    %332 = arith.mulf %331, %251 : vector<48x128xf32>
    %333 = math.exp %332 : vector<48x128xf32>
    %334 = vector.broadcast %33 : f32 to vector<48x128xf32>
    %335 = arith.mulf %334, %333 : vector<48x128xf32>
    %336 = arith.addf %330, %335 : vector<48x128xf32>
    %337 = vector.broadcast %147 : f32 to vector<48x128xf32>
    %338 = arith.mulf %337, %251 : vector<48x128xf32>
    %339 = math.exp %338 : vector<48x128xf32>
    %340 = vector.broadcast %35 : f32 to vector<48x128xf32>
    %341 = arith.mulf %340, %339 : vector<48x128xf32>
    %342 = arith.addf %336, %341 : vector<48x128xf32>
    %343 = vector.broadcast %149 : f32 to vector<48x128xf32>
    %344 = arith.mulf %343, %251 : vector<48x128xf32>
    %345 = math.exp %344 : vector<48x128xf32>
    %346 = vector.broadcast %37 : f32 to vector<48x128xf32>
    %347 = arith.mulf %346, %345 : vector<48x128xf32>
    %348 = arith.addf %342, %347 : vector<48x128xf32>
    %349 = vector.broadcast %151 : f32 to vector<48x128xf32>
    %350 = arith.mulf %349, %251 : vector<48x128xf32>
    %351 = math.exp %350 : vector<48x128xf32>
    %352 = vector.broadcast %39 : f32 to vector<48x128xf32>
    %353 = arith.mulf %352, %351 : vector<48x128xf32>
    %354 = arith.addf %348, %353 : vector<48x128xf32>
    %355 = vector.broadcast %153 : f32 to vector<48x128xf32>
    %356 = arith.mulf %355, %251 : vector<48x128xf32>
    %357 = math.exp %356 : vector<48x128xf32>
    %358 = vector.broadcast %41 : f32 to vector<48x128xf32>
    %359 = arith.mulf %358, %357 : vector<48x128xf32>
    %360 = arith.addf %354, %359 : vector<48x128xf32>
    %361 = vector.broadcast %155 : f32 to vector<48x128xf32>
    %362 = arith.mulf %361, %251 : vector<48x128xf32>
    %363 = math.exp %362 : vector<48x128xf32>
    %364 = vector.broadcast %43 : f32 to vector<48x128xf32>
    %365 = arith.mulf %364, %363 : vector<48x128xf32>
    %366 = arith.addf %360, %365 : vector<48x128xf32>
    %367 = vector.broadcast %157 : f32 to vector<48x128xf32>
    %368 = arith.mulf %367, %251 : vector<48x128xf32>
    %369 = math.exp %368 : vector<48x128xf32>
    %370 = vector.broadcast %45 : f32 to vector<48x128xf32>
    %371 = arith.mulf %370, %369 : vector<48x128xf32>
    %372 = arith.addf %366, %371 : vector<48x128xf32>
    %373 = vector.broadcast %159 : f32 to vector<48x128xf32>
    %374 = arith.mulf %373, %251 : vector<48x128xf32>
    %375 = math.exp %374 : vector<48x128xf32>
    %376 = vector.broadcast %47 : f32 to vector<48x128xf32>
    %377 = arith.mulf %376, %375 : vector<48x128xf32>
    %378 = arith.addf %372, %377 : vector<48x128xf32>
    %379 = vector.broadcast %161 : f32 to vector<48x128xf32>
    %380 = arith.mulf %379, %251 : vector<48x128xf32>
    %381 = math.exp %380 : vector<48x128xf32>
    %382 = vector.broadcast %49 : f32 to vector<48x128xf32>
    %383 = arith.mulf %382, %381 : vector<48x128xf32>
    %384 = arith.addf %378, %383 : vector<48x128xf32>
    %385 = vector.broadcast %163 : f32 to vector<48x128xf32>
    %386 = arith.mulf %385, %251 : vector<48x128xf32>
    %387 = math.exp %386 : vector<48x128xf32>
    %388 = vector.broadcast %51 : f32 to vector<48x128xf32>
    %389 = arith.mulf %388, %387 : vector<48x128xf32>
    %390 = arith.addf %384, %389 : vector<48x128xf32>
    %391 = vector.broadcast %165 : f32 to vector<48x128xf32>
    %392 = arith.mulf %391, %251 : vector<48x128xf32>
    %393 = math.exp %392 : vector<48x128xf32>
    %394 = vector.broadcast %53 : f32 to vector<48x128xf32>
    %395 = arith.mulf %394, %393 : vector<48x128xf32>
    %396 = arith.addf %390, %395 : vector<48x128xf32>
    %397 = vector.broadcast %167 : f32 to vector<48x128xf32>
    %398 = arith.mulf %397, %251 : vector<48x128xf32>
    %399 = math.exp %398 : vector<48x128xf32>
    %400 = vector.broadcast %55 : f32 to vector<48x128xf32>
    %401 = arith.mulf %400, %399 : vector<48x128xf32>
    %402 = arith.addf %396, %401 : vector<48x128xf32>
    %403 = vector.broadcast %169 : f32 to vector<48x128xf32>
    %404 = arith.mulf %403, %251 : vector<48x128xf32>
    %405 = math.exp %404 : vector<48x128xf32>
    %406 = vector.broadcast %57 : f32 to vector<48x128xf32>
    %407 = arith.mulf %406, %405 : vector<48x128xf32>
    %408 = arith.addf %402, %407 : vector<48x128xf32>
    %409 = vector.broadcast %171 : f32 to vector<48x128xf32>
    %410 = arith.mulf %409, %251 : vector<48x128xf32>
    %411 = math.exp %410 : vector<48x128xf32>
    %412 = vector.broadcast %59 : f32 to vector<48x128xf32>
    %413 = arith.mulf %412, %411 : vector<48x128xf32>
    %414 = arith.addf %408, %413 : vector<48x128xf32>
    %415 = vector.broadcast %173 : f32 to vector<48x128xf32>
    %416 = arith.mulf %415, %251 : vector<48x128xf32>
    %417 = math.exp %416 : vector<48x128xf32>
    %418 = vector.broadcast %61 : f32 to vector<48x128xf32>
    %419 = arith.mulf %418, %417 : vector<48x128xf32>
    %420 = arith.addf %414, %419 : vector<48x128xf32>
    %421 = vector.broadcast %175 : f32 to vector<48x128xf32>
    %422 = arith.mulf %421, %251 : vector<48x128xf32>
    %423 = math.exp %422 : vector<48x128xf32>
    %424 = vector.broadcast %63 : f32 to vector<48x128xf32>
    %425 = arith.mulf %424, %423 : vector<48x128xf32>
    %426 = arith.addf %420, %425 : vector<48x128xf32>
    %427 = vector.broadcast %177 : f32 to vector<48x128xf32>
    %428 = arith.mulf %427, %251 : vector<48x128xf32>
    %429 = math.exp %428 : vector<48x128xf32>
    %430 = vector.broadcast %65 : f32 to vector<48x128xf32>
    %431 = arith.mulf %430, %429 : vector<48x128xf32>
    %432 = arith.addf %426, %431 : vector<48x128xf32>
    %433 = vector.broadcast %179 : f32 to vector<48x128xf32>
    %434 = arith.mulf %433, %251 : vector<48x128xf32>
    %435 = math.exp %434 : vector<48x128xf32>
    %436 = vector.broadcast %67 : f32 to vector<48x128xf32>
    %437 = arith.mulf %436, %435 : vector<48x128xf32>
    %438 = arith.addf %432, %437 : vector<48x128xf32>
    %439 = vector.broadcast %181 : f32 to vector<48x128xf32>
    %440 = arith.mulf %439, %251 : vector<48x128xf32>
    %441 = math.exp %440 : vector<48x128xf32>
    %442 = vector.broadcast %69 : f32 to vector<48x128xf32>
    %443 = arith.mulf %442, %441 : vector<48x128xf32>
    %444 = arith.addf %438, %443 : vector<48x128xf32>
    %445 = vector.broadcast %183 : f32 to vector<48x128xf32>
    %446 = arith.mulf %445, %251 : vector<48x128xf32>
    %447 = math.exp %446 : vector<48x128xf32>
    %448 = vector.broadcast %71 : f32 to vector<48x128xf32>
    %449 = arith.mulf %448, %447 : vector<48x128xf32>
    %450 = arith.addf %444, %449 : vector<48x128xf32>
    %451 = vector.broadcast %185 : f32 to vector<48x128xf32>
    %452 = arith.mulf %451, %251 : vector<48x128xf32>
    %453 = math.exp %452 : vector<48x128xf32>
    %454 = vector.broadcast %73 : f32 to vector<48x128xf32>
    %455 = arith.mulf %454, %453 : vector<48x128xf32>
    %456 = arith.addf %450, %455 : vector<48x128xf32>
    %457 = vector.broadcast %187 : f32 to vector<48x128xf32>
    %458 = arith.mulf %457, %251 : vector<48x128xf32>
    %459 = math.exp %458 : vector<48x128xf32>
    %460 = vector.broadcast %75 : f32 to vector<48x128xf32>
    %461 = arith.mulf %460, %459 : vector<48x128xf32>
    %462 = arith.addf %456, %461 : vector<48x128xf32>
    %463 = vector.broadcast %189 : f32 to vector<48x128xf32>
    %464 = arith.mulf %463, %251 : vector<48x128xf32>
    %465 = math.exp %464 : vector<48x128xf32>
    %466 = vector.broadcast %77 : f32 to vector<48x128xf32>
    %467 = arith.mulf %466, %465 : vector<48x128xf32>
    %468 = arith.addf %462, %467 : vector<48x128xf32>
    %469 = vector.broadcast %191 : f32 to vector<48x128xf32>
    %470 = arith.mulf %469, %251 : vector<48x128xf32>
    %471 = math.exp %470 : vector<48x128xf32>
    %472 = vector.broadcast %79 : f32 to vector<48x128xf32>
    %473 = arith.mulf %472, %471 : vector<48x128xf32>
    %474 = arith.addf %468, %473 : vector<48x128xf32>
    %475 = vector.broadcast %193 : f32 to vector<48x128xf32>
    %476 = arith.mulf %475, %251 : vector<48x128xf32>
    %477 = math.exp %476 : vector<48x128xf32>
    %478 = vector.broadcast %81 : f32 to vector<48x128xf32>
    %479 = arith.mulf %478, %477 : vector<48x128xf32>
    %480 = arith.addf %474, %479 : vector<48x128xf32>
    %481 = vector.broadcast %195 : f32 to vector<48x128xf32>
    %482 = arith.mulf %481, %251 : vector<48x128xf32>
    %483 = math.exp %482 : vector<48x128xf32>
    %484 = vector.broadcast %83 : f32 to vector<48x128xf32>
    %485 = arith.mulf %484, %483 : vector<48x128xf32>
    %486 = arith.addf %480, %485 : vector<48x128xf32>
    %487 = vector.broadcast %197 : f32 to vector<48x128xf32>
    %488 = arith.mulf %487, %251 : vector<48x128xf32>
    %489 = math.exp %488 : vector<48x128xf32>
    %490 = vector.broadcast %85 : f32 to vector<48x128xf32>
    %491 = arith.mulf %490, %489 : vector<48x128xf32>
    %492 = arith.addf %486, %491 : vector<48x128xf32>
    %493 = vector.broadcast %199 : f32 to vector<48x128xf32>
    %494 = arith.mulf %493, %251 : vector<48x128xf32>
    %495 = math.exp %494 : vector<48x128xf32>
    %496 = vector.broadcast %87 : f32 to vector<48x128xf32>
    %497 = arith.mulf %496, %495 : vector<48x128xf32>
    %498 = arith.addf %492, %497 : vector<48x128xf32>
    %499 = vector.broadcast %201 : f32 to vector<48x128xf32>
    %500 = arith.mulf %499, %251 : vector<48x128xf32>
    %501 = math.exp %500 : vector<48x128xf32>
    %502 = vector.broadcast %89 : f32 to vector<48x128xf32>
    %503 = arith.mulf %502, %501 : vector<48x128xf32>
    %504 = arith.addf %498, %503 : vector<48x128xf32>
    %505 = vector.broadcast %203 : f32 to vector<48x128xf32>
    %506 = arith.mulf %505, %251 : vector<48x128xf32>
    %507 = math.exp %506 : vector<48x128xf32>
    %508 = vector.broadcast %91 : f32 to vector<48x128xf32>
    %509 = arith.mulf %508, %507 : vector<48x128xf32>
    %510 = arith.addf %504, %509 : vector<48x128xf32>
    %511 = vector.broadcast %205 : f32 to vector<48x128xf32>
    %512 = arith.mulf %511, %251 : vector<48x128xf32>
    %513 = math.exp %512 : vector<48x128xf32>
    %514 = vector.broadcast %93 : f32 to vector<48x128xf32>
    %515 = arith.mulf %514, %513 : vector<48x128xf32>
    %516 = arith.addf %510, %515 : vector<48x128xf32>
    %517 = vector.broadcast %207 : f32 to vector<48x128xf32>
    %518 = arith.mulf %517, %251 : vector<48x128xf32>
    %519 = math.exp %518 : vector<48x128xf32>
    %520 = vector.broadcast %95 : f32 to vector<48x128xf32>
    %521 = arith.mulf %520, %519 : vector<48x128xf32>
    %522 = arith.addf %516, %521 : vector<48x128xf32>
    %523 = vector.broadcast %209 : f32 to vector<48x128xf32>
    %524 = arith.mulf %523, %251 : vector<48x128xf32>
    %525 = math.exp %524 : vector<48x128xf32>
    %526 = vector.broadcast %97 : f32 to vector<48x128xf32>
    %527 = arith.mulf %526, %525 : vector<48x128xf32>
    %528 = arith.addf %522, %527 : vector<48x128xf32>
    %529 = vector.broadcast %211 : f32 to vector<48x128xf32>
    %530 = arith.mulf %529, %251 : vector<48x128xf32>
    %531 = math.exp %530 : vector<48x128xf32>
    %532 = vector.broadcast %99 : f32 to vector<48x128xf32>
    %533 = arith.mulf %532, %531 : vector<48x128xf32>
    %534 = arith.addf %528, %533 : vector<48x128xf32>
    %535 = vector.broadcast %213 : f32 to vector<48x128xf32>
    %536 = arith.mulf %535, %251 : vector<48x128xf32>
    %537 = math.exp %536 : vector<48x128xf32>
    %538 = vector.broadcast %101 : f32 to vector<48x128xf32>
    %539 = arith.mulf %538, %537 : vector<48x128xf32>
    %540 = arith.addf %534, %539 : vector<48x128xf32>
    %541 = vector.broadcast %215 : f32 to vector<48x128xf32>
    %542 = arith.mulf %541, %251 : vector<48x128xf32>
    %543 = math.exp %542 : vector<48x128xf32>
    %544 = vector.broadcast %103 : f32 to vector<48x128xf32>
    %545 = arith.mulf %544, %543 : vector<48x128xf32>
    %546 = arith.addf %540, %545 : vector<48x128xf32>
    %547 = vector.broadcast %217 : f32 to vector<48x128xf32>
    %548 = arith.mulf %547, %251 : vector<48x128xf32>
    %549 = math.exp %548 : vector<48x128xf32>
    %550 = vector.broadcast %105 : f32 to vector<48x128xf32>
    %551 = arith.mulf %550, %549 : vector<48x128xf32>
    %552 = arith.addf %546, %551 : vector<48x128xf32>
    %553 = vector.broadcast %219 : f32 to vector<48x128xf32>
    %554 = arith.mulf %553, %251 : vector<48x128xf32>
    %555 = math.exp %554 : vector<48x128xf32>
    %556 = vector.broadcast %107 : f32 to vector<48x128xf32>
    %557 = arith.mulf %556, %555 : vector<48x128xf32>
    %558 = arith.addf %552, %557 : vector<48x128xf32>
    %559 = vector.broadcast %221 : f32 to vector<48x128xf32>
    %560 = arith.mulf %559, %251 : vector<48x128xf32>
    %561 = math.exp %560 : vector<48x128xf32>
    %562 = vector.broadcast %109 : f32 to vector<48x128xf32>
    %563 = arith.mulf %562, %561 : vector<48x128xf32>
    %564 = arith.addf %558, %563 : vector<48x128xf32>
    %565 = vector.broadcast %223 : f32 to vector<48x128xf32>
    %566 = arith.mulf %565, %251 : vector<48x128xf32>
    %567 = math.exp %566 : vector<48x128xf32>
    %568 = vector.broadcast %111 : f32 to vector<48x128xf32>
    %569 = arith.mulf %568, %567 : vector<48x128xf32>
    %570 = arith.addf %564, %569 : vector<48x128xf32>
    %571 = vector.broadcast %225 : f32 to vector<48x128xf32>
    %572 = arith.mulf %571, %251 : vector<48x128xf32>
    %573 = math.exp %572 : vector<48x128xf32>
    %574 = vector.broadcast %113 : f32 to vector<48x128xf32>
    %575 = arith.mulf %574, %573 : vector<48x128xf32>
    %576 = arith.addf %570, %575 : vector<48x128xf32>
    %577 = vector.broadcast %227 : f32 to vector<48x128xf32>
    %578 = arith.mulf %577, %251 : vector<48x128xf32>
    %579 = math.exp %578 : vector<48x128xf32>
    %580 = vector.broadcast %115 : f32 to vector<48x128xf32>
    %581 = arith.mulf %580, %579 : vector<48x128xf32>
    %582 = arith.addf %576, %581 : vector<48x128xf32>
    %583 = vector.broadcast %229 : f32 to vector<48x128xf32>
    %584 = arith.mulf %583, %251 : vector<48x128xf32>
    %585 = math.exp %584 : vector<48x128xf32>
    %586 = vector.broadcast %117 : f32 to vector<48x128xf32>
    %587 = arith.mulf %586, %585 : vector<48x128xf32>
    %588 = arith.addf %582, %587 : vector<48x128xf32>
    %cst_3 = arith.constant 9.99999982E-15 : f32
    %589 = vector.broadcast %cst_3 : f32 to vector<48x128xf32>
    %590 = arith.maximumf %244, %589 : vector<48x128xf32>
    %591 = math.log %590 : vector<48x128xf32>
    %cst_4 = arith.constant 2.500000e+00 : f32
    %592 = vector.broadcast %cst_4 : f32 to vector<48x128xf32>
    %593 = arith.mulf %592, %591 : vector<48x128xf32>
    %594 = vector.broadcast %5 : f32 to vector<48x128xf32>
    %595 = arith.subf %594, %593 : vector<48x128xf32>
    %596 = vector.broadcast %1 : f32 to vector<48x128xf32>
    %597 = arith.mulf %596, %244 : vector<48x128xf32>
    %598 = arith.subf %595, %597 : vector<48x128xf32>
    %cst_5 = arith.constant 8.500000e+01 : f32
    %599 = vector.broadcast %cst_5 : f32 to vector<48x128xf32>
    %600 = arith.minimumf %598, %599 : vector<48x128xf32>
    %601 = math.exp %600 : vector<48x128xf32>
    %602 = arith.mulf %601, %588 : vector<48x128xf32>
    %c0_6 = arith.constant 0 : index
    %c0_7 = arith.constant 0 : index
    %603 = vector.load %arg3[%c0_6, %c0_7] : memref<48x128xf32, #tpu.memory_space<vmem>>, vector<48x128xf32>
    tpu.vector_store %arg3[%c0_6, %c0_7], %602 {strides = array<i32>} : memref<48x128xf32, #tpu.memory_space<vmem>>, vector<48x128xf32>,
    return
  }
  func.func @transform_0(%arg0: i32, %arg1: i32) -> (i32, i32) {
    %c0_i32 = arith.constant 0 : i32
    %c0_i32_0 = arith.constant 0 : i32
    %c0_i32_1 = arith.constant 0 : i32
    return %c0_i32, %c0_i32_0 : i32, i32
  }
  func.func @transform_1(%arg0: i32, %arg1: i32) -> (i32, i32) {
    %c1_i32 = arith.constant 1 : i32
    %0 = arith.muli %arg0, %c1_i32 : i32
    %1 = arith.addi %0, %arg1 : i32
    %c0_i32 = arith.constant 0 : i32
    %c0_i32_0 = arith.constant 0 : i32
    return %1, %c0_i32 : i32, i32
  }
}

</mosaic_0001>

<bundles_post_ra>
// kernel: tpu_custom_call.1
= control target key start
LH: loop header
LB: loop body
LE: loop exit
PB: predicated region body
PF: predicated region fallthrough
CT: control target
= control target key end

     0   :  { %6 = vsyncpa [#allocation4], 0  ;;  %s4191_s0 = inlined_call_operand.hbm [shape: f32[1,116], index: 0, kind: input, shape index: {}]   ;;  %s4192_s1 = inlined_call_operand.hbm [shape: f32[48,128], index: 1, kind: output, shape index: {}]  }
   0x1   :  { %7 = vsyncpa [#allocation3], 0  ;;  %s3081_s6 = smov [#allocation2]  }
   0x2   :  { %15 = dma.hbm_to_smem %s4191_s0, 16, %s3081_s6, [#allocation4]  }
   0x3   :  { %3077 = dma.done.wait [#allocation4], 16  }
   0x4   :  { %3078 = vsyncadd [#allocation4], 4294967280 }
   0x5   :  { %19 = sfence }
   0x6   :  { %v252_v0 = vlaneseq  ;;  %s2223_s0 = sld [smem:[#allocation2 + $0x1]] }
   0x7   :  { %s2281_s9 = sld [smem:[#allocation2 + $0x3c]] }
   0x8   :  { %v253_v1 = vshrl.u32 %v252_v0, 7  ;;  %v260_v6 = vand.u32 127, %v252_v0  ;;  %s2282_s10 = sld [smem:[#allocation2 + $0x3d]] }
   0x9   :  { %s3124_s11 = sld [smem:[#allocation2 + $0x4]] }
   0xa   :  { %v254_v2 = vadd.s32 8, %v253_v1  ;;  %v255_v3 = vadd.s32 16, %v253_v1  ;;  %v256_v4 = vadd.s32 24, %v253_v1  ;;  %v257_v5 = vadd.s32 32, %v253_v1  ;;  %s2283_s12 = sld [smem:[#allocation2 + $0x3e]] }
   0xb   :  { %v269_v7 = vmul.u32 128, %v253_v1  ;;  %v258_v8 = vadd.s32 40, %v253_v1  ;;  %s3132_s13 = sld [smem:[#allocation2 + $0x5]] }
   0xc   :  { %v270_v9 = vmul.u32 128, %v254_v2  ;;  %v271_v10 = vmul.u32 128, %v255_v3  ;;  %v299_v34 = vstv %s2223_s0  ;;  %s3135_s14 = sld [smem:[#allocation2 + $0x6]] }
   0xd   :  { %v272_v11 = vmul.u32 128, %v256_v4  ;;  %v273_v12 = vmul.u32 128, %v257_v5  ;;  %v275_v13 = vadd.s32 %v269_v7, %v260_v6  ;;  %v336_v7 = vstv %s2281_s9  ;;  %s3138_s15 = sld [smem:[#allocation2 + $0x7]] }
   0xe   :  { %v274_v14 = vmul.u32 128, %v258_v8  ;;  %v276_v15 = vadd.s32 %v270_v9, %v260_v6  ;;  %v277_v16 = vadd.s32 %v271_v10, %v260_v6  ;;  %s3141_s16 = sld [smem:[#allocation2 + $0x8]] }
   0xf   :  { %v278_v17 = vadd.s32 %v272_v11, %v260_v6  ;;  %v279_v18 = vadd.s32 %v273_v12, %v260_v6  ;;  %v281_v19 = vadd.s32 1, %v275_v13  ;;  %s3144_s17 = sld [smem:[#allocation2 + $0x9]] }
  0x10   :  { %v280_v20 = vadd.s32 %v274_v14, %v260_v6  ;;  %v282_v21 = vadd.s32 1, %v276_v15  ;;  %v283_v22 = vadd.s32 1, %v277_v16  ;;  %v368_v16 = vstv %s2282_s10  ;;  %s3147_s18 = sld [smem:[#allocation2 + $0x3f]] }
  0x11   :  { %v284_v23 = vadd.s32 1, %v278_v17  ;;  %v285_v24 = vadd.s32 1, %v279_v18  ;;  %v287_v25 = vcvt.s32.f32 %v281_v19  ;;  %s3150_s19 = sld [smem:[#allocation2 + $0xa]] }
  0x12   :  { %v286_v26 = vadd.s32 1, %v280_v20  ;;  %v288_v27 = vcvt.s32.f32 %v282_v21  ;;  %v289_v28 = vcvt.s32.f32 %v283_v22  ;;  %s3153_s20 = sld [smem:[#allocation2 + $0xb]] }
  0x13   :  { %v290_v29 = vcvt.s32.f32 %v284_v23  ;;  %v291_v30 = vcvt.s32.f32 %v285_v24  ;;  %v293_v31 = vmul.f32 8e-12, %v287_v25  ;;  %s3156_s21 = sld [smem:[#allocation2 + $0xc]] }
  0x14   :  { %v292_v32 = vcvt.s32.f32 %v286_v26  ;;  %v294_v33 = vmul.f32 8e-12, %v288_v27  ;;  %v295_v35 = vmul.f32 8e-12, %v289_v28  ;;  %s3162_s22 = sld [smem:[#allocation2 + $0xd]] }
  0x15   :  { %v296_v36 = vmul.f32 8e-12, %v290_v29  ;;  %v297_v37 = vmul.f32 8e-12, %v291_v30  ;;  %v3098_v38 = vsub.f32 %v293_v31, %v299_v34  ;;  %v400_v29 = vstv %s2283_s12  ;;  %s3168_s23 = sld [smem:[#allocation2 + $0x40]] }
  0x16   :  { %v298_v39 = vmul.f32 8e-12, %v292_v32  ;;  %v3100_v40 = vsub.f32 %v294_v33, %v299_v34  ;;  %v3102_v41 = vsub.f32 %v295_v35, %v299_v34  ;;  %v3159_v30 = vstv %s3124_s11  ;;  %s3174_s24 = sld [smem:[#allocation2 + $0xe]] }
  0x17   :  { %v3104_v42 = vsub.f32 %v296_v36, %v299_v34  ;;  %v3106_v43 = vsub.f32 %v297_v37, %v299_v34  ;;  %v306_v44 = vmax.f32 %v3098_v38, 8e-12  ;;  %v3166_v35 = vstv %s3132_s13  ;;  %s3201_s25 = sld [smem:[#allocation2 + $0x41]] }
  0x18   :  { %v3109_v45 = vsub.f32 %v298_v39, %v299_v34  ;;  %v307_v46 = vmax.f32 %v3100_v40, 8e-12  ;;  %v308_v47 = vmax.f32 %v3102_v41, 8e-12  ;;  %v3172_v39 = vstv %s3135_s14  ;;  %s3213_s26 = sld [smem:[#allocation2 + $0x42]] }
  0x19   :  { %v309_v48 = vmax.f32 %v3104_v42, 8e-12  ;;  %v310_v49 = vmax.f32 %v3106_v43, 8e-12  ;;  %2341 = vrcp.f32 %v306_v44  ;;  %s3246_s27 = sld [smem:[#allocation2 + $0x43]] }
  0x1a   :  { %v311_v50 = vmax.f32 %v3109_v45, 8e-12  ;;  %2343 = vrcp.f32 %v307_v46  ;;  %s3266_s28 = sld [smem:[#allocation2 + $0xf]] }
  0x1b   :  { %2345 = vrcp.f32 %v308_v47  ;;  %s3270_s29 = sld [smem:[#allocation2 + $0x44]] }
  0x1c   :  { %2347 = vrcp.f32 %v309_v48  ;;  %s3282_s30 = sld [smem:[#allocation2 + $0x10]] }
  0x1d   :  { %2349 = vrcp.f32 %v310_v49  ;;  %s3286_s2 = sld [smem:[#allocation2 + $0x11]] }
  0x1e   :  { %2351 = vrcp.f32 %v311_v50  ;;  %s3294_s3 = sld [smem:[#allocation2 + $0x45]] }
  0x1f   :  { %s3312_s4 = sld [smem:[#allocation2 + $0x46]] }
  0x20   :  { %s3328_s5 = sld [smem:[#allocation2 + $0x47]] }
  0x21   :  { %s3338_s6 = sld [smem:[#allocation2 + $0x48]] }
  0x22   :  { %s3356_s7 = sld [smem:[#allocation2 + $0x49]] }
  0x23   :  { %s3373_s8 = sld [smem:[#allocation2 + $0x12]] }
  0x24   :  { %s3377_s0 = sld [smem:[#allocation2 + $0x4a]] }
  0x25   :  { %s3381_s9 = sld [smem:[#allocation2 + $0x13]] }
  0x26   :  { %v2342_v51 = vpop.eup %2341  ;;  %s3398_s10 = sld [smem:[#allocation2 + $0x4b]] }
  0x27   :  { %v2344_v52 = vpop.eup %2343  ;;  %v318_v55 = vmul.f32 %v2342_v51, %v306_v44  ;;  %s3415_s11 = sld [smem:[#allocation2 + $0x4c]] }
  0x28   :  { %v2346_v53 = vpop.eup %2345  ;;  %v319_v57 = vmul.f32 %v2344_v52, %v307_v46  ;;  %s3430_s12 = sld [smem:[#allocation2 + $0x4d]] }
  0x29   :  { %v2348_v54 = vpop.eup %2347  ;;  %v320_v59 = vmul.f32 %v2346_v53, %v308_v47  ;;  %v324_v62 = vsub.f32 2.0, %v318_v55  ;;  %v3178_v47 = vstv %s3138_s15  ;;  %s3445_s13 = sld [smem:[#allocation2 + $0x4e]] }
  0x2a   :  { %v2350_v56 = vpop.eup %2349  ;;  %v321_v60 = vmul.f32 %v2348_v54, %v309_v48  ;;  %v325_v0 = vsub.f32 2.0, %v319_v57  ;;  %s3449_s14 = sld [smem:[#allocation2 + $0x14]] }
  0x2b   :  { %v2352_v58 = vpop.eup %2351  ;;  %v322_v61 = vmul.f32 %v2350_v56, %v310_v49  ;;  %v326_v1 = vsub.f32 2.0, %v320_v59  ;;  %v3116_v4 = vmul.f32 %v2342_v51, %v324_v62  ;;  %v3181_v49 = vstv %s3141_s16  ;;  %s3462_s15 = sld [smem:[#allocation2 + $0x4f]] }
  0x2c   :  { %v323_v63 = vmul.f32 %v2352_v58, %v311_v50  ;;  %v327_v2 = vsub.f32 2.0, %v321_v60  ;;  %v3118_v6 = vmul.f32 %v2344_v52, %v325_v0  ;;  %v3184_v50 = vstv %s3144_s17  ;;  %s3470_s16 = sld [smem:[#allocation2 + $0x15]] }
  0x2d   :  { %v328_v3 = vsub.f32 2.0, %v322_v61  ;;  %v3120_v8 = vmul.f32 %v2346_v53, %v326_v1  ;;  %v337_v11 = vmul.f32 %v336_v7, %v3116_v4  ;;  %v369_v22 = vmul.f32 %v368_v16, %v3116_v4  ;;  %s3482_s17 = sld [smem:[#allocation2 + $0x50]] }
  0x2e   :  { %v329_v5 = vsub.f32 2.0, %v323_v63  ;;  %v3122_v9 = vmul.f32 %v2348_v54, %v327_v2  ;;  %v338_v13 = vmul.f32 %v336_v7, %v3118_v6  ;;  %v370_v24 = vmul.f32 %v368_v16, %v3118_v6 }
  0x2f   :  { %v3126_v10 = vmul.f32 %v2350_v56, %v328_v3  ;;  %v339_v14 = vmul.f32 %v336_v7, %v3120_v8  ;;  %v343_v18 = vmul.f32 1.442695, %v337_v11  ;;  %v371_v26 = vmul.f32 %v368_v16, %v3120_v8 }
  0x30   :  { %v3129_v12 = vmul.f32 %v2352_v58, %v329_v5  ;;  %v340_v15 = vmul.f32 %v336_v7, %v3122_v9  ;;  %v345_v20 = vmul.f32 1.442695, %v338_v13  ;;  %v372_v28 = vmul.f32 %v368_v16, %v3122_v9 }
  0x31   :  { %v341_v17 = vmul.f32 %v336_v7, %v3126_v10  ;;  %v347_v21 = vmul.f32 1.442695, %v339_v14  ;;  %2353 = vpow2.f32 %v343_v18  ;;  %v373_v31 = vmul.f32 %v368_v16, %v3126_v10 }
  0x32   :  { %v342_v19 = vmul.f32 %v336_v7, %v3129_v12  ;;  %v349_v23 = vmul.f32 1.442695, %v340_v15  ;;  %2355 = vpow2.f32 %v345_v20  ;;  %v375_v32 = vmul.f32 1.442695, %v369_v22 }
  0x33   :  { %v351_v25 = vmul.f32 1.442695, %v341_v17  ;;  %2357 = vpow2.f32 %v347_v21  ;;  %v374_v33 = vmul.f32 %v368_v16, %v3129_v12  ;;  %v377_v34 = vmul.f32 1.442695, %v370_v24 }
  0x34   :  { %v353_v27 = vmul.f32 1.442695, %v342_v19  ;;  %2359 = vpow2.f32 %v349_v23  ;;  %v379_v36 = vmul.f32 1.442695, %v371_v26  ;;  %v401_v37 = vmul.f32 %v400_v29, %v3116_v4 }
  0x35   :  { %2361 = vpow2.f32 %v351_v25  ;;  %v381_v44 = vmul.f32 1.442695, %v372_v28  ;;  %v402_v46 = vmul.f32 %v400_v29, %v3118_v6  ;;  %v383_v48 = vmul.f32 1.442695, %v373_v31 }
  0x36   :  { %2363 = vpow2.f32 %v353_v27  ;;  %v385_v51 = vmul.f32 1.442695, %v374_v33  ;;  %v403_v52 = vmul.f32 %v400_v29, %v3120_v8  ;;  %v432_v53 = vstv %s3147_s18  ;;  %s3487_s18 = sld [smem:[#allocation2 + $0x16]] }
  0x37   :  { %2365 = vpow2.f32 %v375_v32  ;;  %v404_v54 = vmul.f32 %v400_v29, %v3122_v9  ;;  %v407_v55 = vmul.f32 1.442695, %v401_v37  ;;  %v3190_v56 = vstv %s3150_s19  ;;  %s3505_s19 = sld [smem:[#allocation2 + $0x17]] }
  0x38   :  { %2367 = vpow2.f32 %v377_v34  ;;  %v405_v57 = vmul.f32 %v400_v29, %v3126_v10  ;;  %v409_v58 = vmul.f32 1.442695, %v402_v46  ;;  %v3194_v59 = vstv %s3153_s20  ;;  %s3508_s20 = sld [smem:[#allocation2 + $0x51]] }
  0x39   :  { %2369 = vpow2.f32 %v379_v36  ;;  %v406_v60 = vmul.f32 %v400_v29, %v3129_v12  ;;  %v433_v61 = vmul.f32 %v432_v53, %v3116_v4  ;;  %v3199_v62 = vstv %s3156_s21  ;;  %s3521_s21 = sld [smem:[#allocation2 + $0x18]] }
  0x3a   :  { %2371 = vpow2.f32 %v381_v44  ;;  %v411_v63 = vmul.f32 1.442695, %v403_v52  ;;  %v434_v0 = vmul.f32 %v432_v53, %v3118_v6  ;;  %v3205_v1 = vstv %s3162_s22  ;;  %s3527_s22 = sld [smem:[#allocation2 + $0x52]] }
  0x3b   :  { %2373 = vpow2.f32 %v383_v48  ;;  %v413_v2 = vmul.f32 1.442695, %v404_v54  ;;  %v435_v3 = vmul.f32 %v432_v53, %v3120_v8  ;;  %v464_v5 = vstv %s3168_s23  ;;  %s3541_s23 = sld [smem:[#allocation2 + $0x19]] }
  0x3c   :  { %2375 = vpow2.f32 %v385_v51  ;;  %v415_v11 = vmul.f32 1.442695, %v405_v57  ;;  %v436_v13 = vmul.f32 %v432_v53, %v3122_v9  ;;  %v3211_v14 = vstv %s3174_s24  ;;  %s3549_s24 = sld [smem:[#allocation2 + $0x53]] }
  0x3d   :  { %2377 = vpow2.f32 %v407_v55  ;;  %v417_v16 = vmul.f32 1.442695, %v406_v60  ;;  %v437_v17 = vmul.f32 %v432_v53, %v3126_v10  ;;  %v438_v18 = vmul.f32 %v432_v53, %v3129_v12 }
  0x3e   :  { %v2354_v7 = vpop.eup %2353  ;;  %2379 = vpow2.f32 %v409_v58  ;;  %v439_v19 = vmul.f32 1.442695, %v433_v61  ;;  %v441_v21 = vmul.f32 1.442695, %v434_v0  ;;  %v465_v22 = vmul.f32 %v464_v5, %v3116_v4 }
  0x3f   :  { %v2356_v15 = vpop.eup %2355  ;;  %2381 = vpow2.f32 %v411_v63  ;;  %v466_v23 = vmul.f32 %v464_v5, %v3118_v6  ;;  %v443_v25 = vmul.f32 1.442695, %v435_v3  ;;  %v467_v26 = vmul.f32 %v464_v5, %v3120_v8 }
  0x40   :  { %v2358_v20 = vpop.eup %2357  ;;  %2383 = vpow2.f32 %v413_v2  ;;  %v468_v27 = vmul.f32 %v464_v5, %v3122_v9  ;;  %v445_v29 = vmul.f32 1.442695, %v436_v13  ;;  %v469_v31 = vmul.f32 %v464_v5, %v3126_v10 }
  0x41   :  { %v2360_v24 = vpop.eup %2359  ;;  %2385 = vpow2.f32 %v415_v11  ;;  %v470_v32 = vmul.f32 %v464_v5, %v3129_v12  ;;  %v356_v34 = vmul.f32 %v2354_v7, %v3159_v30  ;;  %v447_v36 = vmul.f32 1.442695, %v437_v17 }
  0x42   :  { %v2362_v28 = vpop.eup %2361  ;;  %2387 = vpow2.f32 %v417_v16  ;;  %v449_v37 = vmul.f32 1.442695, %v438_v18  ;;  %v471_v46 = vmul.f32 1.442695, %v465_v22  ;;  %v473_v48 = vmul.f32 1.442695, %v466_v23 }
  0x43   :  { %v2364_v33 = vpop.eup %2363  ;;  %2389 = vpow2.f32 %v439_v19  ;;  %v496_v51 = vstv %s3201_s25  ;;  %v357_v53 = vmul.f32 %v2356_v15, %v3159_v30  ;;  %v358_v54 = vmul.f32 %v2358_v20, %v3159_v30  ;;  %s3562_s25 = sld [smem:[#allocation2 + $0x54]] }
  0x44   :  { %v2366_v44 = vpop.eup %2365  ;;  %v475_v55 = vmul.f32 1.442695, %v467_v26  ;;  %v477_v57 = vmul.f32 1.442695, %v468_v27  ;;  %v359_v60 = vmul.f32 %v2360_v24, %v3159_v30  ;;  %2391 = vpow2.f32 %v441_v21 }
  0x45   :  { %v2368_v52 = vpop.eup %2367  ;;  %v479_v61 = vmul.f32 1.442695, %v469_v31  ;;  %v481_v63 = vmul.f32 1.442695, %v470_v32  ;;  %2393 = vpow2.f32 %v443_v25  ;;  %v497_v2 = vmul.f32 %v496_v51, %v3116_v4 }
  0x46   :  { %v2370_v58 = vpop.eup %2369  ;;  %v498_v3 = vmul.f32 %v496_v51, %v3118_v6  ;;  %v3231_v5 = vstv %s3213_s26  ;;  %v360_v11 = vmul.f32 %v2362_v28, %v3159_v30  ;;  %v361_v13 = vmul.f32 %v2364_v33, %v3159_v30  ;;  %s3571_s26 = sld [smem:[#allocation2 + $0x1a]] }
  0x47   :  { %v2372_v0 = vpop.eup %2371  ;;  %v388_v15 = vmul.f32 %v2366_v44, %v3166_v35  ;;  %2395 = vpow2.f32 %v445_v29  ;;  %v389_v17 = vmul.f32 %v2368_v52, %v3166_v35  ;;  %v499_v18 = vmul.f32 %v496_v51, %v3120_v8 }
  0x48   :  { %v2374_v7 = vpop.eup %2373  ;;  %2397 = vpow2.f32 %v447_v36  ;;  %v500_v19 = vmul.f32 %v496_v51, %v3122_v9  ;;  %v390_v21 = vmul.f32 %v2370_v58, %v3166_v35  ;;  %v501_v22 = vmul.f32 %v496_v51, %v3126_v10 }
  0x49   :  { %v2376_v16 = vpop.eup %2375  ;;  %2399 = vpow2.f32 %v449_v37  ;;  %v502_v23 = vmul.f32 %v496_v51, %v3129_v12  ;;  %v391_v24 = vmul.f32 %v2372_v0, %v3166_v35  ;;  %v503_v25 = vmul.f32 1.442695, %v497_v2 }
  0x4a   :  { %v2378_v20 = vpop.eup %2377  ;;  %2401 = vpow2.f32 %v471_v46  ;;  %v505_v26 = vmul.f32 1.442695, %v498_v3  ;;  %v392_v27 = vmul.f32 %v2374_v7, %v3166_v35  ;;  %v393_v28 = vmul.f32 %v2376_v16, %v3166_v35 }
  0x4b   :  { %v2380_v30 = vpop.eup %2379  ;;  %v394_v29 = vadd.f32 %v388_v15, %v356_v34  ;;  %2403 = vpow2.f32 %v473_v48  ;;  %v395_v32 = vadd.f32 %v389_v17, %v357_v53  ;;  %v420_v33 = vmul.f32 %v2378_v20, %v3172_v39 }
  0x4c   :  { %v2382_v31 = vpop.eup %2381  ;;  %2405 = vpow2.f32 %v475_v55  ;;  %v507_v36 = vmul.f32 1.442695, %v499_v18  ;;  %v396_v44 = vadd.f32 %v390_v21, %v358_v54  ;;  %v421_v46 = vmul.f32 %v2380_v30, %v3172_v39 }
  0x4d   :  { %v2384_v37 = vpop.eup %2383  ;;  %2407 = vpow2.f32 %v477_v57  ;;  %v509_v51 = vmul.f32 1.442695, %v500_v19  ;;  %v397_v58 = vadd.f32 %v391_v24, %v359_v60  ;;  %v511_v35 = vmul.f32 1.442695, %v501_v22 }
  0x4e   :  { %v2386_v52 = vpop.eup %2385  ;;  %2409 = vpow2.f32 %v479_v61  ;;  %v513_v34 = vmul.f32 1.442695, %v502_v23  ;;  %v398_v0 = vadd.f32 %v392_v27, %v360_v11  ;;  %v399_v53 = vadd.f32 %v393_v28, %v361_v13 }
  0x4f   :  { %v2388_v48 = vpop.eup %2387  ;;  %2411 = vpow2.f32 %v481_v63  ;;  %v529_v55 = vmul.f32 %v3231_v5, %v3116_v4  ;;  %v422_v3 = vmul.f32 %v2382_v31, %v3172_v39  ;;  %v426_v54 = vadd.f32 %v420_v33, %v394_v29 }
  0x50   :  { %v2390_v2 = vpop.eup %2389  ;;  %2413 = vpow2.f32 %v503_v25  ;;  %v530_v57 = vmul.f32 %v3231_v5, %v3118_v6  ;;  %v423_v60 = vmul.f32 %v2384_v37, %v3172_v39  ;;  %v427_v61 = vadd.f32 %v421_v46, %v395_v32 }
  0x51   :  { %2415 = vpow2.f32 %v505_v26  ;;  %v531_v7 = vmul.f32 %v3231_v5, %v3120_v8  ;;  %v2392_v11 = vpop.eup %2391  ;;  %v424_v63 = vmul.f32 %v2386_v52, %v3172_v39  ;;  %v532_v13 = vmul.f32 %v3231_v5, %v3122_v9 }
  0x52   :  { %2417 = vpow2.f32 %v507_v36  ;;  %v533_v15 = vmul.f32 %v3231_v5, %v3126_v10  ;;  %v2394_v16 = vpop.eup %2393  ;;  %v425_v17 = vmul.f32 %v2388_v48, %v3172_v39  ;;  %v452_v18 = vmul.f32 %v2390_v2, %v3178_v47 }
  0x53   :  { %2419 = vpow2.f32 %v509_v51  ;;  %v535_v19 = vmul.f32 1.442695, %v529_v55  ;;  %v428_v21 = vadd.f32 %v422_v3, %v396_v44  ;;  %v534_v22 = vmul.f32 %v3231_v5, %v3129_v12 }
  0x54   :  { %v2396_v20 = vpop.eup %2395  ;;  %2421 = vpow2.f32 %v511_v35  ;;  %v537_v23 = vmul.f32 1.442695, %v530_v57  ;;  %v429_v24 = vadd.f32 %v423_v60, %v397_v58  ;;  %v453_v25 = vmul.f32 %v2392_v11, %v3178_v47 }
  0x55   :  { %v2398_v30 = vpop.eup %2397  ;;  %v539_v26 = vmul.f32 1.442695, %v531_v7  ;;  %v560_v27 = vstv %s3246_s27  ;;  %v430_v28 = vadd.f32 %v424_v63, %v398_v0  ;;  %v454_v29 = vmul.f32 %v2394_v16, %v3178_v47  ;;  %s3584_s27 = sld [smem:[#allocation2 + $0x55]] }
  0x56   :  { %v2400_v39 = vpop.eup %2399  ;;  %2423 = vpow2.f32 %v513_v34  ;;  %v541_v31 = vmul.f32 1.442695, %v532_v13  ;;  %v431_v33 = vadd.f32 %v425_v17, %v399_v53  ;;  %v458_v5 = vadd.f32 %v452_v18, %v426_v54 }
  0x57   :  { %v2402_v32 = vpop.eup %2401  ;;  %2425 = vpow2.f32 %v535_v19  ;;  %v543_v36 = vmul.f32 1.442695, %v533_v15  ;;  %v455_v44 = vmul.f32 %v2396_v20, %v3178_v47  ;;  %v545_v46 = vmul.f32 1.442695, %v534_v22 }
  0x58   :  { %v2404_v37 = vpop.eup %2403  ;;  %2427 = vpow2.f32 %v537_v23  ;;  %v561_v51 = vmul.f32 %v560_v27, %v3116_v4  ;;  %v456_v58 = vmul.f32 %v2398_v30, %v3178_v47  ;;  %v459_v35 = vadd.f32 %v453_v25, %v427_v61 }
  0x59   :  { %v2406_v52 = vpop.eup %2405  ;;  %2429 = vpow2.f32 %v539_v26  ;;  %v562_v34 = vmul.f32 %v560_v27, %v3118_v6  ;;  %v457_v0 = vmul.f32 %v2400_v39, %v3178_v47  ;;  %v460_v53 = vadd.f32 %v454_v29, %v428_v21 }
  0x5a   :  { %v2408_v48 = vpop.eup %2407  ;;  %2431 = vpow2.f32 %v541_v31  ;;  %v563_v55 = vmul.f32 %v560_v27, %v3120_v8  ;;  %v484_v3 = vmul.f32 %v2402_v32, %v3181_v49  ;;  %v485_v54 = vmul.f32 %v2404_v37, %v3181_v49 }
  0x5b   :  { %v2410_v2 = vpop.eup %2409  ;;  %2433 = vpow2.f32 %v543_v36  ;;  %v564_v57 = vmul.f32 %v560_v27, %v3122_v9  ;;  %v486_v61 = vmul.f32 %v2406_v52, %v3181_v49  ;;  %v565_v47 = vmul.f32 %v560_v27, %v3126_v10 }
  0x5c   :  { %v2412_v60 = vpop.eup %2411  ;;  %2435 = vpow2.f32 %v545_v46  ;;  %v567_v7 = vmul.f32 1.442695, %v561_v51  ;;  %v461_v63 = vadd.f32 %v455_v44, %v429_v24  ;;  %v487_v13 = vmul.f32 %v2408_v48, %v3181_v49 }
  0x5d   :  { %v2414_v11 = vpop.eup %2413  ;;  %v569_v15 = vmul.f32 1.442695, %v562_v34  ;;  %v3290_v16 = vstv %s3266_s28  ;;  %v462_v18 = vadd.f32 %v456_v58, %v430_v28  ;;  %v488_v19 = vmul.f32 %v2410_v2, %v3181_v49  ;;  %s3590_s28 = sld [smem:[#allocation2 + $0x1b]] }
  0x5e   :  { %v2416_v17 = vpop.eup %2415  ;;  %v571_v20 = vmul.f32 1.442695, %v563_v55  ;;  %v592_v21 = vstv %s3270_s29  ;;  %v463_v23 = vadd.f32 %v457_v0, %v431_v33  ;;  %v490_v30 = vadd.f32 %v484_v3, %v458_v5  ;;  %s3604_s29 = sld [smem:[#allocation2 + $0x56]] }
  0x5f   :  { %v2418_v22 = vpop.eup %2417  ;;  %v566_v25 = vmul.f32 %v560_v27, %v3129_v12  ;;  %v573_v26 = vmul.f32 1.442695, %v564_v57  ;;  %v491_v39 = vadd.f32 %v485_v54, %v459_v35  ;;  %v492_v29 = vadd.f32 %v486_v61, %v460_v53 }
  0x60   :  { %v2420_v24 = vpop.eup %2419  ;;  %2437 = vpow2.f32 %v567_v7  ;;  %v575_v31 = vmul.f32 1.442695, %v565_v47  ;;  %v489_v28 = vmul.f32 %v2412_v60, %v3181_v49  ;;  %v493_v36 = vadd.f32 %v487_v13, %v461_v63 }
  0x61   :  { %v2422_v32 = vpop.eup %2421  ;;  %2439 = vpow2.f32 %v569_v15  ;;  %v593_v37 = vmul.f32 %v592_v21, %v3116_v4  ;;  %v494_v44 = vadd.f32 %v488_v19, %v462_v18  ;;  %v516_v46 = vmul.f32 %v2414_v11, %v3184_v50 }
  0x62   :  { %2441 = vpow2.f32 %v571_v20  ;;  %v594_v27 = vmul.f32 %v592_v21, %v3118_v6  ;;  %v517_v5 = vmul.f32 %v2416_v17, %v3184_v50  ;;  %v518_v51 = vmul.f32 %v2418_v22, %v3184_v50 }
  0x63   :  { %v2424_v33 = vpop.eup %2423  ;;  %2443 = vpow2.f32 %v573_v26  ;;  %v577_v52 = vmul.f32 1.442695, %v566_v25  ;;  %v519_v58 = vmul.f32 %v2420_v24, %v3184_v50  ;;  %v520_v35 = vmul.f32 %v2422_v32, %v3184_v50 }
  0x64   :  { %v2426_v49 = vpop.eup %2425  ;;  %2445 = vpow2.f32 %v575_v31  ;;  %v595_v34 = vmul.f32 %v592_v21, %v3120_v8  ;;  %v495_v0 = vadd.f32 %v489_v28, %v463_v23  ;;  %v599_v53 = vmul.f32 1.442695, %v593_v37 }
  0x65   :  { %v2428_v48 = vpop.eup %2427  ;;  %v3307_v55 = vstv %s3282_s30  ;;  %v3310_v2 = vstv %s3286_s2  ;;  %v521_v54 = vmul.f32 %v2424_v33, %v3184_v50  ;;  %v522_v57 = vadd.f32 %v516_v46, %v490_v30  ;;  %s3625_s30 = sld [smem:[#allocation2 + $0x1c]] }
  0x66   :  { %v2430_v3 = vpop.eup %2429  ;;  %v596_v60 = vmul.f32 %v592_v21, %v3122_v9  ;;  %v601_v61 = vmul.f32 1.442695, %v594_v27  ;;  %v523_v7 = vadd.f32 %v517_v5, %v491_v39  ;;  %2447 = vpow2.f32 %v577_v52  ;;  %s3629_s2 = sld [smem:[#allocation2 + $0x57]] }
  0x67   :  { %v2432_v47 = vpop.eup %2431  ;;  %v597_v11 = vmul.f32 %v592_v21, %v3126_v10  ;;  %v624_v63 = vstv %s3294_s3  ;;  %v524_v15 = vadd.f32 %v518_v51, %v492_v29  ;;  %v525_v17 = vadd.f32 %v519_v58, %v493_v36  ;;  %s3642_s3 = sld [smem:[#allocation2 + $0x1d]] }
  0x68   :  { %v2434_v13 = vpop.eup %2433  ;;  %v526_v18 = vadd.f32 %v520_v35, %v494_v44  ;;  %v603_v19 = vmul.f32 1.442695, %v595_v34  ;;  %v548_v22 = vmul.f32 %v2426_v49, %v3190_v56  ;;  %v549_v50 = vmul.f32 %v2428_v48, %v3190_v56 }
  0x69   :  { %v2436_v20 = vpop.eup %2435  ;;  %v598_v23 = vmul.f32 %v592_v21, %v3129_v12  ;;  %2449 = vpow2.f32 %v599_v53  ;;  %v527_v30 = vadd.f32 %v521_v54, %v495_v0  ;;  %v605_v25 = vmul.f32 1.442695, %v596_v60 }
  0x6a   :  { %2451 = vpow2.f32 %v601_v61  ;;  %v625_v26 = vmul.f32 %v624_v63, %v3116_v4  ;;  %v550_v24 = vmul.f32 %v2430_v3, %v3190_v56  ;;  %v551_v39 = vmul.f32 %v2432_v47, %v3190_v56 }
  0x6b   :  { %v607_v29 = vmul.f32 1.442695, %v597_v11  ;;  %v626_v31 = vmul.f32 %v624_v63, %v3118_v6  ;;  %v552_v32 = vmul.f32 %v2434_v13, %v3190_v56  ;;  %v553_v28 = vmul.f32 %v2436_v20, %v3190_v56 }
  0x6c   :  { %2453 = vpow2.f32 %v603_v19  ;;  %v627_v21 = vmul.f32 %v624_v63, %v3120_v8  ;;  %v554_v37 = vadd.f32 %v548_v22, %v522_v57  ;;  %v555_v44 = vadd.f32 %v549_v50, %v523_v7 }
  0x6d   :  { %v2438_v36 = vpop.eup %2437  ;;  %v609_v46 = vmul.f32 1.442695, %v598_v23  ;;  %v628_v27 = vmul.f32 %v624_v63, %v3122_v9  ;;  %2455 = vpow2.f32 %v605_v25  ;;  %v629_v5 = vmul.f32 %v624_v63, %v3126_v10 }
  0x6e   :  { %v2440_v33 = vpop.eup %2439  ;;  %v631_v51 = vmul.f32 1.442695, %v625_v26  ;;  %v656_v52 = vstv %s3312_s4  ;;  %v556_v58 = vadd.f32 %v550_v24, %v524_v15  ;;  %v557_v56 = vadd.f32 %v551_v39, %v525_v17  ;;  %s3646_s4 = sld [smem:[#allocation2 + $0x58]] }
  0x6f   :  { %v2442_v49 = vpop.eup %2441  ;;  %2457 = vpow2.f32 %v607_v29  ;;  %v633_v35 = vmul.f32 1.442695, %v626_v31  ;;  %v558_v48 = vadd.f32 %v552_v32, %v526_v18  ;;  %v559_v0 = vadd.f32 %v553_v28, %v527_v30 }
  0x70   :  { %v2444_v34 = vpop.eup %2443  ;;  %v630_v53 = vmul.f32 %v624_v63, %v3129_v12  ;;  %v635_v3 = vmul.f32 1.442695, %v627_v21  ;;  %v580_v57 = vmul.f32 %v2438_v36, %v3194_v59  ;;  %2459 = vpow2.f32 %v609_v46 }
  0x71   :  { %v2446_v54 = vpop.eup %2445  ;;  %v637_v60 = vmul.f32 1.442695, %v628_v27  ;;  %v657_v61 = vmul.f32 %v656_v52, %v3116_v4  ;;  %v581_v47 = vmul.f32 %v2440_v33, %v3194_v59  ;;  %2461 = vpow2.f32 %v631_v51 }
  0x72   :  { %v639_v7 = vmul.f32 1.442695, %v629_v5  ;;  %v658_v11 = vmul.f32 %v656_v52, %v3118_v6  ;;  %v582_v13 = vmul.f32 %v2442_v49, %v3194_v59  ;;  %v583_v63 = vmul.f32 %v2444_v34, %v3194_v59 }
  0x73   :  { %2463 = vpow2.f32 %v633_v35  ;;  %v659_v15 = vmul.f32 %v656_v52, %v3120_v8  ;;  %v2448_v17 = vpop.eup %2447  ;;  %v584_v18 = vmul.f32 %v2446_v54, %v3194_v59  ;;  %v641_v19 = vmul.f32 1.442695, %v630_v53 }
  0x74   :  { %2465 = vpow2.f32 %v635_v3  ;;  %v660_v20 = vmul.f32 %v656_v52, %v3122_v9  ;;  %v661_v22 = vmul.f32 %v656_v52, %v3126_v10  ;;  %v663_v50 = vmul.f32 1.442695, %v657_v61 }
  0x75   :  { %2467 = vpow2.f32 %v637_v60  ;;  %v688_v23 = vstv %s3328_s5  ;;  %v586_v25 = vadd.f32 %v580_v57, %v554_v37  ;;  %v587_v26 = vadd.f32 %v581_v47, %v555_v44  ;;  %s3654_s5 = sld [smem:[#allocation2 + $0x1e]] }
  0x76   :  { %v2450_v30 = vpop.eup %2449  ;;  %2469 = vpow2.f32 %v639_v7  ;;  %v665_v24 = vmul.f32 1.442695, %v658_v11  ;;  %v585_v29 = vmul.f32 %v2448_v17, %v3194_v59  ;;  %v588_v31 = vadd.f32 %v582_v13, %v556_v58 }
  0x77   :  { %v2452_v39 = vpop.eup %2451  ;;  %v662_v32 = vmul.f32 %v656_v52, %v3129_v12  ;;  %v667_v28 = vmul.f32 1.442695, %v659_v15  ;;  %v589_v21 = vadd.f32 %v583_v63, %v557_v56  ;;  %2471 = vpow2.f32 %v641_v19 }
  0x78   :  { %v669_v36 = vmul.f32 1.442695, %v660_v20  ;;  %v689_v46 = vmul.f32 %v688_v23, %v3116_v4  ;;  %v3350_v33 = vadd.f32 %v584_v18, %v558_v48  ;;  %2473 = vpow2.f32 %v663_v50 }
  0x79   :  { %v2454_v27 = vpop.eup %2453  ;;  %v671_v37 = vmul.f32 1.442695, %v661_v22  ;;  %v690_v44 = vmul.f32 %v688_v23, %v3118_v6  ;;  %v612_v5 = vmul.f32 %v2450_v30, %v3199_v62  ;;  %v613_v59 = vmul.f32 %v2452_v39, %v3199_v62 }
  0x7a   :  { %2475 = vpow2.f32 %v665_v24  ;;  %v691_v51 = vmul.f32 %v688_v23, %v3120_v8  ;;  %v2456_v52 = vpop.eup %2455  ;;  %v673_v49 = vmul.f32 1.442695, %v662_v32  ;;  %v692_v58 = vmul.f32 %v688_v23, %v3122_v9 }
  0x7b   :  { %2477 = vpow2.f32 %v667_v28  ;;  %v720_v56 = vstv %s3338_s6  ;;  %v614_v34 = vmul.f32 %v2454_v27, %v3199_v62  ;;  %v693_v48 = vmul.f32 %v688_v23, %v3126_v10  ;;  %s3657_s6 = sld [smem:[#allocation2 + $0x59]] }
  0x7c   :  { %v2458_v35 = vpop.eup %2457  ;;  %2479 = vpow2.f32 %v669_v36  ;;  %v695_v53 = vmul.f32 1.442695, %v689_v46  ;;  %v591_v3 = vadd.f32 %v585_v29, %v559_v0  ;;  %v694_v54 = vmul.f32 %v688_v23, %v3129_v12 }
  0x7d   :  { %2481 = vpow2.f32 %v671_v37  ;;  %v697_v57 = vmul.f32 1.442695, %v690_v44  ;;  %v2460_v60 = vpop.eup %2459  ;;  %v615_v61 = vmul.f32 %v2456_v52, %v3199_v62  ;;  %v618_v47 = vadd.f32 %v612_v5, %v586_v25 }
  0x7e   :  { %v619_v7 = vadd.f32 %v613_v59, %v587_v26  ;;  %v699_v11 = vmul.f32 1.442695, %v691_v51  ;;  %v2462_v13 = vpop.eup %2461  ;;  %v616_v63 = vmul.f32 %v2458_v35, %v3199_v62  ;;  %2483 = vpow2.f32 %v673_v49 }
  0x7f   :  { %v701_v15 = vmul.f32 1.442695, %v692_v58  ;;  %v721_v17 = vmul.f32 %v720_v56, %v3116_v4  ;;  %v620_v19 = vadd.f32 %v614_v34, %v588_v31  ;;  %2485 = vpow2.f32 %v695_v53 }
  0x80   :  { %v2464_v18 = vpop.eup %2463  ;;  %v703_v0 = vmul.f32 1.442695, %v693_v48  ;;  %v722_v20 = vmul.f32 %v720_v56, %v3118_v6  ;;  %v617_v50 = vmul.f32 %v2460_v60, %v3199_v62  ;;  %2487 = vpow2.f32 %v697_v57 }
  0x81   :  { %v2466_v22 = vpop.eup %2465  ;;  %v705_v23 = vmul.f32 1.442695, %v694_v54  ;;  %v723_v30 = vmul.f32 %v720_v56, %v3120_v8  ;;  %v621_v26 = vadd.f32 %v615_v61, %v589_v21  ;;  %v644_v24 = vmul.f32 %v2462_v13, %v3205_v1 }
  0x82   :  { %v2468_v25 = vpop.eup %2467  ;;  %2489 = vpow2.f32 %v699_v11  ;;  %v724_v39 = vmul.f32 %v720_v56, %v3122_v9  ;;  %v725_v31 = vmul.f32 %v720_v56, %v3126_v10  ;;  %v727_v32 = vmul.f32 1.442695, %v721_v17 }
  0x83   :  { %v2470_v29 = vpop.eup %2469  ;;  %2491 = vpow2.f32 %v701_v15  ;;  %v752_v28 = vstv %s3356_s7  ;;  %v645_v62 = vmul.f32 %v2464_v18, %v3205_v1  ;;  %v726_v36 = vmul.f32 %v720_v56, %v3129_v12  ;;  %s3666_s7 = sld [smem:[#allocation2 + $0x5a]] }
  0x84   :  { %2493 = vpow2.f32 %v703_v0  ;;  %v729_v46 = vmul.f32 1.442695, %v722_v20  ;;  %v2472_v21 = vpop.eup %2471  ;;  %v646_v27 = vmul.f32 %v2466_v22, %v3205_v1  ;;  %v647_v37 = vmul.f32 %v2468_v25, %v3205_v1 }
  0x85   :  { %2495 = vpow2.f32 %v705_v23  ;;  %v731_v44 = vmul.f32 1.442695, %v723_v30  ;;  %v2474_v5 = vpop.eup %2473  ;;  %v622_v59 = vadd.f32 %v616_v63, %v3350_v33  ;;  %v648_v51 = vmul.f32 %v2470_v29, %v3205_v1 }
  0x86   :  { %v733_v52 = vmul.f32 1.442695, %v724_v39  ;;  %v753_v49 = vmul.f32 %v752_v28, %v3116_v4  ;;  %v623_v56 = vadd.f32 %v617_v50, %v591_v3  ;;  %v650_v35 = vadd.f32 %v644_v24, %v618_v47 }
  0x87   :  { %v2476_v58 = vpop.eup %2475  ;;  %2497 = vpow2.f32 %v727_v32  ;;  %v735_v34 = vmul.f32 1.442695, %v725_v31  ;;  %v651_v53 = vadd.f32 %v645_v62, %v619_v7  ;;  %v737_v54 = vmul.f32 1.442695, %v726_v36 }
  0x88   :  { %v2478_v48 = vpop.eup %2477  ;;  %2499 = vpow2.f32 %v729_v46  ;;  %v754_v57 = vmul.f32 %v752_v28, %v3118_v6  ;;  %v649_v61 = vmul.f32 %v2472_v21, %v3205_v1  ;;  %v652_v33 = vadd.f32 %v646_v27, %v620_v19 }
  0x89   :  { %v2480_v60 = vpop.eup %2479  ;;  %v653_v11 = vadd.f32 %v647_v37, %v621_v26  ;;  %2501 = vpow2.f32 %v731_v44  ;;  %v654_v63 = vadd.f32 %v648_v51, %v622_v59  ;;  %v755_v3 = vmul.f32 %v752_v28, %v3120_v8 }
  0x8a   :  { %v2482_v13 = vpop.eup %2481  ;;  %2503 = vpow2.f32 %v733_v52  ;;  %v759_v47 = vmul.f32 1.442695, %v753_v49  ;;  %v676_v15 = vmul.f32 %v2474_v5, %v3211_v14  ;;  %v677_v7 = vmul.f32 %v2476_v58, %v3211_v14 }
  0x8b   :  { %2505 = vpow2.f32 %v735_v34  ;;  %v756_v17 = vmul.f32 %v752_v28, %v3122_v9  ;;  %v2484_v1 = vpop.eup %2483  ;;  %v678_v18 = vmul.f32 %v2478_v48, %v3211_v14  ;;  %v757_v19 = vmul.f32 %v752_v28, %v3126_v10 }
  0x8c   :  { %2507 = vpow2.f32 %v737_v54  ;;  %v761_v0 = vmul.f32 1.442695, %v754_v57  ;;  %v2486_v20 = vpop.eup %2485  ;;  %v679_v22 = vmul.f32 %v2480_v60, %v3211_v14  ;;  %v680_v50 = vmul.f32 %v2482_v13, %v3211_v14 }
  0x8d   :  { %v758_v23 = vmul.f32 %v752_v28, %v3129_v12  ;;  %v784_v30 = vstv %s3377_s0  ;;  %v2488_v25 = vpop.eup %2487  ;;  %2509 = vpow2.f32 %v759_v47  ;;  %v763_v26 = vmul.f32 1.442695, %v755_v3  ;;  %s3677_s0 = sld [smem:[#allocation2 + $0x5b]] }
  0x8e   :  { %v3401_v24 = vstv %s3373_s8  ;;  %v3404_v39 = vstv %s3381_s9  ;;  %v655_v31 = vadd.f32 %v649_v61, %v623_v56  ;;  %v682_v32 = vadd.f32 %v676_v15, %v650_v35  ;;  %s3670_s8 = sld [smem:[#allocation2 + $0x1f]] }
  0x8f   :  { %v2490_v29 = vpop.eup %2489  ;;  %v683_v62 = vadd.f32 %v677_v7, %v651_v53  ;;  %v765_v36 = vmul.f32 1.442695, %v756_v17  ;;  %v681_v21 = vmul.f32 %v2484_v1, %v3211_v14  ;;  %2511 = vpow2.f32 %v761_v0  ;;  %s3684_s9 = sld [smem:[#allocation2 + $0x20]] }
  0x90   :  { %v2492_v46 = vpop.eup %2491  ;;  %v767_v28 = vmul.f32 1.442695, %v757_v19  ;;  %v785_v27 = vmul.f32 %v784_v30, %v3116_v4  ;;  %v684_v44 = vadd.f32 %v678_v18, %v652_v33  ;;  %v685_v5 = vadd.f32 %v679_v22, %v653_v11 }
  0x91   :  { %v2494_v37 = vpop.eup %2493  ;;  %v686_v59 = vadd.f32 %v680_v50, %v654_v63  ;;  %v769_v51 = vmul.f32 1.442695, %v758_v23  ;;  %v708_v49 = vmul.f32 %v2486_v20, %v3290_v16  ;;  %v709_v58 = vmul.f32 %v2488_v25, %v3290_v16 }
  0x92   :  { %v2496_v52 = vpop.eup %2495  ;;  %2513 = vpow2.f32 %v763_v26  ;;  %v786_v56 = vmul.f32 %v784_v30, %v3118_v6  ;;  %v710_v35 = vmul.f32 %v2490_v29, %v3290_v16  ;;  %v711_v14 = vmul.f32 %v2492_v46, %v3290_v16 }
  0x93   :  { %2515 = vpow2.f32 %v765_v36  ;;  %v787_v34 = vmul.f32 %v784_v30, %v3120_v8  ;;  %v687_v53 = vadd.f32 %v681_v21, %v655_v31  ;;  %v788_v54 = vmul.f32 %v784_v30, %v3122_v9 }
  0x94   :  { %v2498_v48 = vpop.eup %2497  ;;  %2517 = vpow2.f32 %v767_v28  ;;  %v791_v57 = vmul.f32 1.442695, %v785_v27  ;;  %v712_v61 = vmul.f32 %v2494_v37, %v3290_v16  ;;  %v713_v33 = vmul.f32 %v2496_v52, %v3290_v16 }
  0x95   :  { %v2500_v60 = vpop.eup %2499  ;;  %2519 = vpow2.f32 %v769_v51  ;;  %v789_v11 = vmul.f32 %v784_v30, %v3126_v10  ;;  %v714_v63 = vadd.f32 %v708_v49, %v682_v32  ;;  %v790_v3 = vmul.f32 %v784_v30, %v3129_v12 }
  0x96   :  { %v2502_v13 = vpop.eup %2501  ;;  %v793_v47 = vmul.f32 1.442695, %v786_v56  ;;  %v816_v15 = vstv %s3398_s10  ;;  %v715_v17 = vadd.f32 %v709_v58, %v683_v62  ;;  %v716_v1 = vadd.f32 %v710_v35, %v684_v44  ;;  %s3690_s10 = sld [smem:[#allocation2 + $0x5c]] }
  0x97   :  { %v2504_v7 = vpop.eup %2503  ;;  %v717_v18 = vadd.f32 %v711_v14, %v685_v5  ;;  %v795_v19 = vmul.f32 1.442695, %v787_v34  ;;  %v740_v20 = vmul.f32 %v2498_v48, %v3307_v55  ;;  %v741_v22 = vmul.f32 %v2500_v60, %v3307_v55 }
  0x98   :  { %v2506_v0 = vpop.eup %2505  ;;  %2521 = vpow2.f32 %v791_v57  ;;  %v797_v16 = vmul.f32 1.442695, %v788_v54  ;;  %v718_v23 = vadd.f32 %v712_v61, %v686_v59  ;;  %v719_v25 = vadd.f32 %v713_v33, %v687_v53 }
  0x99   :  { %v2508_v50 = vpop.eup %2507  ;;  %v799_v26 = vmul.f32 1.442695, %v789_v11  ;;  %v817_v30 = vmul.f32 %v816_v15, %v3116_v4  ;;  %v742_v29 = vmul.f32 %v2502_v13, %v3307_v55  ;;  %2523 = vpow2.f32 %v793_v47 }
  0x9a   :  { %v801_v31 = vmul.f32 1.442695, %v790_v3  ;;  %v818_v32 = vmul.f32 %v816_v15, %v3118_v6  ;;  %v2510_v62 = vpop.eup %2509  ;;  %v743_v36 = vmul.f32 %v2504_v7, %v3307_v55  ;;  %v744_v46 = vmul.f32 %v2506_v0, %v3307_v55 }
  0x9b   :  { %2525 = vpow2.f32 %v795_v19  ;;  %v819_v21 = vmul.f32 %v816_v15, %v3120_v8  ;;  %v745_v28 = vmul.f32 %v2508_v50, %v3307_v55  ;;  %v746_v27 = vadd.f32 %v740_v20, %v714_v63 }
  0x9c   :  { %v747_v37 = vadd.f32 %v741_v22, %v715_v17  ;;  %2527 = vpow2.f32 %v797_v16  ;;  %v2512_v44 = vpop.eup %2511  ;;  %v820_v5 = vmul.f32 %v816_v15, %v3122_v9  ;;  %v821_v59 = vmul.f32 %v816_v15, %v3126_v10 }
  0x9d   :  { %v823_v51 = vmul.f32 1.442695, %v817_v30  ;;  %v848_v52 = vstv %s3415_s11  ;;  %v748_v49 = vadd.f32 %v742_v29, %v716_v1  ;;  %v772_v58 = vmul.f32 %v2510_v62, %v3310_v2  ;;  %s3697_s11 = sld [smem:[#allocation2 + $0x21]] }
  0x9e   :  { %2529 = vpow2.f32 %v799_v26  ;;  %v825_v56 = vmul.f32 1.442695, %v818_v32  ;;  %v749_v14 = vadd.f32 %v743_v36, %v717_v18  ;;  %v750_v34 = vadd.f32 %v744_v46, %v718_v23 }
  0x9f   :  { %v2514_v35 = vpop.eup %2513  ;;  %v822_v55 = vmul.f32 %v816_v15, %v3129_v12  ;;  %v827_v48 = vmul.f32 1.442695, %v819_v21  ;;  %v751_v54 = vadd.f32 %v745_v28, %v719_v25  ;;  %v773_v57 = vmul.f32 %v2512_v44, %v3310_v2 }
  0xa0   :  { %v2516_v53 = vpop.eup %2515  ;;  %2531 = vpow2.f32 %v801_v31  ;;  %v849_v60 = vmul.f32 %v848_v52, %v3116_v4  ;;  %v829_v33 = vmul.f32 1.442695, %v820_v5  ;;  %v831_v11 = vmul.f32 1.442695, %v821_v59 }
  0xa1   :  { %v2518_v61 = vpop.eup %2517  ;;  %2533 = vpow2.f32 %v823_v51  ;;  %v850_v13 = vmul.f32 %v848_v52, %v3118_v6  ;;  %v774_v3 = vmul.f32 %v2514_v35, %v3310_v2  ;;  %v778_v47 = vadd.f32 %v772_v58, %v746_v27 }
  0xa2   :  { %v2520_v63 = vpop.eup %2519  ;;  %2535 = vpow2.f32 %v825_v56  ;;  %v851_v15 = vmul.f32 %v848_v52, %v3120_v8  ;;  %v775_v7 = vmul.f32 %v2516_v53, %v3310_v2  ;;  %v833_v17 = vmul.f32 1.442695, %v822_v55 }
  0xa3   :  { %2537 = vpow2.f32 %v827_v48  ;;  %v852_v1 = vmul.f32 %v848_v52, %v3122_v9  ;;  %v776_v18 = vmul.f32 %v2518_v61, %v3310_v2  ;;  %v779_v19 = vadd.f32 %v773_v57, %v747_v37 }
  0xa4   :  { %v855_v0 = vmul.f32 1.442695, %v849_v60  ;;  %v880_v20 = vstv %s3430_s12  ;;  %v777_v16 = vmul.f32 %v2520_v63, %v3310_v2  ;;  %2539 = vpow2.f32 %v829_v33  ;;  %s3704_s12 = sld [smem:[#allocation2 + $0x5d]] }
  0xa5   :  { %v2522_v22 = vpop.eup %2521  ;;  %v853_v50 = vmul.f32 %v848_v52, %v3126_v10  ;;  %v857_v23 = vmul.f32 1.442695, %v850_v13  ;;  %v780_v25 = vadd.f32 %v774_v3, %v748_v49  ;;  %2541 = vpow2.f32 %v831_v11 }
  0xa6   :  { %v854_v26 = vmul.f32 %v848_v52, %v3129_v12  ;;  %v859_v30 = vmul.f32 1.442695, %v851_v15  ;;  %v2524_v29 = vpop.eup %2523  ;;  %v781_v31 = vadd.f32 %v775_v7, %v749_v14  ;;  %2543 = vpow2.f32 %v833_v17 }
  0xa7   :  { %v861_v32 = vmul.f32 1.442695, %v852_v1  ;;  %v881_v62 = vmul.f32 %v880_v20, %v3116_v4  ;;  %v782_v46 = vadd.f32 %v776_v18, %v750_v34  ;;  %v804_v21 = vmul.f32 %v2522_v22, %v3401_v24 }
  0xa8   :  { %v2526_v36 = vpop.eup %2525  ;;  %2545 = vpow2.f32 %v855_v0  ;;  %v882_v2 = vmul.f32 %v880_v20, %v3118_v6  ;;  %v783_v27 = vadd.f32 %v777_v16, %v751_v54  ;;  %v863_v37 = vmul.f32 1.442695, %v853_v50 }
  0xa9   :  { %v2528_v28 = vpop.eup %2527  ;;  %2547 = vpow2.f32 %v857_v23  ;;  %v883_v44 = vmul.f32 %v880_v20, %v3120_v8  ;;  %v805_v5 = vmul.f32 %v2524_v29, %v3401_v24  ;;  %v865_v59 = vmul.f32 1.442695, %v854_v26 }
  0xaa   :  { %2549 = vpow2.f32 %v859_v30  ;;  %v884_v51 = vmul.f32 %v880_v20, %v3122_v9  ;;  %v806_v49 = vmul.f32 %v2526_v36, %v3401_v24  ;;  %v885_v58 = vmul.f32 %v880_v20, %v3126_v10 }
  0xab   :  { %v2530_v52 = vpop.eup %2529  ;;  %2551 = vpow2.f32 %v861_v32  ;;  %v887_v56 = vmul.f32 1.442695, %v881_v62  ;;  %v810_v35 = vadd.f32 %v804_v21, %v778_v47  ;;  %v886_v14 = vmul.f32 %v880_v20, %v3129_v12 }
  0xac   :  { %v889_v34 = vmul.f32 1.442695, %v882_v2  ;;  %v912_v55 = vstv %s3445_s13  ;;  %v807_v53 = vmul.f32 %v2528_v28, %v3401_v24  ;;  %2553 = vpow2.f32 %v863_v37  ;;  %s3707_s13 = sld [smem:[#allocation2 + $0x22]] }
  0xad   :  { %v2532_v48 = vpop.eup %2531  ;;  %v3468_v54 = vstv %s3449_s14  ;;  %v891_v57 = vmul.f32 1.442695, %v883_v44  ;;  %v808_v61 = vmul.f32 %v2530_v52, %v3401_v24  ;;  %v811_v33 = vadd.f32 %v805_v5, %v779_v19  ;;  %s3710_s14 = sld [smem:[#allocation2 + $0x23]] }
  0xae   :  { %v2534_v60 = vpop.eup %2533  ;;  %2555 = vpow2.f32 %v865_v59  ;;  %v893_v11 = vmul.f32 1.442695, %v884_v51  ;;  %v812_v63 = vadd.f32 %v806_v49, %v780_v25  ;;  %v895_v3 = vmul.f32 1.442695, %v885_v58 }
  0xaf   :  { %v2536_v13 = vpop.eup %2535  ;;  %2557 = vpow2.f32 %v887_v56  ;;  %v913_v47 = vmul.f32 %v912_v55, %v3116_v4  ;;  %v809_v7 = vmul.f32 %v2532_v48, %v3401_v24  ;;  %v897_v17 = vmul.f32 1.442695, %v886_v14 }
  0xb0   :  { %v2538_v15 = vpop.eup %2537  ;;  %2559 = vpow2.f32 %v889_v34  ;;  %v914_v1 = vmul.f32 %v912_v55, %v3118_v6  ;;  %v813_v18 = vadd.f32 %v807_v53, %v781_v31  ;;  %v836_v0 = vmul.f32 %v2534_v60, %v3404_v39 }
  0xb1   :  { %2561 = vpow2.f32 %v891_v57  ;;  %v915_v19 = vmul.f32 %v912_v55, %v3120_v8  ;;  %v2540_v20 = vpop.eup %2539  ;;  %v814_v22 = vadd.f32 %v808_v61, %v782_v46  ;;  %v837_v16 = vmul.f32 %v2536_v13, %v3404_v39 }
  0xb2   :  { %2563 = vpow2.f32 %v893_v11  ;;  %v916_v50 = vmul.f32 %v912_v55, %v3122_v9  ;;  %v2542_v23 = vpop.eup %2541  ;;  %v838_v24 = vmul.f32 %v2538_v15, %v3404_v39  ;;  %v917_v25 = vmul.f32 %v912_v55, %v3126_v10 }
  0xb3   :  { %2565 = vpow2.f32 %v895_v3  ;;  %v919_v26 = vmul.f32 1.442695, %v913_v47  ;;  %v2544_v30 = vpop.eup %2543  ;;  %v918_v29 = vmul.f32 %v912_v55, %v3129_v12  ;;  %v921_v31 = vmul.f32 1.442695, %v914_v1 }
  0xb4   :  { %2567 = vpow2.f32 %v897_v17  ;;  %v944_v32 = vstv %s3462_s15  ;;  %v815_v36 = vadd.f32 %v809_v7, %v783_v27  ;;  %v839_v46 = vmul.f32 %v2540_v20, %v3404_v39  ;;  %s3719_s15 = sld [smem:[#allocation2 + $0x24]] }
  0xb5   :  { %v2546_v62 = vpop.eup %2545  ;;  %v842_v21 = vadd.f32 %v836_v0, %v810_v35  ;;  %v923_v2 = vmul.f32 1.442695, %v915_v19  ;;  %v840_v37 = vmul.f32 %v2542_v23, %v3404_v39  ;;  %v843_v44 = vadd.f32 %v837_v16, %v811_v33 }
  0xb6   :  { %v2548_v28 = vpop.eup %2547  ;;  %v3491_v5 = vstv %s3470_s16  ;;  %v925_v59 = vmul.f32 1.442695, %v916_v50  ;;  %v844_v52 = vadd.f32 %v838_v24, %v812_v63  ;;  %2569 = vpow2.f32 %v919_v26  ;;  %s3722_s16 = sld [smem:[#allocation2 + $0x5e]] }
  0xb7   :  { %v2550_v51 = vpop.eup %2549  ;;  %v927_v49 = vmul.f32 1.442695, %v917_v25  ;;  %v945_v58 = vmul.f32 %v944_v32, %v3116_v4  ;;  %v841_v56 = vmul.f32 %v2544_v30, %v3404_v39  ;;  %2571 = vpow2.f32 %v921_v31 }
  0xb8   :  { %v2552_v27 = vpop.eup %2551  ;;  %v929_v35 = vmul.f32 1.442695, %v918_v29  ;;  %v946_v14 = vmul.f32 %v944_v32, %v3118_v6  ;;  %v845_v34 = vadd.f32 %v839_v46, %v813_v18  ;;  %v868_v55 = vmul.f32 %v2546_v62, %v3468_v54 }
  0xb9   :  { %2573 = vpow2.f32 %v923_v2  ;;  %v947_v48 = vmul.f32 %v944_v32, %v3120_v8  ;;  %v2554_v53 = vpop.eup %2553  ;;  %v869_v57 = vmul.f32 %v2548_v28, %v3468_v54  ;;  %v870_v60 = vmul.f32 %v2550_v51, %v3468_v54 }
  0xba   :  { %2575 = vpow2.f32 %v925_v59  ;;  %v948_v61 = vmul.f32 %v944_v32, %v3122_v9  ;;  %v871_v33 = vmul.f32 %v2552_v27, %v3468_v54  ;;  %v949_v11 = vmul.f32 %v944_v32, %v3126_v10 }
  0xbb   :  { %v2556_v39 = vpop.eup %2555  ;;  %2577 = vpow2.f32 %v927_v49  ;;  %v951_v13 = vmul.f32 1.442695, %v945_v58  ;;  %v950_v3 = vmul.f32 %v944_v32, %v3129_v12  ;;  %v953_v47 = vmul.f32 1.442695, %v946_v14 }
  0xbc   :  { %v2558_v63 = vpop.eup %2557  ;;  %2579 = vpow2.f32 %v929_v35  ;;  %v976_v15 = vstv %s3482_s17  ;;  %v846_v17 = vadd.f32 %v840_v37, %v814_v22  ;;  %v847_v1 = vadd.f32 %v841_v56, %v815_v36  ;;  %s3730_s17 = sld [smem:[#allocation2 + $0x25]] }
  0xbd   :  { %v2560_v7 = vpop.eup %2559  ;;  %v872_v18 = vmul.f32 %v2554_v53, %v3468_v54  ;;  %v955_v0 = vmul.f32 1.442695, %v947_v48  ;;  %v873_v20 = vmul.f32 %v2556_v39, %v3468_v54  ;;  %v874_v16 = vadd.f32 %v868_v55, %v842_v21 }
  0xbe   :  { %v2562_v19 = vpop.eup %2561  ;;  %v3512_v50 = vstv %s3487_s18  ;;  %v957_v23 = vmul.f32 1.442695, %v948_v61  ;;  %v875_v25 = vadd.f32 %v869_v57, %v843_v44  ;;  %2581 = vpow2.f32 %v951_v13  ;;  %s3735_s18 = sld [smem:[#allocation2 + $0x5f]] }
  0xbf   :  { %v2564_v24 = vpop.eup %2563  ;;  %v959_v26 = vmul.f32 1.442695, %v949_v11  ;;  %v977_v30 = vmul.f32 %v976_v15, %v3116_v4  ;;  %v876_v29 = vadd.f32 %v870_v60, %v844_v52  ;;  %v877_v31 = vadd.f32 %v871_v33, %v845_v34 }
  0xc0   :  { %v2566_v22 = vpop.eup %2565  ;;  %2583 = vpow2.f32 %v953_v47  ;;  %v961_v32 = vmul.f32 1.442695, %v950_v3  ;;  %v878_v36 = vadd.f32 %v872_v18, %v846_v17  ;;  %v900_v46 = vmul.f32 %v2558_v63, %v3491_v5 }
  0xc1   :  { %v2568_v62 = vpop.eup %2567  ;;  %2585 = vpow2.f32 %v955_v0  ;;  %v978_v54 = vmul.f32 %v976_v15, %v3118_v6  ;;  %v879_v21 = vadd.f32 %v873_v20, %v847_v1  ;;  %v901_v2 = vmul.f32 %v2560_v7, %v3491_v5 }
  0xc2   :  { %2587 = vpow2.f32 %v957_v23  ;;  %v979_v28 = vmul.f32 %v976_v15, %v3120_v8  ;;  %v902_v37 = vmul.f32 %v2562_v19, %v3491_v5  ;;  %v980_v44 = vmul.f32 %v976_v15, %v3122_v9 }
  0xc3   :  { %2589 = vpow2.f32 %v959_v26  ;;  %v983_v59 = vmul.f32 1.442695, %v977_v30  ;;  %v2570_v51 = vpop.eup %2569  ;;  %v903_v52 = vmul.f32 %v2564_v24, %v3491_v5  ;;  %v904_v49 = vmul.f32 %v2566_v22, %v3491_v5 }
  0xc4   :  { %v905_v58 = vmul.f32 %v2568_v62, %v3491_v5  ;;  %2591 = vpow2.f32 %v961_v32  ;;  %v2572_v27 = vpop.eup %2571  ;;  %v906_v56 = vadd.f32 %v900_v46, %v874_v16  ;;  %v981_v35 = vmul.f32 %v976_v15, %v3126_v10 }
  0xc5   :  { %v985_v14 = vmul.f32 1.442695, %v978_v54  ;;  %v3530_v55 = vstv %s3505_s19  ;;  %v982_v48 = vmul.f32 %v976_v15, %v3129_v12  ;;  %v987_v53 = vmul.f32 1.442695, %v979_v28  ;;  %s3745_s19 = sld [smem:[#allocation2 + $0x26]] }
  0xc6   :  { %v2574_v34 = vpop.eup %2573  ;;  %v1008_v57 = vstv %s3508_s20  ;;  %v907_v61 = vadd.f32 %v901_v2, %v875_v25  ;;  %v932_v39 = vmul.f32 %v2570_v51, %v3512_v50  ;;  %2593 = vpow2.f32 %v983_v59  ;;  %s3755_s20 = sld [smem:[#allocation2 + $0x60]] }
  0xc7   :  { %v2576_v60 = vpop.eup %2575  ;;  %v989_v5 = vmul.f32 1.442695, %v980_v44  ;;  %v908_v11 = vadd.f32 %v902_v37, %v876_v29  ;;  %v909_v13 = vadd.f32 %v903_v52, %v877_v31  ;;  %v910_v63 = vadd.f32 %v904_v49, %v878_v36 }
  0xc8   :  { %v2578_v33 = vpop.eup %2577  ;;  %v911_v3 = vadd.f32 %v905_v58, %v879_v21  ;;  %v933_v7 = vmul.f32 %v2572_v27, %v3512_v50  ;;  %2595 = vpow2.f32 %v985_v14  ;;  %v991_v17 = vmul.f32 1.442695, %v981_v35 }
  0xc9   :  { %v2580_v47 = vpop.eup %2579  ;;  %v1009_v15 = vmul.f32 %v1008_v57, %v3116_v4  ;;  %v934_v1 = vmul.f32 %v2574_v34, %v3512_v50  ;;  %2597 = vpow2.f32 %v987_v53  ;;  %v993_v18 = vmul.f32 1.442695, %v982_v48 }
  0xca   :  { %v1010_v0 = vmul.f32 %v1008_v57, %v3118_v6  ;;  %v935_v19 = vmul.f32 %v2576_v60, %v3512_v50  ;;  %v938_v20 = vadd.f32 %v932_v39, %v906_v56  ;;  %2599 = vpow2.f32 %v989_v5 }
  0xcb   :  { %v1011_v16 = vmul.f32 %v1008_v57, %v3120_v8  ;;  %v2582_v23 = vpop.eup %2581  ;;  %v936_v24 = vmul.f32 %v2578_v33, %v3512_v50  ;;  %v937_v25 = vmul.f32 %v2580_v47, %v3512_v50  ;;  %v3546_v26 = vstv %s3521_s21  ;;  %s3771_s21 = sld [smem:[#allocation2 + $0x61]] }
  0xcc   :  { %v1012_v30 = vmul.f32 %v1008_v57, %v3122_v9  ;;  %2601 = vpow2.f32 %v991_v17  ;;  %v1013_v29 = vmul.f32 %v1008_v57, %v3126_v10  ;;  %v1014_v31 = vmul.f32 %v1008_v57, %v3129_v12 }
  0xcd   :  { %v2584_v22 = vpop.eup %2583  ;;  %v1015_v32 = vmul.f32 1.442695, %v1009_v15  ;;  %v939_v36 = vadd.f32 %v933_v7, %v907_v61  ;;  %v940_v46 = vadd.f32 %v934_v1, %v908_v11  ;;  %v1017_v54 = vmul.f32 1.442695, %v1010_v0 }
  0xce   :  { %v2586_v62 = vpop.eup %2585  ;;  %v1040_v21 = vstv %s3527_s22  ;;  %v941_v50 = vadd.f32 %v935_v19, %v909_v13  ;;  %v964_v28 = vmul.f32 %v2582_v23, %v3530_v55  ;;  %2603 = vpow2.f32 %v993_v18  ;;  %s3778_s22 = sld [smem:[#allocation2 + $0x27]] }
  0xcf   :  { %v2588_v2 = vpop.eup %2587  ;;  %v1019_v37 = vmul.f32 1.442695, %v1011_v16  ;;  %v942_v59 = vadd.f32 %v936_v24, %v910_v63  ;;  %v943_v51 = vadd.f32 %v937_v25, %v911_v3  ;;  %v965_v52 = vmul.f32 %v2584_v22, %v3530_v55 }
  0xd0   :  { %v2590_v44 = vpop.eup %2589  ;;  %v1021_v49 = vmul.f32 1.442695, %v1012_v30  ;;  %2605 = vpow2.f32 %v1015_v32  ;;  %v1023_v27 = vmul.f32 1.442695, %v1013_v29  ;;  %v1025_v56 = vmul.f32 1.442695, %v1014_v31 }
  0xd1   :  { %v2592_v58 = vpop.eup %2591  ;;  %v1041_v35 = vmul.f32 %v1040_v21, %v3116_v4  ;;  %v966_v14 = vmul.f32 %v2586_v62, %v3530_v55  ;;  %v967_v34 = vmul.f32 %v2588_v2, %v3530_v55  ;;  %2607 = vpow2.f32 %v1017_v54 }
  0xd2   :  { %v1042_v48 = vmul.f32 %v1040_v21, %v3118_v6  ;;  %v968_v53 = vmul.f32 %v2590_v44, %v3530_v55  ;;  %v970_v57 = vadd.f32 %v964_v28, %v938_v20  ;;  %2609 = vpow2.f32 %v1019_v37 }
  0xd3   :  { %v1043_v60 = vmul.f32 %v1040_v21, %v3120_v8  ;;  %v2594_v61 = vpop.eup %2593  ;;  %v969_v39 = vmul.f32 %v2592_v58, %v3530_v55  ;;  %v971_v5 = vadd.f32 %v965_v52, %v939_v36  ;;  %v3566_v33 = vstv %s3541_s23  ;;  %s3788_s23 = sld [smem:[#allocation2 + $0x62]] }
  0xd4   :  { %v1044_v11 = vmul.f32 %v1040_v21, %v3122_v9  ;;  %2611 = vpow2.f32 %v1021_v49  ;;  %v1045_v13 = vmul.f32 %v1040_v21, %v3126_v10  ;;  %v1047_v63 = vmul.f32 1.442695, %v1041_v35 }
  0xd5   :  { %v1072_v3 = vstv %s3549_s24  ;;  %v2596_v47 = vpop.eup %2595  ;;  %v972_v7 = vadd.f32 %v966_v14, %v940_v46  ;;  %v973_v17 = vadd.f32 %v967_v34, %v941_v50  ;;  %v1046_v15 = vmul.f32 %v1040_v21, %v3129_v12  ;;  %s3794_s24 = sld [smem:[#allocation2 + $0x28]] }
  0xd6   :  { %v1049_v1 = vmul.f32 1.442695, %v1042_v48  ;;  %v2598_v18 = vpop.eup %2597  ;;  %v974_v55 = vadd.f32 %v968_v53, %v942_v59  ;;  %v996_v0 = vmul.f32 %v2594_v61, %v3546_v26  ;;  %2613 = vpow2.f32 %v1023_v27 }
  0xd7   :  { %v1051_v19 = vmul.f32 1.442695, %v1043_v60  ;;  %v2600_v20 = vpop.eup %2599  ;;  %v3575_v16 = vadd.f32 %v969_v39, %v943_v51  ;;  %2615 = vpow2.f32 %v1025_v56  ;;  %v1053_v23 = vmul.f32 1.442695, %v1044_v11 }
  0xd8   :  { %v1073_v24 = vmul.f32 %v1072_v3, %v3116_v4  ;;  %v997_v25 = vmul.f32 %v2596_v47, %v3546_v26  ;;  %2617 = vpow2.f32 %v1047_v63  ;;  %v1055_v30 = vmul.f32 1.442695, %v1045_v13 }
  0xd9   :  { %v1074_v22 = vmul.f32 %v1072_v3, %v3118_v6  ;;  %v2602_v29 = vpop.eup %2601  ;;  %v998_v31 = vmul.f32 %v2598_v18, %v3546_v26  ;;  %2619 = vpow2.f32 %v1049_v1  ;;  %v1057_v32 = vmul.f32 1.442695, %v1046_v15 }
  0xda   :  { %v1075_v62 = vmul.f32 %v1072_v3, %v3120_v8  ;;  %v999_v36 = vmul.f32 %v2600_v20, %v3546_v26  ;;  %v1002_v46 = vadd.f32 %v996_v0, %v970_v57  ;;  %2621 = vpow2.f32 %v1051_v19 }
  0xdb   :  { %v1076_v54 = vmul.f32 %v1072_v3, %v3122_v9  ;;  %v2604_v21 = vpop.eup %2603  ;;  %2623 = vpow2.f32 %v1053_v23  ;;  %v1077_v2 = vmul.f32 %v1072_v3, %v3126_v10  ;;  %v1079_v50 = vmul.f32 1.442695, %v1073_v24 }
  0xdc   :  { %v1104_v28 = vstv %s3562_s25  ;;  %v1000_v37 = vmul.f32 %v2602_v29, %v3546_v26  ;;  %2625 = vpow2.f32 %v1055_v30  ;;  %v1078_v44 = vmul.f32 %v1072_v3, %v3129_v12  ;;  %s3808_s25 = sld [smem:[#allocation2 + $0x63]] }
  0xdd   :  { %v1081_v59 = vmul.f32 1.442695, %v1074_v22  ;;  %v2606_v51 = vpop.eup %2605  ;;  %v1003_v52 = vadd.f32 %v997_v25, %v971_v5  ;;  %v1004_v49 = vadd.f32 %v998_v31, %v972_v7  ;;  %v3593_v58 = vstv %s3571_s26  ;;  %s3818_s26 = sld [smem:[#allocation2 + $0x29]] }
  0xde   :  { %v1083_v27 = vmul.f32 1.442695, %v1075_v62  ;;  %v2608_v56 = vpop.eup %2607  ;;  %v1001_v35 = vmul.f32 %v2604_v21, %v3546_v26  ;;  %2627 = vpow2.f32 %v1057_v32  ;;  %v1085_v14 = vmul.f32 1.442695, %v1076_v54 }
  0xdf   :  { %v1105_v34 = vmul.f32 %v1104_v28, %v3116_v4  ;;  %v2610_v48 = vpop.eup %2609  ;;  %v1005_v53 = vadd.f32 %v999_v36, %v973_v17  ;;  %2629 = vpow2.f32 %v1079_v50  ;;  %v1087_v57 = vmul.f32 1.442695, %v1077_v2 }
  0xe0   :  { %v1106_v60 = vmul.f32 %v1104_v28, %v3118_v6  ;;  %v1006_v61 = vadd.f32 %v1000_v37, %v974_v55  ;;  %2631 = vpow2.f32 %v1081_v59  ;;  %v1089_v39 = vmul.f32 1.442695, %v1078_v44 }
  0xe1   :  { %v1107_v5 = vmul.f32 %v1104_v28, %v3120_v8  ;;  %v2612_v11 = vpop.eup %2611  ;;  %v1028_v13 = vmul.f32 %v2606_v51, %v3566_v33  ;;  %v1029_v26 = vmul.f32 %v2608_v56, %v3566_v33  ;;  %2633 = vpow2.f32 %v1083_v27 }
  0xe2   :  { %v1108_v63 = vmul.f32 %v1104_v28, %v3122_v9  ;;  %v1030_v3 = vmul.f32 %v2610_v48, %v3566_v33  ;;  %2635 = vpow2.f32 %v1085_v14  ;;  %v1109_v47 = vmul.f32 %v1104_v28, %v3126_v10 }
  0xe3   :  { %v1111_v7 = vmul.f32 1.442695, %v1105_v34  ;;  %v2614_v17 = vpop.eup %2613  ;;  %2637 = vpow2.f32 %v1087_v57  ;;  %v1110_v15 = vmul.f32 %v1104_v28, %v3129_v12  ;;  %v1113_v1 = vmul.f32 1.442695, %v1106_v60 }
  0xe4   :  { %v1136_v18 = vstv %s3584_s27  ;;  %v2616_v55 = vpop.eup %2615  ;;  %v1007_v0 = vadd.f32 %v1001_v35, %v3575_v16  ;;  %v1031_v19 = vmul.f32 %v2612_v11, %v3566_v33  ;;  %2639 = vpow2.f32 %v1089_v39  ;;  %s3830_s27 = sld [smem:[#allocation2 + $0x2a]] }
  0xe5   :  { %v1115_v20 = vmul.f32 1.442695, %v1107_v5  ;;  %v2618_v23 = vpop.eup %2617  ;;  %v1034_v24 = vadd.f32 %v1028_v13, %v1002_v46  ;;  %v1035_v25 = vadd.f32 %v1029_v26, %v1003_v52  ;;  %v3611_v30 = vstv %s3590_s28  ;;  %s3834_s28 = sld [smem:[#allocation2 + $0x64]] }
  0xe6   :  { %v1117_v22 = vmul.f32 1.442695, %v1108_v63  ;;  %v2620_v29 = vpop.eup %2619  ;;  %v1032_v31 = vmul.f32 %v2614_v17, %v3566_v33  ;;  %2641 = vpow2.f32 %v1111_v7  ;;  %v1119_v32 = vmul.f32 1.442695, %v1109_v47 }
  0xe7   :  { %v1137_v62 = vmul.f32 %v1136_v18, %v3116_v4  ;;  %v2622_v36 = vpop.eup %2621  ;;  %v1036_v54 = vadd.f32 %v1030_v3, %v1004_v49  ;;  %2643 = vpow2.f32 %v1113_v1  ;;  %v1121_v16 = vmul.f32 1.442695, %v1110_v15 }
  0xe8   :  { %v1138_v21 = vmul.f32 %v1136_v18, %v3118_v6  ;;  %v2624_v2 = vpop.eup %2623  ;;  %v1033_v46 = vmul.f32 %v2616_v55, %v3566_v33  ;;  %v1037_v50 = vadd.f32 %v1031_v19, %v1005_v53  ;;  %2645 = vpow2.f32 %v1115_v20 }
  0xe9   :  { %v1139_v28 = vmul.f32 %v1136_v18, %v3120_v8  ;;  %v2626_v37 = vpop.eup %2625  ;;  %v1060_v44 = vmul.f32 %v2618_v23, %v3593_v58  ;;  %v1061_v59 = vmul.f32 %v2620_v29, %v3593_v58  ;;  %2647 = vpow2.f32 %v1117_v22 }
  0xea   :  { %v1140_v51 = vmul.f32 %v1136_v18, %v3122_v9  ;;  %v1062_v52 = vmul.f32 %v2622_v36, %v3593_v58  ;;  %2649 = vpow2.f32 %v1119_v32  ;;  %v1141_v49 = vmul.f32 %v1136_v18, %v3126_v10 }
  0xeb   :  { %v1143_v27 = vmul.f32 1.442695, %v1137_v62  ;;  %v2628_v33 = vpop.eup %2627  ;;  %2651 = vpow2.f32 %v1121_v16  ;;  %v1142_v56 = vmul.f32 %v1136_v18, %v3129_v12  ;;  %v1145_v35 = vmul.f32 1.442695, %v1138_v21 }
  0xec   :  { %v1168_v14 = vstv %s3604_s29  ;;  %v2630_v34 = vpop.eup %2629  ;;  %v1038_v48 = vadd.f32 %v1032_v31, %v1006_v61  ;;  %v1063_v53 = vmul.f32 %v2624_v2, %v3593_v58  ;;  %v1064_v57 = vmul.f32 %v2626_v37, %v3593_v58  ;;  %s3844_s29 = sld [smem:[#allocation2 + $0x2b]] }
  0xed   :  { %v1147_v60 = vmul.f32 1.442695, %v1139_v28  ;;  %v2632_v39 = vpop.eup %2631  ;;  %v1039_v5 = vadd.f32 %v1033_v46, %v1007_v0  ;;  %v1066_v11 = vadd.f32 %v1060_v44, %v1034_v24  ;;  %v1067_v13 = vadd.f32 %v1061_v59, %v1035_v25 }
  0xee   :  { %v1149_v26 = vmul.f32 1.442695, %v1140_v51  ;;  %v2634_v63 = vpop.eup %2633  ;;  %v1068_v3 = vadd.f32 %v1062_v52, %v1036_v54  ;;  %2653 = vpow2.f32 %v1143_v27  ;;  %v1151_v47 = vmul.f32 1.442695, %v1141_v49 }
  0xef   :  { %v1169_v7 = vmul.f32 %v1168_v14, %v3116_v4  ;;  %v2636_v17 = vpop.eup %2635  ;;  %v1065_v61 = vmul.f32 %v2628_v33, %v3593_v58  ;;  %2655 = vpow2.f32 %v1145_v35  ;;  %v1153_v15 = vmul.f32 1.442695, %v1142_v56 }
  0xf0   :  { %v1170_v1 = vmul.f32 %v1168_v14, %v3118_v6  ;;  %v2638_v18 = vpop.eup %2637  ;;  %v1069_v55 = vadd.f32 %v1063_v53, %v1037_v50  ;;  %v1070_v19 = vadd.f32 %v1064_v57, %v1038_v48  ;;  %2657 = vpow2.f32 %v1147_v60 }
  0xf1   :  { %v1171_v0 = vmul.f32 %v1168_v14, %v3120_v8  ;;  %v2640_v20 = vpop.eup %2639  ;;  %v1092_v23 = vmul.f32 %v2630_v34, %v3611_v30  ;;  %v1093_v24 = vmul.f32 %v2632_v39, %v3611_v30  ;;  %2659 = vpow2.f32 %v1149_v26 }
  0xf2   :  { %v1172_v25 = vmul.f32 %v1168_v14, %v3122_v9  ;;  %v1094_v58 = vmul.f32 %v2634_v63, %v3611_v30  ;;  %2661 = vpow2.f32 %v1151_v47  ;;  %v1173_v22 = vmul.f32 %v1168_v14, %v3126_v10 }
  0xf3   :  { %v1175_v29 = vmul.f32 1.442695, %v1169_v7  ;;  %v2642_v31 = vpop.eup %2641  ;;  %v1095_v32 = vmul.f32 %v2636_v17, %v3611_v30  ;;  %2663 = vpow2.f32 %v1153_v15  ;;  %v1174_v62 = vmul.f32 %v1168_v14, %v3129_v12 }
  0xf4   :  { %v1177_v36 = vmul.f32 1.442695, %v1170_v1  ;;  %v2644_v54 = vpop.eup %2643  ;;  %v1071_v16 = vadd.f32 %v1065_v61, %v1039_v5  ;;  %v1096_v21 = vmul.f32 %v2638_v18, %v3611_v30  ;;  %v1097_v2 = vmul.f32 %v2640_v20, %v3611_v30 }
  0xf5   :  { %v1179_v46 = vmul.f32 1.442695, %v1171_v0  ;;  %v2646_v50 = vpop.eup %2645  ;;  %v1123_v28 = vstv %s3625_s30  ;;  %v1181_v37 = vmul.f32 1.442695, %v1172_v25  ;;  %v1200_v44 = vstv %s3629_s2  ;;  %s3852_s30 = sld [smem:[#allocation2 + $0x65]] }
  0xf6   :  { %v2648_v59 = vpop.eup %2647  ;;  %v1098_v51 = vadd.f32 %v1092_v23, %v1066_v11  ;;  %v1099_v52 = vadd.f32 %v1093_v24, %v1067_v13  ;;  %2665 = vpow2.f32 %v1175_v29  ;;  %v1183_v49 = vmul.f32 1.442695, %v1173_v22  ;;  %s3862_s2 = sld [smem:[#allocation2 + $0x2c]] }
  0xf7   :  { %v2650_v27 = vpop.eup %2649  ;;  %v1100_v33 = vadd.f32 %v1094_v58, %v1068_v3  ;;  %v1101_v56 = vadd.f32 %v1095_v32, %v1069_v55  ;;  %2667 = vpow2.f32 %v1177_v36  ;;  %v1185_v35 = vmul.f32 1.442695, %v1174_v62 }
  0xf8   :  { %v2652_v14 = vpop.eup %2651  ;;  %v1102_v34 = vadd.f32 %v1096_v21, %v1070_v19  ;;  %v1103_v30 = vadd.f32 %v1097_v2, %v1071_v16  ;;  %2669 = vpow2.f32 %v1179_v46  ;;  %v1201_v48 = vmul.f32 %v1200_v44, %v3116_v4 }
  0xf9   :  { %v1124_v53 = vmul.f32 %v2642_v31, %v1123_v28  ;;  %v1125_v57 = vmul.f32 %v2644_v54, %v1123_v28  ;;  %2671 = vpow2.f32 %v1181_v37  ;;  %v1202_v60 = vmul.f32 %v1200_v44, %v3118_v6 }
  0xfa   :  { %v1126_v39 = vmul.f32 %v2646_v50, %v1123_v28  ;;  %v1127_v5 = vmul.f32 %v2648_v59, %v1123_v28  ;;  %2673 = vpow2.f32 %v1183_v49  ;;  %v1203_v11 = vmul.f32 %v1200_v44, %v3120_v8 }
  0xfb   :  { %v2654_v13 = vpop.eup %2653  ;;  %v1128_v26 = vmul.f32 %v2650_v27, %v1123_v28  ;;  %v1129_v63 = vmul.f32 %v2652_v14, %v1123_v28  ;;  %2675 = vpow2.f32 %v1185_v35  ;;  %v1204_v3 = vmul.f32 %v1200_v44, %v3122_v9 }
  0xfc   :  { %v2656_v47 = vpop.eup %2655  ;;  %v1205_v7 = vmul.f32 %v1200_v44, %v3126_v10  ;;  %v1207_v17 = vmul.f32 1.442695, %v1201_v48  ;;  %v1155_v15 = vstv %s3642_s3  ;;  %v1206_v1 = vmul.f32 %v1200_v44, %v3129_v12  ;;  %s3867_s3 = sld [smem:[#allocation2 + $0x66]] }
  0xfd   :  { %v2658_v61 = vpop.eup %2657  ;;  %v1209_v18 = vmul.f32 1.442695, %v1202_v60  ;;  %v1232_v55 = vstv %s3646_s4  ;;  %v1130_v0 = vadd.f32 %v1124_v53, %v1098_v51  ;;  %v1131_v20 = vadd.f32 %v1125_v57, %v1099_v52  ;;  %s3880_s4 = sld [smem:[#allocation2 + $0x67]] }
  0xfe   :  { %v2660_v19 = vpop.eup %2659  ;;  %v1132_v23 = vadd.f32 %v1126_v39, %v1100_v33  ;;  %v1211_v24 = vmul.f32 1.442695, %v1203_v11  ;;  %v1133_v58 = vadd.f32 %v1127_v5, %v1101_v56  ;;  %v1134_v22 = vadd.f32 %v1128_v26, %v1102_v34 }
  0xff   :  { %v2662_v25 = vpop.eup %2661  ;;  %v1135_v29 = vadd.f32 %v1129_v63, %v1103_v30  ;;  %v1213_v31 = vmul.f32 1.442695, %v1204_v3  ;;  %v1156_v62 = vmul.f32 %v2654_v13, %v1155_v15  ;;  %2677 = vpow2.f32 %v1207_v17 }
 0x100   :  { %v2664_v32 = vpop.eup %2663  ;;  %v1215_v36 = vmul.f32 1.442695, %v1205_v7  ;;  %v1233_v54 = vmul.f32 %v1232_v55, %v3116_v4  ;;  %v1157_v16 = vmul.f32 %v2656_v47, %v1155_v15  ;;  %2679 = vpow2.f32 %v1209_v18 }
 0x101   :  { %v1217_v21 = vmul.f32 1.442695, %v1206_v1  ;;  %v1234_v2 = vmul.f32 %v1232_v55, %v3118_v6  ;;  %v1158_v46 = vmul.f32 %v2658_v61, %v1155_v15  ;;  %v1159_v50 = vmul.f32 %v2660_v19, %v1155_v15 }
 0x102   :  { %2681 = vpow2.f32 %v1211_v24  ;;  %v1235_v28 = vmul.f32 %v1232_v55, %v3120_v8  ;;  %v1160_v44 = vmul.f32 %v2662_v25, %v1155_v15  ;;  %v1161_v59 = vmul.f32 %v2664_v32, %v1155_v15 }
 0x103   :  { %v2666_v37 = vpop.eup %2665  ;;  %2683 = vpow2.f32 %v1213_v31  ;;  %v1236_v51 = vmul.f32 %v1232_v55, %v3122_v9  ;;  %v1187_v49 = vstv %s3654_s5  ;;  %v1237_v27 = vmul.f32 %v1232_v55, %v3126_v10  ;;  %s3890_s5 = sld [smem:[#allocation2 + $0x2d]] }
 0x104   :  { %v2668_v52 = vpop.eup %2667  ;;  %2685 = vpow2.f32 %v1215_v36  ;;  %v1239_v33 = vmul.f32 1.442695, %v1233_v54  ;;  %v1238_v35 = vmul.f32 %v1232_v55, %v3129_v12  ;;  %v1241_v14 = vmul.f32 1.442695, %v1234_v2 }
 0x105   :  { %v2670_v56 = vpop.eup %2669  ;;  %2687 = vpow2.f32 %v1217_v21  ;;  %v1264_v34 = vstv %s3657_s6  ;;  %v1162_v48 = vadd.f32 %v1156_v62, %v1130_v0  ;;  %v1163_v53 = vadd.f32 %v1157_v16, %v1131_v20  ;;  %s3904_s6 = sld [smem:[#allocation2 + $0x68]] }
 0x106   :  { %v2672_v30 = vpop.eup %2671  ;;  %v1164_v57 = vadd.f32 %v1158_v46, %v1132_v23  ;;  %v1243_v60 = vmul.f32 1.442695, %v1235_v28  ;;  %v1165_v5 = vadd.f32 %v1159_v50, %v1133_v58  ;;  %v1166_v11 = vadd.f32 %v1160_v44, %v1134_v22 }
 0x107   :  { %v2674_v39 = vpop.eup %2673  ;;  %v1167_v13 = vadd.f32 %v1161_v59, %v1135_v29  ;;  %v1245_v26 = vmul.f32 1.442695, %v1236_v51  ;;  %v1188_v3 = vmul.f32 %v2666_v37, %v1187_v49  ;;  %2689 = vpow2.f32 %v1239_v33 }
 0x108   :  { %v2676_v63 = vpop.eup %2675  ;;  %v1247_v47 = vmul.f32 1.442695, %v1237_v27  ;;  %v1265_v7 = vmul.f32 %v1264_v34, %v3116_v4  ;;  %v1189_v17 = vmul.f32 %v2668_v52, %v1187_v49  ;;  %2691 = vpow2.f32 %v1241_v14 }
 0x109   :  { %v1249_v61 = vmul.f32 1.442695, %v1238_v35  ;;  %v1266_v15 = vmul.f32 %v1264_v34, %v3118_v6  ;;  %v1190_v1 = vmul.f32 %v2670_v56, %v1187_v49  ;;  %v1191_v18 = vmul.f32 %v2672_v30, %v1187_v49 }
 0x10a   :  { %2693 = vpow2.f32 %v1243_v60  ;;  %v1267_v55 = vmul.f32 %v1264_v34, %v3120_v8  ;;  %v1192_v19 = vmul.f32 %v2674_v39, %v1187_v49  ;;  %v1193_v0 = vmul.f32 %v2676_v63, %v1187_v49 }
 0x10b   :  { %2695 = vpow2.f32 %v1245_v26  ;;  %v1268_v20 = vmul.f32 %v1264_v34, %v3122_v9  ;;  %v1269_v23 = vmul.f32 %v1264_v34, %v3126_v10  ;;  %v1271_v24 = vmul.f32 1.442695, %v1265_v7 }
 0x10c   :  { %2697 = vpow2.f32 %v1247_v47  ;;  %v1296_v25 = vstv %s3666_s7  ;;  %v2678_v58 = vpop.eup %2677  ;;  %v1219_v22 = vstv %s3670_s8  ;;  %v1270_v29 = vmul.f32 %v1264_v34, %v3129_v12  ;;  %s3925_s7 = sld [smem:[#allocation2 + $0x69]] }
 0x10d   :  { %2699 = vpow2.f32 %v1249_v61  ;;  %v1273_v31 = vmul.f32 1.442695, %v1266_v15  ;;  %v2680_v32 = vpop.eup %2679  ;;  %v1194_v62 = vadd.f32 %v1188_v3, %v1162_v48  ;;  %v1195_v36 = vadd.f32 %v1189_v17, %v1163_v53  ;;  %s3929_s8 = sld [smem:[#allocation2 + $0x2e]] }
 0x10e   :  { %v1196_v54 = vadd.f32 %v1190_v1, %v1164_v57  ;;  %v1275_v16 = vmul.f32 1.442695, %v1267_v55  ;;  %v1197_v2 = vadd.f32 %v1191_v18, %v1165_v5  ;;  %v1198_v46 = vadd.f32 %v1192_v19, %v1166_v11 }
 0x10f   :  { %v2682_v21 = vpop.eup %2681  ;;  %v1277_v50 = vmul.f32 1.442695, %v1268_v20  ;;  %v1297_v28 = vmul.f32 %v1296_v25, %v3116_v4  ;;  %v1199_v44 = vadd.f32 %v1193_v0, %v1167_v13  ;;  %2701 = vpow2.f32 %v1271_v24 }
 0x110   :  { %v2684_v37 = vpop.eup %2683  ;;  %v1279_v59 = vmul.f32 1.442695, %v1269_v23  ;;  %v1298_v51 = vmul.f32 %v1296_v25, %v3118_v6  ;;  %v1220_v49 = vmul.f32 %v2678_v58, %v1219_v22  ;;  %2703 = vpow2.f32 %v1273_v31 }
 0x111   :  { %v2686_v52 = vpop.eup %2685  ;;  %v1281_v27 = vmul.f32 1.442695, %v1270_v29  ;;  %v1299_v33 = vmul.f32 %v1296_v25, %v3120_v8  ;;  %v1221_v35 = vmul.f32 %v2680_v32, %v1219_v22  ;;  %v1222_v14 = vmul.f32 %v2682_v21, %v1219_v22 }
 0x112   :  { %v2688_v56 = vpop.eup %2687  ;;  %2705 = vpow2.f32 %v1275_v16  ;;  %v1300_v34 = vmul.f32 %v1296_v25, %v3122_v9  ;;  %v1301_v30 = vmul.f32 %v1296_v25, %v3126_v10  ;;  %v1303_v48 = vmul.f32 1.442695, %v1297_v28 }
 0x113   :  { %2707 = vpow2.f32 %v1277_v50  ;;  %v1328_v53 = vstv %s3677_s0  ;;  %v1223_v57 = vmul.f32 %v2684_v37, %v1219_v22  ;;  %v1302_v60 = vmul.f32 %v1296_v25, %v3129_v12  ;;  %s3943_s0 = sld [smem:[#allocation2 + $0x2f]] }
 0x114   :  { %2709 = vpow2.f32 %v1279_v59  ;;  %v1305_v39 = vmul.f32 1.442695, %v1298_v51  ;;  %v2690_v5 = vpop.eup %2689  ;;  %v1224_v11 = vmul.f32 %v2686_v52, %v1219_v22  ;;  %v1225_v13 = vmul.f32 %v2688_v56, %v1219_v22 }
 0x115   :  { %2711 = vpow2.f32 %v1281_v27  ;;  %v1307_v26 = vmul.f32 1.442695, %v1299_v33  ;;  %v2692_v63 = vpop.eup %2691  ;;  %v1226_v3 = vadd.f32 %v1220_v49, %v1194_v62  ;;  %v1251_v47 = vstv %s3684_s9  ;;  %s3948_s9 = sld [smem:[#allocation2 + $0x6a]] }
 0x116   :  { %v1309_v7 = vmul.f32 1.442695, %v1300_v34  ;;  %v1329_v17 = vmul.f32 %v1328_v53, %v3116_v4  ;;  %v1227_v15 = vadd.f32 %v1221_v35, %v1195_v36  ;;  %v1228_v1 = vadd.f32 %v1222_v14, %v1196_v54 }
 0x117   :  { %v2694_v61 = vpop.eup %2693  ;;  %2713 = vpow2.f32 %v1303_v48  ;;  %v1311_v18 = vmul.f32 1.442695, %v1301_v30  ;;  %v1229_v19 = vadd.f32 %v1223_v57, %v1197_v2  ;;  %v1313_v0 = vmul.f32 1.442695, %v1302_v60 }
 0x118   :  { %v2696_v55 = vpop.eup %2695  ;;  %2715 = vpow2.f32 %v1305_v39  ;;  %v1330_v20 = vmul.f32 %v1328_v53, %v3118_v6  ;;  %v1230_v24 = vadd.f32 %v1224_v11, %v1198_v46  ;;  %v1231_v25 = vadd.f32 %v1225_v13, %v1199_v44 }
 0x119   :  { %v2698_v23 = vpop.eup %2697  ;;  %2717 = vpow2.f32 %v1307_v26  ;;  %v1331_v58 = vmul.f32 %v1328_v53, %v3120_v8  ;;  %v1252_v29 = vmul.f32 %v2690_v5, %v1251_v47  ;;  %v1332_v31 = vmul.f32 %v1328_v53, %v3122_v9 }
 0x11a   :  { %v2700_v22 = vpop.eup %2699  ;;  %2719 = vpow2.f32 %v1309_v7  ;;  %v1335_v32 = vmul.f32 1.442695, %v1329_v17  ;;  %v1253_v62 = vmul.f32 %v2692_v63, %v1251_v47  ;;  %v1333_v36 = vmul.f32 %v1328_v53, %v3126_v10 }
 0x11b   :  { %2721 = vpow2.f32 %v1311_v18  ;;  %v1360_v54 = vstv %s3690_s10  ;;  %v1254_v16 = vmul.f32 %v2694_v61, %v1251_v47  ;;  %v1334_v21 = vmul.f32 %v1328_v53, %v3129_v12  ;;  %s3957_s10 = sld [smem:[#allocation2 + $0x30]] }
 0x11c   :  { %2723 = vpow2.f32 %v1313_v0  ;;  %v1337_v2 = vmul.f32 1.442695, %v1330_v20  ;;  %v2702_v46 = vpop.eup %2701  ;;  %v1255_v50 = vmul.f32 %v2696_v55, %v1251_v47  ;;  %v1256_v28 = vmul.f32 %v2698_v23, %v1251_v47 }
 0x11d   :  { %v1257_v37 = vmul.f32 %v2700_v22, %v1251_v47  ;;  %v1339_v44 = vmul.f32 1.442695, %v1331_v58  ;;  %v2704_v59 = vpop.eup %2703  ;;  %2725 = vpow2.f32 %v1335_v32  ;;  %v1341_v51 = vmul.f32 1.442695, %v1332_v31 }
 0x11e   :  { %v1361_v52 = vmul.f32 %v1360_v54, %v3116_v4  ;;  %v1258_v27 = vadd.f32 %v1252_v29, %v1226_v3  ;;  %v1259_v33 = vadd.f32 %v1253_v62, %v1227_v15  ;;  %v1283_v56 = vstv %s3697_s11  ;;  %s3960_s11 = sld [smem:[#allocation2 + $0x6b]] }
 0x11f   :  { %v2706_v49 = vpop.eup %2705  ;;  %v1343_v35 = vmul.f32 1.442695, %v1333_v36  ;;  %v1260_v34 = vadd.f32 %v1254_v16, %v1228_v1  ;;  %2727 = vpow2.f32 %v1337_v2  ;;  %v1345_v30 = vmul.f32 1.442695, %v1334_v21 }
 0x120   :  { %v2708_v14 = vpop.eup %2707  ;;  %v1362_v48 = vmul.f32 %v1360_v54, %v3118_v6  ;;  %v1261_v57 = vadd.f32 %v1255_v50, %v1229_v19  ;;  %v1262_v60 = vadd.f32 %v1256_v28, %v1230_v24  ;;  %v1263_v39 = vadd.f32 %v1257_v37, %v1231_v25 }
 0x121   :  { %v2710_v53 = vpop.eup %2709  ;;  %2729 = vpow2.f32 %v1339_v44  ;;  %v1284_v11 = vmul.f32 %v2702_v46, %v1283_v56  ;;  %v1363_v13 = vmul.f32 %v1360_v54, %v3120_v8  ;;  %v1367_v26 = vmul.f32 1.442695, %v1361_v52 }
 0x122   :  { %v2712_v5 = vpop.eup %2711  ;;  %2731 = vpow2.f32 %v1341_v51  ;;  %v1285_v63 = vmul.f32 %v2704_v59, %v1283_v56  ;;  %v1286_v3 = vmul.f32 %v2706_v49, %v1283_v56  ;;  %v1364_v47 = vmul.f32 %v1360_v54, %v3122_v9 }
 0x123   :  { %2733 = vpow2.f32 %v1343_v35  ;;  %v1365_v17 = vmul.f32 %v1360_v54, %v3126_v10  ;;  %v1369_v61 = vmul.f32 1.442695, %v1362_v48  ;;  %v1392_v15 = vstv %s3704_s12  ;;  %s3968_s12 = sld [smem:[#allocation2 + $0x31]] }
 0x124   :  { %v2714_v7 = vpop.eup %2713  ;;  %2735 = vpow2.f32 %v1345_v30  ;;  %v1287_v18 = vmul.f32 %v2708_v14, %v1283_v56  ;;  %v1288_v55 = vmul.f32 %v2710_v53, %v1283_v56  ;;  %v1289_v19 = vmul.f32 %v2712_v5, %v1283_v56 }
 0x125   :  { %v2716_v1 = vpop.eup %2715  ;;  %v1366_v0 = vmul.f32 %v1360_v54, %v3129_v12  ;;  %v1315_v23 = vstv %s3707_s13  ;;  %2737 = vpow2.f32 %v1367_v26  ;;  %v1371_v24 = vmul.f32 1.442695, %v1363_v13  ;;  %s3971_s13 = sld [smem:[#allocation2 + $0x6c]] }
 0x126   :  { %v2718_v20 = vpop.eup %2717  ;;  %v1290_v58 = vadd.f32 %v1284_v11, %v1258_v27  ;;  %v3725_v22 = vstv %s3710_s14  ;;  %v1373_v29 = vmul.f32 1.442695, %v1364_v47  ;;  %v1393_v31 = vmul.f32 %v1392_v15, %v3116_v4  ;;  %s3979_s14 = sld [smem:[#allocation2 + $0x6d]] }
 0x127   :  { %v2720_v25 = vpop.eup %2719  ;;  %v1291_v62 = vadd.f32 %v1285_v63, %v1259_v33  ;;  %v1292_v36 = vadd.f32 %v1286_v3, %v1260_v34  ;;  %2739 = vpow2.f32 %v1369_v61  ;;  %v1375_v54 = vmul.f32 1.442695, %v1365_v17 }
 0x128   :  { %v2722_v32 = vpop.eup %2721  ;;  %v1293_v21 = vadd.f32 %v1287_v18, %v1261_v57  ;;  %v1294_v2 = vadd.f32 %v1288_v55, %v1262_v60  ;;  %v1295_v46 = vadd.f32 %v1289_v19, %v1263_v39  ;;  %v1377_v50 = vmul.f32 1.442695, %v1366_v0 }
 0x129   :  { %v2724_v16 = vpop.eup %2723  ;;  %v1316_v28 = vmul.f32 %v2714_v7, %v1315_v23  ;;  %v1317_v37 = vmul.f32 %v2716_v1, %v1315_v23  ;;  %2741 = vpow2.f32 %v1371_v24  ;;  %v1394_v44 = vmul.f32 %v1392_v15, %v3118_v6 }
 0x12a   :  { %v2726_v59 = vpop.eup %2725  ;;  %v1318_v51 = vmul.f32 %v2718_v20, %v1315_v23  ;;  %2743 = vpow2.f32 %v1373_v29  ;;  %v1395_v52 = vmul.f32 %v1392_v15, %v3120_v8  ;;  %v1399_v49 = vmul.f32 1.442695, %v1393_v31 }
 0x12b   :  { %v1319_v27 = vmul.f32 %v2720_v25, %v1315_v23  ;;  %v1320_v33 = vmul.f32 %v2722_v32, %v1315_v23  ;;  %v1321_v56 = vmul.f32 %v2724_v16, %v1315_v23  ;;  %2745 = vpow2.f32 %v1375_v54 }
 0x12c   :  { %v2728_v35 = vpop.eup %2727  ;;  %2747 = vpow2.f32 %v1377_v50  ;;  %v1396_v14 = vmul.f32 %v1392_v15, %v3122_v9  ;;  %v1397_v34 = vmul.f32 %v1392_v15, %v3126_v10  ;;  %v1398_v30 = vmul.f32 %v1392_v15, %v3129_v12 }
 0x12d   :  { %v1322_v53 = vadd.f32 %v1316_v28, %v1290_v58  ;;  %v1348_v57 = vmul.f32 %v2726_v59, %v3725_v22  ;;  %v3739_v60 = vstv %s3719_s15  ;;  %v1401_v39 = vmul.f32 1.442695, %v1394_v44  ;;  %s3984_s15 = sld [smem:[#allocation2 + $0x32]] }
 0x12e   :  { %v2730_v48 = vpop.eup %2729  ;;  %v1323_v11 = vadd.f32 %v1317_v37, %v1291_v62  ;;  %2749 = vpow2.f32 %v1399_v49  ;;  %v1403_v13 = vmul.f32 1.442695, %v1395_v52  ;;  %v1424_v26 = vstv %s3722_s16  ;;  %s3991_s16 = sld [smem:[#allocation2 + $0x6e]] }
 0x12f   :  { %v2732_v5 = vpop.eup %2731  ;;  %v1324_v3 = vadd.f32 %v1318_v51, %v1292_v36  ;;  %v1325_v47 = vadd.f32 %v1319_v27, %v1293_v21  ;;  %v1326_v7 = vadd.f32 %v1320_v33, %v1294_v2  ;;  %v1349_v17 = vmul.f32 %v2728_v35, %v3725_v22 }
 0x130   :  { %v2734_v63 = vpop.eup %2733  ;;  %v1327_v15 = vadd.f32 %v1321_v56, %v1295_v46  ;;  %v1405_v1 = vmul.f32 1.442695, %v1396_v14  ;;  %v1407_v18 = vmul.f32 1.442695, %v1397_v34  ;;  %v1409_v55 = vmul.f32 1.442695, %v1398_v30 }
 0x131   :  { %v2736_v61 = vpop.eup %2735  ;;  %v1350_v19 = vmul.f32 %v2730_v48, %v3725_v22  ;;  %v1354_v0 = vadd.f32 %v1348_v57, %v1322_v53  ;;  %2751 = vpow2.f32 %v1401_v39  ;;  %v1425_v20 = vmul.f32 %v1424_v26, %v3116_v4 }
 0x132   :  { %v2738_v23 = vpop.eup %2737  ;;  %v1351_v24 = vmul.f32 %v2732_v5, %v3725_v22  ;;  %v1352_v25 = vmul.f32 %v2734_v63, %v3725_v22  ;;  %2753 = vpow2.f32 %v1403_v13  ;;  %v1426_v58 = vmul.f32 %v1424_v26, %v3118_v6 }
 0x133   :  { %v1353_v29 = vmul.f32 %v2736_v61, %v3725_v22  ;;  %v1355_v31 = vadd.f32 %v1349_v17, %v1323_v11  ;;  %v3752_v32 = vstv %s3730_s17  ;;  %v1427_v62 = vmul.f32 %v1424_v26, %v3120_v8  ;;  %s3999_s17 = sld [smem:[#allocation2 + $0x33]] }
 0x134   :  { %v2740_v36 = vpop.eup %2739  ;;  %2755 = vpow2.f32 %v1405_v1  ;;  %v1428_v54 = vmul.f32 %v1424_v26, %v3122_v9  ;;  %v1429_v16 = vmul.f32 %v1424_v26, %v3126_v10  ;;  %v1430_v21 = vmul.f32 %v1424_v26, %v3129_v12 }
 0x135   :  { %v1380_v2 = vmul.f32 %v2738_v23, %v3739_v60  ;;  %2757 = vpow2.f32 %v1407_v18  ;;  %v1431_v46 = vmul.f32 1.442695, %v1425_v20  ;;  %v1456_v22 = vstv %s3735_s18  ;;  %s4004_s18 = sld [smem:[#allocation2 + $0x6f]] }
 0x136   :  { %v2742_v50 = vpop.eup %2741  ;;  %v1356_v28 = vadd.f32 %v1350_v19, %v1324_v3  ;;  %v1357_v37 = vadd.f32 %v1351_v24, %v1325_v47  ;;  %v1358_v44 = vadd.f32 %v1352_v25, %v1326_v7  ;;  %v1433_v59 = vmul.f32 1.442695, %v1426_v58 }
 0x137   :  { %v2744_v51 = vpop.eup %2743  ;;  %v1359_v52 = vadd.f32 %v1353_v29, %v1327_v15  ;;  %v1381_v49 = vmul.f32 %v2740_v36, %v3739_v60  ;;  %2759 = vpow2.f32 %v1409_v55  ;;  %v1435_v27 = vmul.f32 1.442695, %v1427_v62 }
 0x138   :  { %v2746_v33 = vpop.eup %2745  ;;  %v1437_v56 = vmul.f32 1.442695, %v1428_v54  ;;  %v1439_v35 = vmul.f32 1.442695, %v1429_v16  ;;  %v1441_v14 = vmul.f32 1.442695, %v1430_v21  ;;  %v1457_v34 = vmul.f32 %v1456_v22, %v3116_v4 }
 0x139   :  { %v2748_v30 = vpop.eup %2747  ;;  %v1382_v48 = vmul.f32 %v2742_v50, %v3739_v60  ;;  %v1386_v53 = vadd.f32 %v1380_v2, %v1354_v0  ;;  %2761 = vpow2.f32 %v1431_v46  ;;  %v1458_v57 = vmul.f32 %v1456_v22, %v3118_v6 }
 0x13a   :  { %v1383_v39 = vmul.f32 %v2744_v51, %v3739_v60  ;;  %2763 = vpow2.f32 %v1433_v59  ;;  %v3768_v5 = vstv %s3745_s19  ;;  %v1459_v11 = vmul.f32 %v1456_v22, %v3120_v8  ;;  %s4009_s19 = sld [smem:[#allocation2 + $0x34]] }
 0x13b   :  { %v2750_v13 = vpop.eup %2749  ;;  %v1384_v26 = vmul.f32 %v2746_v33, %v3739_v60  ;;  %v1387_v63 = vadd.f32 %v1381_v49, %v1355_v31  ;;  %2765 = vpow2.f32 %v1435_v27  ;;  %v1460_v3 = vmul.f32 %v1456_v22, %v3122_v9 }
 0x13c   :  { %v1385_v47 = vmul.f32 %v2748_v30, %v3739_v60  ;;  %v1461_v7 = vmul.f32 %v1456_v22, %v3126_v10  ;;  %v1463_v17 = vmul.f32 1.442695, %v1457_v34  ;;  %v1488_v61 = vstv %s3755_s20  ;;  %s4012_s20 = sld [smem:[#allocation2 + $0x35]] }
 0x13d   :  { %v1388_v15 = vadd.f32 %v1382_v48, %v1356_v28  ;;  %2767 = vpow2.f32 %v1437_v56  ;;  %v1462_v1 = vmul.f32 %v1456_v22, %v3129_v12  ;;  %v1465_v18 = vmul.f32 1.442695, %v1458_v57 }
 0x13e   :  { %v2752_v55 = vpop.eup %2751  ;;  %v1389_v19 = vadd.f32 %v1383_v39, %v1357_v37  ;;  %v1412_v0 = vmul.f32 %v2750_v13, %v3752_v32  ;;  %2769 = vpow2.f32 %v1439_v35  ;;  %v1467_v20 = vmul.f32 1.442695, %v1459_v11 }
 0x13f   :  { %v2754_v23 = vpop.eup %2753  ;;  %v1390_v24 = vadd.f32 %v1384_v26, %v1358_v44  ;;  %2771 = vpow2.f32 %v1441_v14  ;;  %v1469_v60 = vmul.f32 1.442695, %v1460_v3  ;;  %v1489_v25 = vmul.f32 %v1488_v61, %v3116_v4 }
 0x140   :  { %v1391_v58 = vadd.f32 %v1385_v47, %v1359_v52  ;;  %2773 = vpow2.f32 %v1463_v17  ;;  %v1471_v29 = vmul.f32 1.442695, %v1461_v7  ;;  %v1490_v31 = vmul.f32 %v1488_v61, %v3118_v6 }
 0x141   :  { %v2756_v62 = vpop.eup %2755  ;;  %v1413_v36 = vmul.f32 %v2752_v55, %v3752_v32  ;;  %2775 = vpow2.f32 %v1465_v18  ;;  %v1473_v54 = vmul.f32 1.442695, %v1462_v1  ;;  %v1491_v16 = vmul.f32 %v1488_v61, %v3120_v8 }
 0x142   :  { %v2758_v21 = vpop.eup %2757  ;;  %v1414_v2 = vmul.f32 %v2754_v23, %v3752_v32  ;;  %v1418_v46 = vadd.f32 %v1412_v0, %v1386_v53  ;;  %2777 = vpow2.f32 %v1467_v20  ;;  %v1492_v22 = vmul.f32 %v1488_v61, %v3122_v9 }
 0x143   :  { %2779 = vpow2.f32 %v1469_v60  ;;  %v1493_v50 = vmul.f32 %v1488_v61, %v3126_v10  ;;  %v1495_v28 = vmul.f32 1.442695, %v1489_v25  ;;  %v1520_v37 = vstv %s3771_s21  ;;  %s4021_s21 = sld [smem:[#allocation2 + $0x36]] }
 0x144   :  { %v2760_v44 = vpop.eup %2759  ;;  %v1415_v59 = vmul.f32 %v2756_v62, %v3752_v32  ;;  %2781 = vpow2.f32 %v1471_v29  ;;  %v1494_v51 = vmul.f32 %v1488_v61, %v3129_v12  ;;  %v1497_v52 = vmul.f32 1.442695, %v1490_v31 }
 0x145   :  { %v1416_v49 = vmul.f32 %v2758_v21, %v3752_v32  ;;  %2783 = vpow2.f32 %v1473_v54  ;;  %v3798_v27 = vstv %s3778_s22  ;;  %v1499_v33 = vmul.f32 1.442695, %v1491_v16  ;;  %s4025_s22 = sld [smem:[#allocation2 + $0x70]] }
 0x146   :  { %v2762_v56 = vpop.eup %2761  ;;  %v1419_v35 = vadd.f32 %v1413_v36, %v1387_v63  ;;  %v1420_v14 = vadd.f32 %v1414_v2, %v1388_v15  ;;  %v1501_v34 = vmul.f32 1.442695, %v1492_v22  ;;  %v1521_v30 = vmul.f32 %v1520_v37, %v3116_v4 }
 0x147   :  { %v2764_v48 = vpop.eup %2763  ;;  %v1417_v53 = vmul.f32 %v2760_v44, %v3752_v32  ;;  %2785 = vpow2.f32 %v1495_v28  ;;  %v1503_v57 = vmul.f32 1.442695, %v1493_v50  ;;  %v1522_v39 = vmul.f32 %v1520_v37, %v3118_v6 }
 0x148   :  { %v2766_v11 = vpop.eup %2765  ;;  %v1421_v13 = vadd.f32 %v1415_v59, %v1389_v19  ;;  %2787 = vpow2.f32 %v1497_v52  ;;  %v1505_v26 = vmul.f32 1.442695, %v1494_v51  ;;  %v1523_v3 = vmul.f32 %v1520_v37, %v3120_v8 }
 0x149   :  { %v1422_v47 = vadd.f32 %v1416_v49, %v1390_v24  ;;  %v1444_v63 = vmul.f32 %v2762_v56, %v3768_v5  ;;  %2789 = vpow2.f32 %v1499_v33  ;;  %v1524_v7 = vmul.f32 %v1520_v37, %v3122_v9 }
 0x14a   :  { %v2768_v17 = vpop.eup %2767  ;;  %v1445_v32 = vmul.f32 %v2764_v48, %v3768_v5  ;;  %2791 = vpow2.f32 %v1501_v34  ;;  %v1525_v61 = vmul.f32 %v1520_v37, %v3126_v10  ;;  %v1527_v15 = vmul.f32 1.442695, %v1521_v30 }
 0x14b   :  { %v2770_v1 = vpop.eup %2769  ;;  %2793 = vpow2.f32 %v1503_v57  ;;  %v1526_v18 = vmul.f32 %v1520_v37, %v3129_v12  ;;  %v1529_v55 = vmul.f32 1.442695, %v1522_v39  ;;  %v1552_v19 = vstv %s3788_s23  ;;  %s4033_s23 = sld [smem:[#allocation2 + $0x37]] }
 0x14c   :  { %v2772_v0 = vpop.eup %2771  ;;  %v1423_v20 = vadd.f32 %v1417_v53, %v1391_v58  ;;  %v1446_v23 = vmul.f32 %v2766_v11, %v3768_v5  ;;  %2795 = vpow2.f32 %v1505_v26  ;;  %v1531_v24 = vmul.f32 1.442695, %v1523_v3 }
 0x14d   :  { %v2774_v60 = vpop.eup %2773  ;;  %v1447_v25 = vmul.f32 %v2768_v17, %v3768_v5  ;;  %v1450_v29 = vadd.f32 %v1444_v63, %v1418_v46  ;;  %v3815_v31 = vstv %s3794_s24  ;;  %v1533_v62 = vmul.f32 1.442695, %v1524_v7  ;;  %s4036_s24 = sld [smem:[#allocation2 + $0x71]] }
 0x14e   :  { %v2776_v36 = vpop.eup %2775  ;;  %v1451_v54 = vadd.f32 %v1445_v32, %v1419_v35  ;;  %2797 = vpow2.f32 %v1527_v15  ;;  %v1535_v16 = vmul.f32 1.442695, %v1525_v61  ;;  %v1553_v21 = vmul.f32 %v1552_v19, %v3116_v4 }
 0x14f   :  { %v2778_v2 = vpop.eup %2777  ;;  %v1448_v58 = vmul.f32 %v2770_v1, %v3768_v5  ;;  %2799 = vpow2.f32 %v1529_v55  ;;  %v1537_v22 = vmul.f32 1.442695, %v1526_v18  ;;  %v1554_v50 = vmul.f32 %v1552_v19, %v3118_v6 }
 0x150   :  { %v2780_v28 = vpop.eup %2779  ;;  %v1449_v46 = vmul.f32 %v2772_v0, %v3768_v5  ;;  %v1452_v37 = vadd.f32 %v1446_v23, %v1420_v14  ;;  %2801 = vpow2.f32 %v1531_v24  ;;  %v1555_v44 = vmul.f32 %v1552_v19, %v3120_v8 }
 0x151   :  { %v2782_v59 = vpop.eup %2781  ;;  %v1453_v51 = vadd.f32 %v1447_v25, %v1421_v13  ;;  %v1476_v52 = vmul.f32 %v2774_v60, %v3798_v27  ;;  %2803 = vpow2.f32 %v1533_v62  ;;  %v1556_v49 = vmul.f32 %v1552_v19, %v3122_v9 }
 0x152   :  { %v2784_v33 = vpop.eup %2783  ;;  %v1477_v56 = vmul.f32 %v2776_v36, %v3798_v27  ;;  %2805 = vpow2.f32 %v1535_v16  ;;  %v1557_v35 = vmul.f32 %v1552_v19, %v3126_v10  ;;  %v1559_v34 = vmul.f32 1.442695, %v1553_v21 }
 0x153   :  { %2807 = vpow2.f32 %v1537_v22  ;;  %v1558_v5 = vmul.f32 %v1552_v19, %v3129_v12  ;;  %v1561_v14 = vmul.f32 1.442695, %v1554_v50  ;;  %v1584_v30 = vstv %s3808_s25  ;;  %s4047_s25 = sld [smem:[#allocation2 + $0x38]] }
 0x154   :  { %v2786_v48 = vpop.eup %2785  ;;  %v1454_v53 = vadd.f32 %v1448_v58, %v1422_v47  ;;  %v1478_v57 = vmul.f32 %v2778_v2, %v3798_v27  ;;  %v1479_v39 = vmul.f32 %v2780_v28, %v3798_v27  ;;  %v1563_v11 = vmul.f32 1.442695, %v1555_v44 }
 0x155   :  { %v2788_v13 = vpop.eup %2787  ;;  %v1455_v26 = vadd.f32 %v1449_v46, %v1423_v20  ;;  %v1480_v3 = vmul.f32 %v2782_v59, %v3798_v27  ;;  %v1481_v63 = vmul.f32 %v2784_v33, %v3798_v27  ;;  %v1565_v7 = vmul.f32 1.442695, %v1556_v49 }
 0x156   :  { %v2790_v17 = vpop.eup %2789  ;;  %v1482_v32 = vadd.f32 %v1476_v52, %v1450_v29  ;;  %2809 = vpow2.f32 %v1559_v34  ;;  %v1567_v61 = vmul.f32 1.442695, %v1557_v35  ;;  %v1585_v47 = vmul.f32 %v1584_v30, %v3116_v4 }
 0x157   :  { %v2792_v15 = vpop.eup %2791  ;;  %v1483_v1 = vadd.f32 %v1477_v56, %v1451_v54  ;;  %v1539_v18 = vstv %s3818_s26  ;;  %2811 = vpow2.f32 %v1561_v14  ;;  %v1569_v55 = vmul.f32 1.442695, %v1558_v5  ;;  %s4062_s26 = sld [smem:[#allocation2 + $0x72]] }
 0x158   :  { %v2794_v19 = vpop.eup %2793  ;;  %v1484_v0 = vadd.f32 %v1478_v57, %v1452_v37  ;;  %v1485_v23 = vadd.f32 %v1479_v39, %v1453_v51  ;;  %v1508_v20 = vmul.f32 %v2786_v48, %v3815_v31  ;;  %2813 = vpow2.f32 %v1563_v11 }
 0x159   :  { %v2796_v24 = vpop.eup %2795  ;;  %v1486_v27 = vadd.f32 %v1480_v3, %v1454_v53  ;;  %v1487_v60 = vadd.f32 %v1481_v63, %v1455_v26  ;;  %2815 = vpow2.f32 %v1565_v7  ;;  %v1586_v25 = vmul.f32 %v1584_v30, %v3118_v6 }
 0x15a   :  { %v1509_v29 = vmul.f32 %v2788_v13, %v3815_v31  ;;  %2817 = vpow2.f32 %v1567_v61  ;;  %v1587_v62 = vmul.f32 %v1584_v30, %v3120_v8  ;;  %v1591_v36 = vmul.f32 1.442695, %v1585_v47 }
 0x15b   :  { %v2798_v54 = vpop.eup %2797  ;;  %v1510_v16 = vmul.f32 %v2790_v17, %v3815_v31  ;;  %v1511_v21 = vmul.f32 %v2792_v15, %v3815_v31  ;;  %v1512_v2 = vmul.f32 %v2794_v19, %v3815_v31  ;;  %2819 = vpow2.f32 %v1569_v55 }
 0x15c   :  { %v2800_v58 = vpop.eup %2799  ;;  %v1513_v22 = vmul.f32 %v2796_v24, %v3815_v31  ;;  %v1514_v50 = vadd.f32 %v1508_v20, %v1482_v32  ;;  %v1588_v28 = vmul.f32 %v1584_v30, %v3122_v9  ;;  %v1589_v46 = vmul.f32 %v1584_v30, %v3126_v10 }
 0x15d   :  { %v2802_v37 = vpop.eup %2801  ;;  %v3855_v44 = vstv %s3830_s27  ;;  %v1590_v59 = vmul.f32 %v1584_v30, %v3129_v12  ;;  %v1593_v51 = vmul.f32 1.442695, %v1586_v25  ;;  %v1616_v52 = vstv %s3834_s28  ;;  %s4069_s27 = sld [smem:[#allocation2 + $0x39]] }
 0x15e   :  { %v2804_v49 = vpop.eup %2803  ;;  %v1515_v33 = vadd.f32 %v1509_v29, %v1483_v1  ;;  %v1540_v56 = vmul.f32 %v2798_v54, %v1539_v18  ;;  %2821 = vpow2.f32 %v1591_v36  ;;  %v1595_v35 = vmul.f32 1.442695, %v1587_v62  ;;  %s4081_s28 = sld [smem:[#allocation2 + $0x73]] }
 0x15f   :  { %v2806_v31 = vpop.eup %2805  ;;  %v1516_v34 = vadd.f32 %v1510_v16, %v1484_v0  ;;  %v1517_v5 = vadd.f32 %v1511_v21, %v1485_v23  ;;  %v1518_v14 = vadd.f32 %v1512_v2, %v1486_v27  ;;  %v1541_v48 = vmul.f32 %v2800_v58, %v1539_v18 }
 0x160   :  { %v2808_v53 = vpop.eup %2807  ;;  %v1519_v57 = vadd.f32 %v1513_v22, %v1487_v60  ;;  %v1597_v39 = vmul.f32 1.442695, %v1588_v28  ;;  %v1599_v11 = vmul.f32 1.442695, %v1589_v46  ;;  %v1617_v13 = vmul.f32 %v1616_v52, %v3116_v4 }
 0x161   :  { %v1542_v30 = vmul.f32 %v2802_v37, %v1539_v18  ;;  %2823 = vpow2.f32 %v1593_v51  ;;  %v1601_v26 = vmul.f32 1.442695, %v1590_v59  ;;  %v1618_v3 = vmul.f32 %v1616_v52, %v3118_v6 }
 0x162   :  { %v1543_v63 = vmul.f32 %v2804_v49, %v1539_v18  ;;  %v1546_v7 = vadd.f32 %v1540_v56, %v1514_v50  ;;  %2825 = vpow2.f32 %v1595_v35  ;;  %v1619_v17 = vmul.f32 %v1616_v52, %v3120_v8 }
 0x163   :  { %v2810_v32 = vpop.eup %2809  ;;  %v1544_v61 = vmul.f32 %v2806_v31, %v1539_v18  ;;  %v1545_v47 = vmul.f32 %v2808_v53, %v1539_v18  ;;  %v1547_v15 = vadd.f32 %v1541_v48, %v1515_v33  ;;  %v3865_v1 = vstv %s3844_s29  ;;  %s4108_s29 = sld [smem:[#allocation2 + $0x3a]] }
 0x164   :  { %v2812_v55 = vpop.eup %2811  ;;  %2827 = vpow2.f32 %v1597_v39  ;;  %v1620_v19 = vmul.f32 %v1616_v52, %v3122_v9  ;;  %v1621_v0 = vmul.f32 %v1616_v52, %v3126_v10  ;;  %v1623_v23 = vmul.f32 1.442695, %v1617_v13 }
 0x165   :  { %v2814_v20 = vpop.eup %2813  ;;  %2829 = vpow2.f32 %v1599_v11  ;;  %v1622_v24 = vmul.f32 %v1616_v52, %v3129_v12  ;;  %v1625_v27 = vmul.f32 1.442695, %v1618_v3  ;;  %v1648_v60 = vstv %s3852_s30  ;;  %s4112_s30 = sld [smem:[#allocation2]] }
 0x166   :  { %v2816_v25 = vpop.eup %2815  ;;  %v1548_v18 = vadd.f32 %v1542_v30, %v1516_v34  ;;  %v1549_v29 = vadd.f32 %v1543_v63, %v1517_v5  ;;  %v1572_v62 = vmul.f32 %v2810_v32, %v3855_v44  ;;  %v1627_v36 = vmul.f32 1.442695, %v1619_v17 }
 0x167   :  { %v2818_v54 = vpop.eup %2817  ;;  %v1550_v16 = vadd.f32 %v1544_v61, %v1518_v14  ;;  %v1551_v21 = vadd.f32 %v1545_v47, %v1519_v57  ;;  %v1573_v2 = vmul.f32 %v2812_v55, %v3855_v44  ;;  %2831 = vpow2.f32 %v1601_v26 }
 0x168   :  { %v2820_v58 = vpop.eup %2819  ;;  %2833 = vpow2.f32 %v1623_v23  ;;  %v1629_v22 = vmul.f32 1.442695, %v1620_v19  ;;  %v1631_v50 = vmul.f32 1.442695, %v1621_v0  ;;  %v1649_v28 = vmul.f32 %v1648_v60, %v3116_v4 }
 0x169   :  { %v1574_v46 = vmul.f32 %v2814_v20, %v3855_v44  ;;  %2835 = vpow2.f32 %v1625_v27  ;;  %v1633_v37 = vmul.f32 1.442695, %v1622_v24  ;;  %v1650_v59 = vmul.f32 %v1648_v60, %v3118_v6 }
 0x16a   :  { %v1575_v51 = vmul.f32 %v2816_v25, %v3855_v44  ;;  %v1578_v52 = vadd.f32 %v1572_v62, %v1546_v7  ;;  %2837 = vpow2.f32 %v1627_v36  ;;  %v1651_v49 = vmul.f32 %v1648_v60, %v3120_v8 }
 0x16b   :  { %v2822_v33 = vpop.eup %2821  ;;  %v1576_v56 = vmul.f32 %v2818_v54, %v3855_v44  ;;  %v1577_v35 = vmul.f32 %v2820_v58, %v3855_v44  ;;  %v3885_v31 = vstv %s3862_s2  ;;  %v1652_v34 = vmul.f32 %v1648_v60, %v3122_v9  ;;  %s4117_s2 = sld [smem:[#allocation2 + $0x2]] }
 0x16c   :  { %2839 = vpow2.f32 %v1629_v22  ;;  %v1653_v5 = vmul.f32 %v1648_v60, %v3126_v10  ;;  %v1655_v14 = vmul.f32 1.442695, %v1649_v28  ;;  %v1680_v48 = vstv %s3867_s3  ;;  %s4158_s3 = sld [smem:[#allocation2 + $0x3b]] }
 0x16d   :  { %v1579_v53 = vadd.f32 %v1573_v2, %v1547_v15  ;;  %v1580_v57 = vadd.f32 %v1574_v46, %v1548_v18  ;;  %v1654_v39 = vmul.f32 %v1648_v60, %v3129_v12  ;;  %v1657_v11 = vmul.f32 1.442695, %v1650_v59 }
 0x16e   :  { %v2824_v13 = vpop.eup %2823  ;;  %v1581_v30 = vadd.f32 %v1575_v51, %v1549_v29  ;;  %v1604_v44 = vmul.f32 %v2822_v33, %v3865_v1  ;;  %2841 = vpow2.f32 %v1631_v50  ;;  %v1659_v26 = vmul.f32 1.442695, %v1651_v49 }
 0x16f   :  { %v2826_v3 = vpop.eup %2825  ;;  %v3894_v63 = vadd.f32 %v1576_v56, %v1550_v16  ;;  %2843 = vpow2.f32 %v1633_v37  ;;  %v1661_v7 = vmul.f32 1.442695, %v1652_v34  ;;  %v1681_v17 = vmul.f32 %v1680_v48, %v3116_v4 }
 0x170   :  { %v3897_v32 = vadd.f32 %v1577_v35, %v1551_v21  ;;  %2845 = vpow2.f32 %v1655_v14  ;;  %v1663_v61 = vmul.f32 1.442695, %v1653_v5  ;;  %v1682_v47 = vmul.f32 %v1680_v48, %v3118_v6 }
 0x171   :  { %v2828_v15 = vpop.eup %2827  ;;  %v1605_v55 = vmul.f32 %v2824_v13, %v3865_v1  ;;  %2847 = vpow2.f32 %v1657_v11  ;;  %v1665_v19 = vmul.f32 1.442695, %v1654_v39  ;;  %v1683_v0 = vmul.f32 %v1680_v48, %v3120_v8 }
 0x172   :  { %v2830_v23 = vpop.eup %2829  ;;  %v1606_v20 = vmul.f32 %v2826_v3, %v3865_v1  ;;  %v1610_v24 = vadd.f32 %v1604_v44, %v1578_v52  ;;  %2849 = vpow2.f32 %v1659_v26  ;;  %v1684_v27 = vmul.f32 %v1680_v48, %v3122_v9 }
 0x173   :  { %2851 = vpow2.f32 %v1661_v7  ;;  %v1685_v60 = vmul.f32 %v1680_v48, %v3126_v10  ;;  %v1687_v25 = vmul.f32 1.442695, %v1681_v17  ;;  %v1712_v18 = vstv %s3880_s4  ;;  %s3082_s4 = smov [#allocation5]  }
 0x174   :  { %v2832_v29 = vpop.eup %2831  ;;  %v1607_v62 = vmul.f32 %v2828_v15, %v3865_v1  ;;  %2853 = vpow2.f32 %v1663_v61  ;;  %v1686_v36 = vmul.f32 %v1680_v48, %v3129_v12  ;;  %v1689_v54 = vmul.f32 1.442695, %v1682_v47 }
 0x175   :  { %v2834_v16 = vpop.eup %2833  ;;  %v1608_v21 = vmul.f32 %v2830_v23, %v3865_v1  ;;  %v1611_v2 = vadd.f32 %v1605_v55, %v1579_v53  ;;  %v3912_v58 = vstv %s3890_s5  ;;  %v1691_v22 = vmul.f32 1.442695, %v1683_v0  ;;  %s2211_s5 = sshll.u32 %s3082_s4, 4  ;;  %s2212_s5 = int_to_ptr.vmem [resolvable:$true] %s2211_s5 }
 0x176   :  { %v2836_v50 = vpop.eup %2835  ;;  %v1612_v28 = vadd.f32 %v1606_v20, %v1580_v57  ;;  %2855 = vpow2.f32 %v1665_v19  ;;  %v1693_v46 = vmul.f32 1.442695, %v1684_v27  ;;  %v1713_v37 = vmul.f32 %v1712_v18, %v3116_v4  ;;  %p3062_p1 = scmp.lt.s32.totalorder %s2212_s5, %s2212_s5 }
 0x177   :  { %v2838_v59 = vpop.eup %2837  ;;  %v1609_v51 = vmul.f32 %v2832_v29, %v3865_v1  ;;  %2857 = vpow2.f32 %v1687_v25  ;;  %v1695_v52 = vmul.f32 1.442695, %v1685_v60  ;;  %v1714_v49 = vmul.f32 %v1712_v18, %v3118_v6 }
 0x178   :  { %v1613_v33 = vadd.f32 %v1607_v62, %v1581_v30  ;;  %2859 = vpow2.f32 %v1689_v54  ;;  %v1697_v56 = vmul.f32 1.442695, %v1686_v36  ;;  %v1715_v35 = vmul.f32 %v1712_v18, %v3120_v8 }
 0x179   :  { %v2840_v34 = vpop.eup %2839  ;;  %v1636_v5 = vmul.f32 %v2834_v16, %v3885_v31  ;;  %v1637_v14 = vmul.f32 %v2836_v50, %v3885_v31  ;;  %2861 = vpow2.f32 %v1691_v22  ;;  %v1716_v48 = vmul.f32 %v1712_v18, %v3122_v9 }
 0x17a   :  { %v1638_v1 = vmul.f32 %v2838_v59, %v3885_v31  ;;  %2863 = vpow2.f32 %v1693_v46  ;;  %v1717_v53 = vmul.f32 %v1712_v18, %v3126_v10  ;;  %v1719_v57 = vmul.f32 1.442695, %v1713_v37 }
 0x17b   :  { %v2842_v39 = vpop.eup %2841  ;;  %2865 = vpow2.f32 %v1695_v52  ;;  %v1718_v11 = vmul.f32 %v1712_v18, %v3129_v12  ;;  %v1721_v13 = vmul.f32 1.442695, %v1714_v49  ;;  %v1744_v30 = vstv %s3904_s6  ;;  %s3057_s6 = scalar_lea.vmem %s2212_s5, 768 }
 0x17c   :  { %v2844_v44 = vpop.eup %2843  ;;  %v1614_v26 = vadd.f32 %v1608_v21, %v3894_v63  ;;  %v1639_v3 = vmul.f32 %v2840_v34, %v3885_v31  ;;  %2867 = vpow2.f32 %v1697_v56  ;;  %v1723_v7 = vmul.f32 1.442695, %v1715_v35  ;;  %p3058_p0 = scmp.ne.s32.totalorder %s2212_s5, %s3057_s6  ;;  %p3063_p2 = scmp.lt.s32.totalorder %s3057_s6, %s3057_s6 }
 0x17d   :  { %v2846_v17 = vpop.eup %2845  ;;  %v1615_v61 = vadd.f32 %v1609_v51, %v3897_v32  ;;  %v1642_v47 = vadd.f32 %v1636_v5, %v1610_v24  ;;  %v1643_v15 = vadd.f32 %v1637_v14, %v1611_v2  ;;  %v1725_v55 = vmul.f32 1.442695, %v1716_v48 }
 0x17e   :  { %v2848_v19 = vpop.eup %2847  ;;  %v1640_v0 = vmul.f32 %v2842_v39, %v3885_v31  ;;  %2869 = vpow2.f32 %v1719_v57  ;;  %v1727_v23 = vmul.f32 1.442695, %v1717_v53  ;;  %v1745_v20 = vmul.f32 %v1744_v30, %v3116_v4  ;;  %p3064_p3 = por %p3063_p2, %p3062_p1 }
 0x17f   :  { %v2850_v63 = vpop.eup %2849  ;;  %v1644_v27 = vadd.f32 %v1638_v1, %v1612_v28  ;;  %2871 = vpow2.f32 %v1721_v13  ;;  %v1729_v60 = vmul.f32 1.442695, %v1718_v11  ;;  %v1746_v25 = vmul.f32 %v1744_v30, %v3118_v6 }
 0x180   :  { %v2852_v18 = vpop.eup %2851  ;;  %v1641_v29 = vmul.f32 %v2844_v44, %v3885_v31  ;;  %v1645_v32 = vadd.f32 %v1639_v3, %v1613_v33  ;;  %2873 = vpow2.f32 %v1723_v7  ;;  %v1747_v24 = vmul.f32 %v1744_v30, %v3120_v8  ;;  %p3065_p4 = pnand %p3064_p3, %p3058_p0 }
 0x181   :  { %v2854_v62 = vpop.eup %2853  ;;  %v1668_v36 = vmul.f32 %v2846_v17, %v3912_v58  ;;  %v1669_v54 = vmul.f32 %v2848_v19, %v3912_v58  ;;  %2875 = vpow2.f32 %v1725_v55  ;;  %v1748_v16 = vmul.f32 %v1744_v30, %v3122_v9 }
 0x182   :  { %v1670_v21 = vmul.f32 %v2850_v63, %v3912_v58  ;;  %2877 = vpow2.f32 %v1727_v23  ;;  %v1749_v2 = vmul.f32 %v1744_v30, %v3126_v10  ;;  %v1751_v22 = vmul.f32 1.442695, %v1745_v20 }
 0x183   :  { %v2856_v31 = vpop.eup %2855  ;;  %v1646_v50 = vadd.f32 %v1640_v0, %v1614_v26  ;;  %2879 = vpow2.f32 %v1729_v60  ;;  %v1750_v28 = vmul.f32 %v1744_v30, %v3129_v12  ;;  %v1753_v46 = vmul.f32 1.442695, %v1746_v25 }
 0x184   :  { %v2858_v37 = vpop.eup %2857  ;;  %v1671_v59 = vmul.f32 %v2852_v18, %v3912_v58  ;;  %v1672_v51 = vmul.f32 %v2854_v62, %v3912_v58  ;;  %v1755_v52 = vmul.f32 1.442695, %v1747_v24  ;;  %v1776_v49 = vstv %s3925_s7 }
 0x185   :  { %v2860_v33 = vpop.eup %2859  ;;  %v1647_v56 = vadd.f32 %v1641_v29, %v1615_v61  ;;  %v1674_v35 = vadd.f32 %v1668_v36, %v1642_v47  ;;  %v1699_v34 = vstv %s3929_s8  ;;  %v1757_v5 = vmul.f32 1.442695, %v1748_v16 }
 0x186   :  { %v2862_v14 = vpop.eup %2861  ;;  %v1675_v48 = vadd.f32 %v1669_v54, %v1643_v15  ;;  %v1676_v1 = vadd.f32 %v1670_v21, %v1644_v27  ;;  %2881 = vpow2.f32 %v1751_v22  ;;  %v1759_v53 = vmul.f32 1.442695, %v1749_v2 }
 0x187   :  { %v2864_v57 = vpop.eup %2863  ;;  %v1673_v39 = vmul.f32 %v2856_v31, %v3912_v58  ;;  %2883 = vpow2.f32 %v1753_v46  ;;  %v1761_v11 = vmul.f32 1.442695, %v1750_v28  ;;  %v1777_v13 = vmul.f32 %v1776_v49, %v3116_v4 }
 0x188   :  { %v2866_v30 = vpop.eup %2865  ;;  %v1677_v44 = vadd.f32 %v1671_v59, %v1645_v32  ;;  %v1678_v26 = vadd.f32 %v1672_v51, %v1646_v50  ;;  %2885 = vpow2.f32 %v1755_v52  ;;  %v1778_v3 = vmul.f32 %v1776_v49, %v3118_v6 }
 0x189   :  { %v2868_v7 = vpop.eup %2867  ;;  %v1700_v17 = vmul.f32 %v2858_v37, %v1699_v34  ;;  %v1701_v61 = vmul.f32 %v2860_v33, %v1699_v34  ;;  %2887 = vpow2.f32 %v1757_v5  ;;  %v1779_v47 = vmul.f32 %v1776_v49, %v3120_v8 }
 0x18a   :  { %v1702_v15 = vmul.f32 %v2862_v14, %v1699_v34  ;;  %v1703_v55 = vmul.f32 %v2864_v57, %v1699_v34  ;;  %2889 = vpow2.f32 %v1759_v53  ;;  %v1780_v58 = vmul.f32 %v1776_v49, %v3122_v9 }
 0x18b   :  { %v2870_v19 = vpop.eup %2869  ;;  %v1704_v0 = vmul.f32 %v2866_v30, %v1699_v34  ;;  %2891 = vpow2.f32 %v1761_v11  ;;  %v1781_v23 = vmul.f32 %v1776_v49, %v3126_v10  ;;  %v1783_v20 = vmul.f32 1.442695, %v1777_v13 }
 0x18c   :  { %v2872_v63 = vpop.eup %2871  ;;  %v1679_v27 = vadd.f32 %v1673_v39, %v1647_v56  ;;  %v1705_v60 = vmul.f32 %v2868_v7, %v1699_v34  ;;  %v1782_v25 = vmul.f32 %v1776_v49, %v3129_v12  ;;  %v1785_v18 = vmul.f32 1.442695, %v1778_v3 }
 0x18d   :  { %v2874_v29 = vpop.eup %2873  ;;  %v1731_v32 = vstv %s3943_s0  ;;  %v1787_v24 = vmul.f32 1.442695, %v1779_v47  ;;  %v1808_v62 = vstv %s3948_s9  ;;  %v1706_v54 = vadd.f32 %v1700_v17, %v1674_v35 }
 0x18e   :  { %v2876_v36 = vpop.eup %2875  ;;  %v1707_v16 = vadd.f32 %v1701_v61, %v1675_v48  ;;  %v1708_v21 = vadd.f32 %v1702_v15, %v1676_v1  ;;  %v1789_v2 = vmul.f32 1.442695, %v1780_v58  ;;  %v1709_v31 = vadd.f32 %v1703_v55, %v1677_v44 }
 0x18f   :  { %v2878_v22 = vpop.eup %2877  ;;  %v1710_v50 = vadd.f32 %v1704_v0, %v1678_v26  ;;  %2893 = vpow2.f32 %v1783_v20  ;;  %v1791_v28 = vmul.f32 1.442695, %v1781_v23  ;;  %v1711_v37 = vadd.f32 %v1705_v60, %v1679_v27 }
 0x190   :  { %v2880_v46 = vpop.eup %2879  ;;  %2895 = vpow2.f32 %v1785_v18  ;;  %v1793_v59 = vmul.f32 1.442695, %v1782_v25  ;;  %v1809_v51 = vmul.f32 %v1808_v62, %v3116_v4  ;;  %v1732_v52 = vmul.f32 %v2870_v19, %v1731_v32 }
 0x191   :  { %v1733_v49 = vmul.f32 %v2872_v63, %v1731_v32  ;;  %2897 = vpow2.f32 %v1787_v24  ;;  %v1810_v33 = vmul.f32 %v1808_v62, %v3118_v6  ;;  %v1734_v56 = vmul.f32 %v2874_v29, %v1731_v32 }
 0x192   :  { %v1735_v35 = vmul.f32 %v2876_v36, %v1731_v32  ;;  %2899 = vpow2.f32 %v1789_v2  ;;  %v1811_v34 = vmul.f32 %v1808_v62, %v3120_v8  ;;  %v1736_v14 = vmul.f32 %v2878_v22, %v1731_v32 }
 0x193   :  { %v2882_v5 = vpop.eup %2881  ;;  %v1737_v48 = vmul.f32 %v2880_v46, %v1731_v32  ;;  %2901 = vpow2.f32 %v1791_v28  ;;  %v1812_v1 = vmul.f32 %v1808_v62, %v3122_v9  ;;  %v1813_v57 = vmul.f32 %v1808_v62, %v3126_v10 }
 0x194   :  { %v2884_v53 = vpop.eup %2883  ;;  %2903 = vpow2.f32 %v1793_v59  ;;  %v1815_v39 = vmul.f32 1.442695, %v1809_v51  ;;  %v1763_v13 = vstv %s3957_s10  ;;  %v1814_v30 = vmul.f32 %v1808_v62, %v3129_v12 }
 0x195   :  { %v2886_v11 = vpop.eup %2885  ;;  %v1817_v44 = vmul.f32 1.442695, %v1810_v33  ;;  %v1840_v26 = vstv %s3960_s11  ;;  %v1738_v7 = vadd.f32 %v1732_v52, %v1706_v54  ;;  %v1739_v17 = vadd.f32 %v1733_v49, %v1707_v16 }
 0x196   :  { %v2888_v3 = vpop.eup %2887  ;;  %v1740_v61 = vadd.f32 %v1734_v56, %v1708_v21  ;;  %v1819_v47 = vmul.f32 1.442695, %v1811_v34  ;;  %v1741_v55 = vadd.f32 %v1735_v35, %v1709_v31  ;;  %v1742_v58 = vadd.f32 %v1736_v14, %v1710_v50 }
 0x197   :  { %v2890_v15 = vpop.eup %2889  ;;  %v1743_v19 = vadd.f32 %v1737_v48, %v1711_v37  ;;  %v1821_v0 = vmul.f32 1.442695, %v1812_v1  ;;  %v1764_v20 = vmul.f32 %v2882_v5, %v1763_v13  ;;  %2905 = vpow2.f32 %v1815_v39 }
 0x198   :  { %v2892_v23 = vpop.eup %2891  ;;  %v1823_v63 = vmul.f32 1.442695, %v1813_v57  ;;  %v1841_v27 = vmul.f32 %v1840_v26, %v3116_v4  ;;  %v1765_v60 = vmul.f32 %v2884_v53, %v1763_v13  ;;  %2907 = vpow2.f32 %v1817_v44 }
 0x199   :  { %v1825_v25 = vmul.f32 1.442695, %v1814_v30  ;;  %v1842_v18 = vmul.f32 %v1840_v26, %v3118_v6  ;;  %v1766_v29 = vmul.f32 %v2886_v11, %v1763_v13  ;;  %v1767_v32 = vmul.f32 %v2888_v3, %v1763_v13 }
 0x19a   :  { %2909 = vpow2.f32 %v1819_v47  ;;  %v1843_v24 = vmul.f32 %v1840_v26, %v3120_v8  ;;  %v1768_v62 = vmul.f32 %v2890_v15, %v1763_v13  ;;  %v1769_v36 = vmul.f32 %v2892_v23, %v1763_v13 }
 0x19b   :  { %2911 = vpow2.f32 %v1821_v0  ;;  %v1844_v54 = vmul.f32 %v1840_v26, %v3122_v9  ;;  %v1795_v21 = vstv %s3968_s12  ;;  %v1845_v2 = vmul.f32 %v1840_v26, %v3126_v10 }
 0x19c   :  { %v2894_v16 = vpop.eup %2893  ;;  %2913 = vpow2.f32 %v1823_v63  ;;  %v1847_v22 = vmul.f32 1.442695, %v1841_v27  ;;  %v1846_v50 = vmul.f32 %v1840_v26, %v3129_v12  ;;  %v1849_v28 = vmul.f32 1.442695, %v1842_v18 }
 0x19d   :  { %v2896_v31 = vpop.eup %2895  ;;  %2915 = vpow2.f32 %v1825_v25  ;;  %v1872_v46 = vstv %s3971_s13  ;;  %v1770_v59 = vadd.f32 %v1764_v20, %v1738_v7  ;;  %v1771_v51 = vadd.f32 %v1765_v60, %v1739_v17 }
 0x19e   :  { %v2898_v37 = vpop.eup %2897  ;;  %v1772_v52 = vadd.f32 %v1766_v29, %v1740_v61  ;;  %v1851_v49 = vmul.f32 1.442695, %v1843_v24  ;;  %v1773_v56 = vadd.f32 %v1767_v32, %v1741_v55  ;;  %v1774_v35 = vadd.f32 %v1768_v62, %v1742_v58 }
 0x19f   :  { %v2900_v33 = vpop.eup %2899  ;;  %v1775_v34 = vadd.f32 %v1769_v36, %v1743_v19  ;;  %v1853_v5 = vmul.f32 1.442695, %v1844_v54  ;;  %v1796_v48 = vmul.f32 %v2894_v16, %v1795_v21  ;;  %2917 = vpow2.f32 %v1847_v22 }
 0x1a0   :  { %v2902_v14 = vpop.eup %2901  ;;  %v1855_v1 = vmul.f32 1.442695, %v1845_v2  ;;  %v1873_v53 = vmul.f32 %v1872_v46, %v3116_v4  ;;  %v1797_v39 = vmul.f32 %v2896_v31, %v1795_v21  ;;  %2919 = vpow2.f32 %v1849_v28 }
 0x1a1   :  { %v2904_v57 = vpop.eup %2903  ;;  %v1857_v11 = vmul.f32 1.442695, %v1846_v50  ;;  %v1874_v13 = vmul.f32 %v1872_v46, %v3118_v6  ;;  %v1798_v30 = vmul.f32 %v2898_v37, %v1795_v21  ;;  %v1799_v44 = vmul.f32 %v2900_v33, %v1795_v21 }
 0x1a2   :  { %2921 = vpow2.f32 %v1851_v49  ;;  %v1875_v26 = vmul.f32 %v1872_v46, %v3120_v8  ;;  %v1800_v3 = vmul.f32 %v2902_v14, %v1795_v21  ;;  %v1876_v7 = vmul.f32 %v1872_v46, %v3122_v9 }
 0x1a3   :  { %2923 = vpow2.f32 %v1853_v5  ;;  %v1904_v17 = vstv %s3979_s14  ;;  %v1801_v61 = vmul.f32 %v2904_v57, %v1795_v21  ;;  %v1877_v47 = vmul.f32 %v1872_v46, %v3126_v10 }
 0x1a4   :  { %2925 = vpow2.f32 %v1855_v1  ;;  %v1879_v15 = vmul.f32 1.442695, %v1873_v53  ;;  %v2906_v55 = vpop.eup %2905  ;;  %v1827_v58 = vstv %s3984_s15  ;;  %v1878_v19 = vmul.f32 %v1872_v46, %v3129_v12 }
 0x1a5   :  { %2927 = vpow2.f32 %v1857_v11  ;;  %v1881_v0 = vmul.f32 1.442695, %v1874_v13  ;;  %v2908_v23 = vpop.eup %2907  ;;  %v1802_v20 = vadd.f32 %v1796_v48, %v1770_v59  ;;  %v1803_v63 = vadd.f32 %v1797_v39, %v1771_v51 }
 0x1a6   :  { %v1883_v27 = vmul.f32 1.442695, %v1875_v26  ;;  %v1905_v60 = vmul.f32 %v1904_v17, %v3116_v4  ;;  %v1804_v18 = vadd.f32 %v1798_v30, %v1772_v52  ;;  %v1805_v29 = vadd.f32 %v1799_v44, %v1773_v56 }
 0x1a7   :  { %v2910_v25 = vpop.eup %2909  ;;  %v1806_v32 = vadd.f32 %v1800_v3, %v1774_v35  ;;  %v1885_v24 = vmul.f32 1.442695, %v1876_v7  ;;  %v1807_v36 = vadd.f32 %v1801_v61, %v1775_v34  ;;  %2929 = vpow2.f32 %v1879_v15 }
 0x1a8   :  { %v2912_v62 = vpop.eup %2911  ;;  %v1887_v54 = vmul.f32 1.442695, %v1877_v47  ;;  %v1906_v16 = vmul.f32 %v1904_v17, %v3118_v6  ;;  %v1828_v2 = vmul.f32 %v2906_v55, %v1827_v58  ;;  %2931 = vpow2.f32 %v1881_v0 }
 0x1a9   :  { %v2914_v21 = vpop.eup %2913  ;;  %v1889_v22 = vmul.f32 1.442695, %v1878_v19  ;;  %v1907_v31 = vmul.f32 %v1904_v17, %v3120_v8  ;;  %v1829_v28 = vmul.f32 %v2908_v23, %v1827_v58  ;;  %2933 = vpow2.f32 %v1883_v27 }
 0x1aa   :  { %v2916_v50 = vpop.eup %2915  ;;  %v1908_v46 = vmul.f32 %v1904_v17, %v3122_v9  ;;  %v1911_v37 = vmul.f32 1.442695, %v1905_v60  ;;  %v1830_v59 = vmul.f32 %v2910_v25, %v1827_v58  ;;  %2935 = vpow2.f32 %v1885_v24 }
 0x1ab   :  { %v1909_v51 = vmul.f32 %v1904_v17, %v3126_v10  ;;  %v1936_v52 = vstv %s3991_s16  ;;  %v1831_v49 = vmul.f32 %v2912_v62, %v1827_v58  ;;  %2937 = vpow2.f32 %v1887_v54 }
 0x1ac   :  { %v1910_v33 = vmul.f32 %v1904_v17, %v3129_v12  ;;  %v1913_v56 = vmul.f32 1.442695, %v1906_v16  ;;  %v2918_v35 = vpop.eup %2917  ;;  %v1832_v34 = vmul.f32 %v2914_v21, %v1827_v58  ;;  %v1833_v5 = vmul.f32 %v2916_v50, %v1827_v58 }
 0x1ad   :  { %2939 = vpow2.f32 %v1889_v22  ;;  %v1915_v14 = vmul.f32 1.442695, %v1907_v31  ;;  %v2920_v48 = vpop.eup %2919  ;;  %v1917_v1 = vmul.f32 1.442695, %v1908_v46  ;;  %v1937_v53 = vmul.f32 %v1936_v52, %v3116_v4 }
 0x1ae   :  { %2941 = vpow2.f32 %v1911_v37  ;;  %v1834_v39 = vadd.f32 %v1828_v2, %v1802_v20  ;;  %v1835_v11 = vadd.f32 %v1829_v28, %v1803_v63  ;;  %v1859_v13 = vstv %s3999_s17 }
 0x1af   :  { %v2922_v57 = vpop.eup %2921  ;;  %v1919_v30 = vmul.f32 1.442695, %v1909_v51  ;;  %v1836_v26 = vadd.f32 %v1830_v59, %v1804_v18  ;;  %2943 = vpow2.f32 %v1913_v56  ;;  %v1921_v3 = vmul.f32 1.442695, %v1910_v33 }
 0x1b0   :  { %v2924_v44 = vpop.eup %2923  ;;  %v1938_v7 = vmul.f32 %v1936_v52, %v3118_v6  ;;  %v1837_v61 = vadd.f32 %v1831_v49, %v1805_v29  ;;  %v1838_v47 = vadd.f32 %v1832_v34, %v1806_v32  ;;  %v1839_v15 = vadd.f32 %v1833_v5, %v1807_v36 }
 0x1b1   :  { %v2926_v17 = vpop.eup %2925  ;;  %2945 = vpow2.f32 %v1915_v14  ;;  %v1860_v58 = vmul.f32 %v2918_v35, %v1859_v13  ;;  %v1939_v19 = vmul.f32 %v1936_v52, %v3120_v8  ;;  %v1943_v0 = vmul.f32 1.442695, %v1937_v53 }
 0x1b2   :  { %v2928_v55 = vpop.eup %2927  ;;  %2947 = vpow2.f32 %v1917_v1  ;;  %v1861_v23 = vmul.f32 %v2920_v48, %v1859_v13  ;;  %v1940_v20 = vmul.f32 %v1936_v52, %v3122_v9  ;;  %v1968_v63 = vstv %s4004_s18 }
 0x1b3   :  { %2949 = vpow2.f32 %v1919_v30  ;;  %v1862_v27 = vmul.f32 %v2922_v57, %v1859_v13  ;;  %v1941_v60 = vmul.f32 %v1936_v52, %v3126_v10  ;;  %v1945_v25 = vmul.f32 1.442695, %v1938_v7 }
 0x1b4   :  { %2951 = vpow2.f32 %v1921_v3  ;;  %v2930_v18 = vpop.eup %2929  ;;  %v1863_v29 = vmul.f32 %v2924_v44, %v1859_v13  ;;  %v1864_v32 = vmul.f32 %v2926_v17, %v1859_v13  ;;  %v1865_v24 = vmul.f32 %v2928_v55, %v1859_v13 }
 0x1b5   :  { %v1942_v62 = vmul.f32 %v1936_v52, %v3129_v12  ;;  %v2932_v36 = vpop.eup %2931  ;;  %v1891_v54 = vstv %s4009_s19  ;;  %2953 = vpow2.f32 %v1943_v0  ;;  %v1947_v16 = vmul.f32 1.442695, %v1939_v19 }
 0x1b6   :  { %v1969_v21 = vmul.f32 %v1968_v63, %v3116_v4  ;;  %v2934_v2 = vpop.eup %2933  ;;  %v1866_v22 = vadd.f32 %v1860_v58, %v1834_v39  ;;  %v1867_v31 = vadd.f32 %v1861_v23, %v1835_v11  ;;  %v4028_v50 = vstv %s4012_s20 }
 0x1b7   :  { %v1949_v28 = vmul.f32 1.442695, %v1940_v20  ;;  %v2936_v46 = vpop.eup %2935  ;;  %v1868_v37 = vadd.f32 %v1862_v27, %v1836_v26  ;;  %2955 = vpow2.f32 %v1945_v25  ;;  %v1951_v59 = vmul.f32 1.442695, %v1941_v60 }
 0x1b8   :  { %v1970_v51 = vmul.f32 %v1968_v63, %v3118_v6  ;;  %v2938_v52 = vpop.eup %2937  ;;  %v1869_v49 = vadd.f32 %v1863_v29, %v1837_v61  ;;  %v1870_v33 = vadd.f32 %v1864_v32, %v1838_v47  ;;  %v1871_v56 = vadd.f32 %v1865_v24, %v1839_v15 }
 0x1b9   :  { %v1953_v35 = vmul.f32 1.442695, %v1942_v62  ;;  %v1892_v5 = vmul.f32 %v2930_v18, %v1891_v54  ;;  %2957 = vpow2.f32 %v1947_v16  ;;  %v1971_v14 = vmul.f32 %v1968_v63, %v3120_v8 }
 0x1ba   :  { %v2940_v34 = vpop.eup %2939  ;;  %v1975_v48 = vmul.f32 1.442695, %v1969_v21  ;;  %v1893_v53 = vmul.f32 %v2932_v36, %v1891_v54  ;;  %v1894_v57 = vmul.f32 %v2934_v2, %v1891_v54  ;;  %2959 = vpow2.f32 %v1949_v28 }
 0x1bb   :  { %v2942_v1 = vpop.eup %2941  ;;  %v1972_v39 = vmul.f32 %v1968_v63, %v3122_v9  ;;  %v1895_v11 = vmul.f32 %v2936_v46, %v1891_v54  ;;  %2961 = vpow2.f32 %v1951_v59  ;;  %v1973_v13 = vmul.f32 %v1968_v63, %v3126_v10 }
 0x1bc   :  { %v1977_v30 = vmul.f32 1.442695, %v1970_v51  ;;  %v2944_v44 = vpop.eup %2943  ;;  %v1896_v26 = vmul.f32 %v2938_v52, %v1891_v54  ;;  %v1897_v3 = vmul.f32 %v2940_v34, %v1891_v54  ;;  %2963 = vpow2.f32 %v1953_v35 }
 0x1bd   :  { %v1974_v7 = vmul.f32 %v1968_v63, %v3129_v12  ;;  %v1898_v61 = vadd.f32 %v1892_v5, %v1866_v22  ;;  %v1924_v47 = vmul.f32 %v2942_v1, %v4028_v50  ;;  %2965 = vpow2.f32 %v1975_v48 }
 0x1be   :  { %v2946_v17 = vpop.eup %2945  ;;  %v1979_v15 = vmul.f32 1.442695, %v1971_v14  ;;  %v1899_v58 = vadd.f32 %v1893_v53, %v1867_v31  ;;  %v4041_v19 = vstv %s4021_s21  ;;  %v1981_v0 = vmul.f32 1.442695, %v1972_v39 }
 0x1bf   :  { %v2948_v55 = vpop.eup %2947  ;;  %v2000_v23 = vstv %s4025_s22  ;;  %v1900_v27 = vadd.f32 %v1894_v57, %v1868_v37  ;;  %v1901_v60 = vadd.f32 %v1895_v11, %v1869_v49  ;;  %2967 = vpow2.f32 %v1977_v30 }
 0x1c0   :  { %v2950_v20 = vpop.eup %2949  ;;  %v1983_v25 = vmul.f32 1.442695, %v1973_v13  ;;  %v1902_v29 = vadd.f32 %v1896_v26, %v1870_v33  ;;  %v1903_v63 = vadd.f32 %v1897_v3, %v1871_v56  ;;  %v1925_v32 = vmul.f32 %v2944_v44, %v4028_v50 }
 0x1c1   :  { %v2952_v18 = vpop.eup %2951  ;;  %v1985_v24 = vmul.f32 1.442695, %v1974_v7  ;;  %v1926_v62 = vmul.f32 %v2946_v17, %v4028_v50  ;;  %v1930_v36 = vadd.f32 %v1924_v47, %v1898_v61  ;;  %2969 = vpow2.f32 %v1979_v15 }
 0x1c2   :  { %v2001_v54 = vmul.f32 %v2000_v23, %v3116_v4  ;;  %v2954_v16 = vpop.eup %2953  ;;  %v1927_v21 = vmul.f32 %v2948_v55, %v4028_v50  ;;  %v1928_v2 = vmul.f32 %v2950_v20, %v4028_v50  ;;  %2971 = vpow2.f32 %v1981_v0 }
 0x1c3   :  { %v2002_v22 = vmul.f32 %v2000_v23, %v3118_v6  ;;  %v1929_v31 = vmul.f32 %v2952_v18, %v4028_v50  ;;  %2973 = vpow2.f32 %v1983_v25  ;;  %v4054_v28 = vstv %s4033_s23 }
 0x1c4   :  { %v2003_v46 = vmul.f32 %v2000_v23, %v3120_v8  ;;  %v2956_v37 = vpop.eup %2955  ;;  %v2004_v59 = vmul.f32 %v2000_v23, %v3122_v9  ;;  %v2005_v51 = vmul.f32 %v2000_v23, %v3126_v10  ;;  %v2006_v52 = vmul.f32 %v2000_v23, %v3129_v12 }
 0x1c5   :  { %v2032_v49 = vstv %s4036_s24  ;;  %v1931_v33 = vadd.f32 %v1925_v32, %v1899_v58  ;;  %v1956_v56 = vmul.f32 %v2954_v16, %v4041_v19  ;;  %2975 = vpow2.f32 %v1985_v24 }
 0x1c6   :  { %v2007_v35 = vmul.f32 1.442695, %v2001_v54  ;;  %v2958_v34 = vpop.eup %2957  ;;  %v1932_v50 = vadd.f32 %v1926_v62, %v1900_v27  ;;  %v1933_v5 = vadd.f32 %v1927_v21, %v1901_v60  ;;  %v1934_v14 = vadd.f32 %v1928_v2, %v1902_v29 }
 0x1c7   :  { %v2009_v48 = vmul.f32 1.442695, %v2002_v22  ;;  %v2960_v1 = vpop.eup %2959  ;;  %v1935_v53 = vadd.f32 %v1929_v31, %v1903_v63  ;;  %v1957_v57 = vmul.f32 %v2956_v37, %v4041_v19  ;;  %v2011_v39 = vmul.f32 1.442695, %v2003_v46 }
 0x1c8   :  { %v2033_v11 = vmul.f32 %v2032_v49, %v3116_v4  ;;  %v2962_v13 = vpop.eup %2961  ;;  %v2013_v30 = vmul.f32 1.442695, %v2004_v59  ;;  %v2015_v44 = vmul.f32 1.442695, %v2005_v51  ;;  %v2017_v26 = vmul.f32 1.442695, %v2006_v52 }
 0x1c9   :  { %v2034_v3 = vmul.f32 %v2032_v49, %v3118_v6  ;;  %v2964_v7 = vpop.eup %2963  ;;  %v1958_v17 = vmul.f32 %v2958_v34, %v4041_v19  ;;  %v1962_v61 = vadd.f32 %v1956_v56, %v1930_v36  ;;  %2977 = vpow2.f32 %v2007_v35 }
 0x1ca   :  { %v2035_v47 = vmul.f32 %v2032_v49, %v3120_v8  ;;  %v2966_v15 = vpop.eup %2965  ;;  %v1959_v55 = vmul.f32 %v2960_v1, %v4041_v19  ;;  %2979 = vpow2.f32 %v2009_v48  ;;  %v4073_v58 = vstv %s4047_s25 }
 0x1cb   :  { %v2036_v0 = vmul.f32 %v2032_v49, %v3122_v9  ;;  %v1960_v23 = vmul.f32 %v2962_v13, %v4041_v19  ;;  %2981 = vpow2.f32 %v2011_v39  ;;  %v2037_v20 = vmul.f32 %v2032_v49, %v3126_v10 }
 0x1cc   :  { %v2039_v27 = vmul.f32 1.442695, %v2033_v11  ;;  %v2968_v60 = vpop.eup %2967  ;;  %v1961_v25 = vmul.f32 %v2964_v7, %v4041_v19  ;;  %2983 = vpow2.f32 %v2013_v30  ;;  %v2038_v18 = vmul.f32 %v2032_v49, %v3129_v12 }
 0x1cd   :  { %v2041_v29 = vmul.f32 1.442695, %v2034_v3  ;;  %v1963_v63 = vadd.f32 %v1957_v57, %v1931_v33  ;;  %v1988_v32 = vmul.f32 %v2966_v15, %v4054_v28  ;;  %2985 = vpow2.f32 %v2015_v44 }
 0x1ce   :  { %v2043_v24 = vmul.f32 1.442695, %v2035_v47  ;;  %v2970_v62 = vpop.eup %2969  ;;  %v1964_v36 = vadd.f32 %v1958_v17, %v1932_v50  ;;  %v1965_v54 = vadd.f32 %v1959_v55, %v1933_v5  ;;  %2987 = vpow2.f32 %v2017_v26 }
 0x1cf   :  { %v2045_v16 = vmul.f32 1.442695, %v2036_v0  ;;  %v2972_v21 = vpop.eup %2971  ;;  %v1966_v2 = vadd.f32 %v1960_v23, %v1934_v14  ;;  %v1989_v19 = vmul.f32 %v2968_v60, %v4054_v28  ;;  %2989 = vpow2.f32 %v2039_v27 }
 0x1d0   :  { %v2047_v22 = vmul.f32 1.442695, %v2037_v20  ;;  %v2974_v31 = vpop.eup %2973  ;;  %v1967_v46 = vadd.f32 %v1961_v25, %v1935_v53  ;;  %2991 = vpow2.f32 %v2041_v29  ;;  %v2049_v37 = vmul.f32 1.442695, %v2038_v18 }
 0x1d1   :  { %v2064_v59 = vstv %s4062_s26  ;;  %v1990_v51 = vmul.f32 %v2970_v62, %v4054_v28  ;;  %v4086_v52 = vadd.f32 %v1988_v32, %v1962_v61  ;;  %2993 = vpow2.f32 %v2043_v24 }
 0x1d2   :  { %v2128_v49 = vmax.f32 %v3098_v38, 1e-14  ;;  %v2976_v33 = vpop.eup %2975  ;;  %v1991_v56 = vmul.f32 %v2972_v21, %v4054_v28  ;;  %2995 = vpow2.f32 %v2045_v16  ;;  %v4091_v35 = vstv %s4069_s27 }
 0x1d3   :  { %v2129_v34 = vmax.f32 %v3100_v40, 1e-14  ;;  %v4094_v50 = vadd.f32 %v1989_v19, %v1963_v63  ;;  %2997 = vpow2.f32 %v2047_v22  ;;  %v2065_v5 = vmul.f32 %v2064_v59, %v3116_v4 }
 0x1d4   :  { %v2130_v14 = vmax.f32 %v3102_v41, 1e-14  ;;  %v1992_v48 = vmul.f32 %v2974_v31, %v4054_v28  ;;  %2999 = vpow2.f32 %v2049_v37  ;;  %v2066_v1 = vmul.f32 %v2064_v59, %v3118_v6 }
 0x1d5   :  { %v2131_v53 = vmax.f32 %v3104_v42, 1e-14  ;;  %v1993_v57 = vmul.f32 %v2976_v33, %v4054_v28  ;;  %v2067_v39 = vmul.f32 %v2064_v59, %v3120_v8  ;;  %v2132_v11 = vmax.f32 %v3106_v43, 1e-14 }
 0x1d6   :  { %3001 = vlog2.f32 %v2128_v49  ;;  %v2978_v13 = vpop.eup %2977  ;;  %v2068_v30 = vmul.f32 %v2064_v59, %v3122_v9  ;;  %v2096_v44 = vstv %s4081_s28  ;;  %v2133_v26 = vmax.f32 %v3109_v45, 1e-14 }
 0x1d7   :  { %3003 = vlog2.f32 %v2129_v34  ;;  %v2980_v3 = vpop.eup %2979  ;;  %v1996_v7 = vadd.f32 %v1990_v51, %v1964_v36  ;;  %v2069_v17 = vmul.f32 %v2064_v59, %v3126_v10  ;;  %v2071_v61 = vmul.f32 1.442695, %v2065_v5 }
 0x1d8   :  { %3005 = vlog2.f32 %v2130_v14  ;;  %v2982_v47 = vpop.eup %2981  ;;  %v1997_v28 = vadd.f32 %v1991_v56, %v1965_v54  ;;  %v2070_v15 = vmul.f32 %v2064_v59, %v3129_v12  ;;  %v2073_v55 = vmul.f32 1.442695, %v2066_v1 }
 0x1d9   :  { %3007 = vlog2.f32 %v2131_v53  ;;  %v2984_v0 = vpop.eup %2983  ;;  %v1998_v23 = vadd.f32 %v1992_v48, %v1966_v2  ;;  %v2075_v20 = vmul.f32 1.442695, %v2067_v39  ;;  %v2097_v27 = vmul.f32 %v2096_v44, %v3116_v4 }
 0x1da   :  { %3009 = vlog2.f32 %v2132_v11  ;;  %v2986_v60 = vpop.eup %2985  ;;  %v1999_v25 = vadd.f32 %v1993_v57, %v1967_v46  ;;  %v2077_v18 = vmul.f32 1.442695, %v2068_v30  ;;  %v2098_v29 = vmul.f32 %v2096_v44, %v3118_v6 }
 0x1db   :  { %3011 = vlog2.f32 %v2133_v26  ;;  %v2988_v63 = vpop.eup %2987  ;;  %v2020_v32 = vmul.f32 %v2978_v13, %v4073_v58  ;;  %v2079_v24 = vmul.f32 1.442695, %v2069_v17  ;;  %v2099_v62 = vmul.f32 %v2096_v44, %v3120_v8 }
 0x1dc   :  { %3013 = vpow2.f32 %v2071_v61  ;;  %v2990_v36 = vpop.eup %2989  ;;  %v2021_v4 = vmul.f32 %v2980_v3, %v4073_v58  ;;  %v2081_v54 = vmul.f32 1.442695, %v2070_v15  ;;  %v2100_v16 = vmul.f32 %v2096_v44, %v3122_v9 }
 0x1dd   :  { %3015 = vpow2.f32 %v2073_v55  ;;  %v4121_v21 = vpop.eup %2991  ;;  %v2022_v6 = vmul.f32 %v2982_v47, %v4073_v58  ;;  %v2101_v2 = vmul.f32 %v2096_v44, %v3126_v10  ;;  %v2103_v19 = vmul.f32 1.442695, %v2097_v27 }
 0x1de   :  { %3017 = vpow2.f32 %v2075_v20  ;;  %v4125_v22 = vpop.eup %2993  ;;  %v2023_v8 = vmul.f32 %v2984_v0, %v4073_v58  ;;  %v2102_v31 = vmul.f32 %v2096_v44, %v3129_v12  ;;  %v2105_v46 = vmul.f32 1.442695, %v2098_v29 }
 0x1df   :  { %3019 = vpow2.f32 %v2077_v18  ;;  %v4129_v37 = vpop.eup %2995  ;;  %v2024_v9 = vmul.f32 %v2986_v60, %v4073_v58  ;;  %v2025_v59 = vmul.f32 %v2988_v63, %v4073_v58  ;;  %v2107_v51 = vmul.f32 1.442695, %v2099_v62 }
 0x1e0   :  { %3021 = vpow2.f32 %v2079_v24  ;;  %v4133_v49 = vpop.eup %2997  ;;  %v4136_v10 = vadd.f32 %v2020_v32, %v4086_v52  ;;  %v4139_v33 = vstv %s4108_s29  ;;  %v2109_v56 = vmul.f32 1.442695, %v2100_v16 }
 0x1e1   :  { %3023 = vpow2.f32 %v2081_v54  ;;  %v4141_v12 = vpop.eup %2999  ;;  %v4144_v34 = vadd.f32 %v2021_v4, %v4094_v50  ;;  %v4146_v5 = vadd.f32 %v2022_v6, %v1996_v7  ;;  %v2111_v58 = vmul.f32 1.442695, %v2101_v2 }
 0x1e2   :  { %3025 = vpow2.f32 %v2103_v19  ;;  %v4148_v48 = vadd.f32 %v2023_v8, %v1997_v28  ;;  %v2113_v52 = vmul.f32 1.442695, %v2102_v31  ;;  %v2159_v1 = vstv %s4112_s30 }
 0x1e3   :  { %v3002_v14 = vpop.eup %3001  ;;  %3027 = vpow2.f32 %v2105_v46  ;;  %v4151_v57 = vadd.f32 %v2024_v9, %v1998_v23  ;;  %v4153_v39 = vadd.f32 %v2025_v59, %v1999_v25  ;;  %v2052_v13 = vmul.f32 %v2990_v36, %v4091_v35 }
 0x1e4   :  { %v3004_v53 = vpop.eup %3003  ;;  %3029 = vpow2.f32 %v2107_v51  ;;  %v2135_v11 = vmul.f32 0.6931472, %v3002_v14  ;;  %v2152_v44 = vstv %s4117_s2  ;;  %v2160_v17 = vmul.f32 %v2159_v1, %v3098_v38 }
 0x1e5   :  { %v3006_v50 = vpop.eup %3005  ;;  %3031 = vpow2.f32 %v2109_v56  ;;  %v2137_v30 = vmul.f32 0.6931472, %v3004_v53  ;;  %v2161_v15 = vmul.f32 %v2159_v1, %v3100_v40  ;;  %v2162_v27 = vmul.f32 %v2159_v1, %v3102_v41 }
 0x1e6   :  { %v3008_v26 = vpop.eup %3007  ;;  %3033 = vpow2.f32 %v2111_v58  ;;  %v2139_v3 = vmul.f32 0.6931472, %v3006_v50  ;;  %v2146_v7 = vmul.f32 2.5, %v2135_v11  ;;  %v2163_v38 = vmul.f32 %v2159_v1, %v3104_v42 }
 0x1e7   :  { %v3010_v61 = vpop.eup %3009  ;;  %3035 = vpow2.f32 %v2113_v52  ;;  %v2141_v47 = vmul.f32 0.6931472, %v3008_v26  ;;  %v2147_v28 = vmul.f32 2.5, %v2137_v30  ;;  %v2164_v62 = vmul.f32 %v2159_v1, %v3106_v43 }
 0x1e8   :  { %v3012_v55 = vpop.eup %3011  ;;  %v2143_v0 = vmul.f32 0.6931472, %v3010_v61  ;;  %v2148_v23 = vmul.f32 2.5, %v2139_v3  ;;  %v2153_v20 = vsub.f32 %v2152_v44, %v2146_v7  ;;  %v2165_v16 = vmul.f32 %v2159_v1, %v3109_v45 }
 0x1e9   :  { %v3014_v60 = vpop.eup %3013  ;;  %v2145_v25 = vmul.f32 0.6931472, %v3012_v55  ;;  %v2149_v18 = vmul.f32 2.5, %v2141_v47  ;;  %v2154_v29 = vsub.f32 %v2152_v44, %v2147_v28  ;;  %v2053_v41 = vmul.f32 %v4121_v21, %v4091_v35 }
 0x1ea   :  { %v3016_v63 = vpop.eup %3015  ;;  %v2150_v32 = vmul.f32 2.5, %v2143_v0  ;;  %v2155_v24 = vsub.f32 %v2152_v44, %v2148_v23  ;;  %v2166_v36 = vsub.f32 %v2153_v20, %v2160_v17  ;;  %v2054_v46 = vmul.f32 %v4125_v22, %v4091_v35 }
 0x1eb   :  { %v3018_v4 = vpop.eup %3017  ;;  %v2151_v40 = vmul.f32 2.5, %v2145_v25  ;;  %v2156_v54 = vsub.f32 %v2152_v44, %v2149_v18  ;;  %v2167_v6 = vsub.f32 %v2154_v29, %v2161_v15  ;;  %v2058_v56 = vadd.f32 %v2052_v13, %v4136_v10 }
 0x1ec   :  { %v3020_v2 = vpop.eup %3019  ;;  %v2157_v19 = vsub.f32 %v2152_v44, %v2150_v32  ;;  %v2168_v8 = vsub.f32 %v2155_v24, %v2162_v27  ;;  %v2172_v42 = vmin.f32 %v2166_v36, 85.0  ;;  %v2115_v1 = vstv %s4158_s3 }
 0x1ed   :  { %v3022_v31 = vpop.eup %3021  ;;  %v2158_v43 = vsub.f32 %v2152_v44, %v2151_v40  ;;  %v2169_v9 = vsub.f32 %v2156_v54, %v2163_v38  ;;  %v2173_v59 = vmin.f32 %v2167_v6, 85.0  ;;  %v2055_v30 = vmul.f32 %v4129_v37, %v4091_v35 }
 0x1ee   :  { %v3024_v51 = vpop.eup %3023  ;;  %v2170_v45 = vsub.f32 %v2157_v19, %v2164_v62  ;;  %v2174_v58 = vmin.f32 %v2168_v8, 85.0  ;;  %v2178_v14 = vmul.f32 1.442695, %v2172_v42  ;;  %v2059_v3 = vadd.f32 %v2053_v41, %v4144_v34 }
 0x1ef   :  { %v3026_v52 = vpop.eup %3025  ;;  %v2171_v53 = vsub.f32 %v2158_v43, %v2165_v16  ;;  %v2175_v21 = vmin.f32 %v2169_v9, 85.0  ;;  %v2180_v11 = vmul.f32 1.442695, %v2173_v59  ;;  %v2056_v17 = vmul.f32 %v4133_v49, %v4091_v35 }
 0x1f0   :  { %v3028_v50 = vpop.eup %3027  ;;  %v2176_v26 = vmin.f32 %v2170_v45, 85.0  ;;  %3037 = vpow2.f32 %v2178_v14  ;;  %v2182_v22 = vmul.f32 1.442695, %v2174_v58  ;;  %v2084_v61 = vmul.f32 %v3014_v60, %v4139_v33 }
 0x1f1   :  { %v3030_v44 = vpop.eup %3029  ;;  %v2177_v7 = vmin.f32 %v2171_v53, 85.0  ;;  %3039 = vpow2.f32 %v2180_v11  ;;  %v2184_v10 = vmul.f32 1.442695, %v2175_v21  ;;  %v2057_v37 = vmul.f32 %v4141_v12, %v4091_v35 }
 0x1f2   :  { %v3032_v13 = vpop.eup %3031  ;;  %3041 = vpow2.f32 %v2182_v22  ;;  %v2186_v47 = vmul.f32 1.442695, %v2176_v26  ;;  %v2085_v15 = vmul.f32 %v3016_v63, %v4139_v33  ;;  %v2060_v0 = vadd.f32 %v2054_v46, %v4146_v5 }
 0x1f3   :  { %v3034_v28 = vpop.eup %3033  ;;  %3043 = vpow2.f32 %v2184_v10  ;;  %v2188_v55 = vmul.f32 1.442695, %v2177_v7  ;;  %v2086_v23 = vmul.f32 %v3018_v4, %v4139_v33  ;;  %v2061_v49 = vadd.f32 %v2055_v30, %v4148_v48 }
 0x1f4   :  { %v3036_v34 = vpop.eup %3035  ;;  %3045 = vpow2.f32 %v2186_v47  ;;  %v2087_v20 = vmul.f32 %v3020_v2, %v4139_v33  ;;  %v2062_v27 = vadd.f32 %v2056_v17, %v4151_v57  ;;  %v2088_v60 = vmul.f32 %v3022_v31, %v4139_v33 }
 0x1f5   :  { %3047 = vpow2.f32 %v2188_v55  ;;  %v2090_v35 = vadd.f32 %v2084_v61, %v2058_v56  ;;  %v2116_v12 = vmul.f32 %v3026_v52, %v2115_v1  ;;  %v2063_v25 = vadd.f32 %v2057_v37, %v4153_v39 }
 0x1f6   :  { %v2089_v18 = vmul.f32 %v3024_v51, %v4139_v33  ;;  %v2091_v29 = vadd.f32 %v2085_v15, %v2059_v3  ;;  %v2117_v5 = vmul.f32 %v3028_v50, %v2115_v1  ;;  %v2092_v38 = vadd.f32 %v2086_v23, %v2060_v0 }
 0x1f7   :  { %v2118_v63 = vmul.f32 %v3030_v44, %v2115_v1  ;;  %v2093_v32 = vadd.f32 %v2087_v20, %v2061_v49  ;;  %v2119_v24 = vmul.f32 %v3032_v13, %v2115_v1  ;;  %v2094_v48 = vadd.f32 %v2088_v60, %v2062_v27 }
 0x1f8   :  { %v2120_v62 = vmul.f32 %v3034_v28, %v2115_v1  ;;  %v2122_v36 = vadd.f32 %v2116_v12, %v2090_v35  ;;  %v2095_v4 = vadd.f32 %v2089_v18, %v2063_v25  ;;  %v2121_v40 = vmul.f32 %v3036_v34, %v2115_v1 }
 0x1f9   :  { %v2123_v57 = vadd.f32 %v2117_v5, %v2091_v29  ;;  %v2124_v54 = vadd.f32 %v2118_v63, %v2092_v38  ;;  %v2125_v6 = vadd.f32 %v2119_v24, %v2093_v32 }
 0x1fa   :  { %v2126_v41 = vadd.f32 %v2120_v62, %v2094_v48  ;;  %v2127_v33 = vadd.f32 %v2121_v40, %v2095_v4 }
 0x1fd   :  { %v3038_v16 = vpop.eup %3037 }
 0x1fe   :  { %v3040_v2 = vpop.eup %3039  ;;  %v2190_v39 = vmul.f32 %v3038_v16, %v2122_v36 }
 0x1ff   :  { %v3042_v19 = vpop.eup %3041  ;;  %v2191_v8 = vmul.f32 %v3040_v2, %v2123_v57 }
 0x200   :  { %v3044_v42 = vpop.eup %3043  ;;  %v2192_v31 = vmul.f32 %v3042_v19, %v2124_v54  ;;  %2196 = vst [vmem:[#allocation5] sm:$0xff] %v2190_v39 }
 0x201   :  { %v3046_v46 = vpop.eup %3045  ;;  %v2193_v43 = vmul.f32 %v3044_v42, %v2125_v6  ;;  %2197 = vst [vmem:[#allocation5 + $0x8] sm:$0xff] %v2191_v8 }
 0x202   :  { %v3048_v9 = vpop.eup %3047  ;;  %v2194_v59 = vmul.f32 %v3046_v46, %v2126_v41  ;;  %2198 = vst [vmem:[#allocation5 + $0x10] sm:$0xff] %v2192_v31 }
 0x203   :  { %v2195_v51 = vmul.f32 %v3048_v9, %v2127_v33  ;;  %2199 = vst [vmem:[#allocation5 + $0x18] sm:$0xff] %v2193_v43 }
 0x204   :  { %2200 = vst [vmem:[#allocation5 + $0x20] sm:$0xff] %v2194_v59 }
 0x205   :  { %2201 = vst [vmem:[#allocation5 + $0x28] sm:$0xff] %v2195_v51 }
 0x206   :  { %3068 = shalt.err (!%p3065_p4)
}
 0x207   :  { %s3083_s7 = smov 128   ;;  %s3084_s8 = smov 8  }
 0x208   :  { %2217 = dma.vmem_to_hbm [thread:$0]  %s2212_s5, 768, %s4192_s1, [#allocation3], %s3083_s7, %s3083_s7, %s3084_s8  }
 0x209   :  { %3079 = dma.done.wait [#allocation3], 768  }
 0x20a   :  { %3080 = vsyncadd [#allocation3], 4294966528 }
 0x20b   :  { %2221 = vsyncpa [#allocation3], 1 }
 0x20c   :  { %2222 = vsyncpa [#allocation4], 1 }

</bundles_post_ra>
